<compile_context>
chip_gen: v7x
topology: tpu7x:2x2x1
jax: 0.10.0
libtpu: 0.0.40
codegen_flags: <defaults>
</compile_context>

<pallas_src>
import numpy as np
import jax
import jax.numpy as jnp
from jax import lax
from jax.experimental import pallas as pl
from jax.experimental.pallas import tpu as pltpu

OUTSIZE = (2, 10)                 # spline parameters, as in the module
INSIZE = (4, 16, 16)              # small (C, H, W), NCHW input like PyTorch


# ---------------------------------------------------------------------------
# The single fused Pallas kernel (one grid step == one lane-packed image slab)
# ---------------------------------------------------------------------------
def _fused_forward_kernel(
    x_ref,                                   # [Cin, n*HW]        bf16 (raw input, lane-packed)
    gstem_ref, stem_w_ref, stem_b_ref,       # [9, n*HW, n*P1] bf16, [C1, 9*Cin] bf16, [C1,1] f32
    b1_w1_ref, b1_b1_ref,                    # [W1, C1] bf16, [W1, 1] f32
    b1_g2_ref, b1_w2_ref, b1_b2_ref,         # [9, n*P1, n*P2] bf16, [W1, 9*W1] bf16, [W1,1] f32
    b1_gd_ref, b1_wd_ref, b1_bd_ref,         # [n*P1, n*P2] bf16, [C2, C1] bf16, [C2, 1] f32
    b1_w3_ref, b1_b3_ref,                    # [C2, W1] bf16, [C2, 1] f32
    b2_w1_ref, b2_b1_ref,                    # [W2, C2] bf16, [W2, 1] f32
    b2_g2_ref, b2_w2_ref, b2_b2_ref,         # [9, n*P2, n*P2] bf16, [W2, 9*W2] bf16, [W2,1] f32
    b2_w3_ref, b2_b3_ref,                    # [C2, W2] bf16, [C2, 1] f32
    pool_ref, proj_w_ref, proj_b_ref,        # [n, n*P2] bf16, [C2, NOUT] bf16 (1/HW folded), [1, NOUT] f32
    out_ref,                                 # [n, NOUT] f32   (lane-dense output slab)
):
    f32 = jnp.float32
    bf16 = jnp.bfloat16

    def mm(a, b):
        # bf16 MXU operands, f32 accumulation.
        return jnp.dot(a, b, preferred_element_type=f32)

    def conv1x1(w_ref, b_ref, x_bf, residual=None, relu=True):
        # Folded-BN 1x1 conv on channels-major, lane-packed [Cin, L] activation.
        y = mm(w_ref[...], x_bf) + b_ref[...]
        if residual is not None:                 # only emitted where needed
            y = y + residual
        return jnp.maximum(y, 0.0) if relu else y

    def conv3x3(w_ref, b_ref, g_ref, x_bf):
        # 9 spatial shift-gathers (pad+shift+stride as 0/1 matmuls, per-image
        # block-diagonal), stacked along K, then ONE concatenated tap matmul.
        shifted = [mm(x_bf, g_ref[t]) for t in range(9)]            # 9 x [Cin, Lout] f32
        stacked = jnp.concatenate(shifted, axis=0).astype(bf16)     # [9*Cin, Lout]
        y = mm(w_ref[...], stacked) + b_ref[...]                    # [Cout, Lout]
        return jnp.maximum(y, 0.0)

    # Stem: 3x3/s2 conv, im2col done in-kernel via the gather matrices.
    x = conv3x3(stem_w_ref, stem_b_ref, gstem_ref, x_ref[...])      # [C1, n*P1] f32
    x_bf = x.astype(bf16)

    # Bottleneck 1 (stride-2 3x3, projection shortcut).
    o1 = conv1x1(b1_w1_ref, b1_b1_ref, x_bf)                        # [W1, n*P1]
    o2 = conv3x3(b1_w2_ref, b1_b2_ref, b1_g2_ref, o1.astype(bf16))  # [W1, n*P2]
    idn = mm(b1_wd_ref[...], mm(x_bf, b1_gd_ref[...]).astype(bf16)) + b1_bd_ref[...]
    o3 = conv1x1(b1_w3_ref, b1_b3_ref, o2.astype(bf16), residual=idn)  # [C2, n*P2]
    o3_bf = o3.astype(bf16)

    # Bottleneck 2 (identity shortcut).
    p1 = conv1x1(b2_w1_ref, b2_b1_ref, o3_bf)                       # [W2, n*P2]
    p2 = conv3x3(b2_w2_ref, b2_b2_ref, b2_g2_ref, p1.astype(bf16))  # [W2, n*P2]
    p3 = conv1x1(b2_w3_ref, b2_b3_ref, p2.astype(bf16), residual=o3)  # [C2, n*P2]

    # Per-image global average pool (1/HW folded into proj_w) via a lane
    # contraction, landing features image-major: [n, C2].
    feats = lax.dot_general(
        pool_ref[...], p3.astype(bf16),
        dimension_numbers=(((1,), (1,)), ((), ())),
        preferred_element_type=f32)                                 # [n, C2]

    # Linear projection -> lane-dense [n, NOUT] store.
    out_ref[...] = mm(feats.astype(bf16), proj_w_ref[...]) + proj_b_ref[...]


# ---------------------------------------------------------------------------
# Host-side constant construction (built once, outside jit)
# ---------------------------------------------------------------------------
def _gather_mats(H, W, k, stride, pad):
    """0/1 selection matrices [k*k, Hin*Win, Hout*Wout] encoding pad+shift+stride."""
    Ho = (H + 2 * pad - k) // stride + 1
    Wo = (W + 2 * pad - k) // stride + 1
    g = np.zeros((k * k, H * W, Ho * Wo), np.float32)
    for ki in range(k):
        for kj in range(k):
            t = ki * k + kj
            for oh in range(Ho):
                for ow in range(Wo):
                    ih = oh * stride + ki - pad
                    iw = ow * stride + kj - pad
                    if 0 <= ih < H and 0 <= iw < W:
                        g[t, ih * W + iw, oh * Wo + ow] = 1.0
    return g


def _kron_eye(g, n):
    """Per-tap block-diagonal expansion over n lane-packed images."""
    T, pin, pout = g.shape
    out = np.zeros((T, n * pin, n * pout), np.float32)
    for b in range(n):
        out[:, b * pin:(b + 1) * pin, b * pout:(b + 1) * pout] = g
    return out


def _fold_1x1(w, scale, bias):
    wt = (w[0, 0] * scale[None, :]).T                      # [cout, cin], BN scale folded
    return wt, bias.reshape(-1, 1)


def _fold_dense(w, scale, bias):
    """kxk conv folded to [cout, k*k*cin] (tap-major rows, matches in-kernel concat)."""
    kh, kw, cin, cout = w.shape
    w2d = w.reshape(kh * kw * cin, cout) * scale[None, :]
    return w2d.T, bias.reshape(-1, 1)


# ---------------------------------------------------------------------------
# Deterministic raw parameter construction (same backbone as before)
# ---------------------------------------------------------------------------
def _conv_w(key, kh, kw, cin, cout):
    fan_in = kh * kw * cin
    return (jax.random.normal(key, (kh, kw, cin, cout), jnp.float32)
            / jnp.sqrt(jnp.float32(fan_in)))


def _bn_folded(key, c, eps=1e-5):
    k1, k2, k3, k4 = jax.random.split(key, 4)
    gamma = 1.0 + 0.1 * jax.random.normal(k1, (c,), jnp.float32)
    beta = 0.1 * jax.random.normal(k2, (c,), jnp.float32)
    mean = 0.1 * jax.random.normal(k3, (c,), jnp.float32)
    var = 0.5 + 0.5 * jax.random.uniform(k4, (c,), jnp.float32)
    scale = gamma / jnp.sqrt(var + eps)
    bias = beta - mean * scale
    return scale, bias


def _bottleneck_params(key, cin, width, cout, downsample):
    ks = jax.random.split(key, 8)
    p = {"w1": _conv_w(ks[0], 1, 1, cin, width),
         "w2": _conv_w(ks[1], 3, 3, width, width),
         "w3": _conv_w(ks[2], 1, 1, width, cout)}
    p["s1"], p["b1"] = _bn_folded(ks[3], width)
    p["s2"], p["b2"] = _bn_folded(ks[4], width)
    p["s3"], p["b3"] = _bn_folded(ks[5], cout)
    if downsample:
        p["wd"] = _conv_w(ks[6], 1, 1, cin, cout)
        p["sd"], p["bd"] = _bn_folded(ks[7], cout)
    return p


def make_params(key):
    cin = INSIZE[0]
    ks = jax.random.split(key, 6)
    params = {"stem_w": _conv_w(ks[0], 3, 3, cin, 8)}
    params["stem_s"], params["stem_b"] = _bn_folded(ks[1], 8)
    params["block1"] = _bottleneck_params(ks[2], 8, 4, 16, downsample=True)
    params["block2"] = _bottleneck_params(ks[3], 16, 8, 16, downsample=False)
    net_outsize = 16
    nout = OUTSIZE[0] * OUTSIZE[1]
    params["proj_w"] = (jax.random.normal(ks[4], (net_outsize, nout), jnp.float32)
                        / jnp.sqrt(jnp.float32(net_outsize)))
    params["proj_b"] = 0.01 * jax.random.normal(ks[5], (nout,), jnp.float32)
    return params


def prepare_kernel_params(params, n_img):
    """Fold BN / pooling into weights, build block-diag gather matrices, cast to bf16."""
    bf16 = jnp.bfloat16
    f32 = jnp.float32

    g_stem = _kron_eye(_gather_mats(16, 16, 3, 2, 1), n_img)    # [9, n*256, n*64]
    g2_1   = _kron_eye(_gather_mats(8, 8, 3, 2, 1), n_img)      # [9, n*64,  n*16]
    gd_1   = _kron_eye(_gather_mats(8, 8, 1, 2, 0), n_img)[0]   # [n*64, n*16]
    g2_2   = _kron_eye(_gather_mats(4, 4, 3, 1, 1), n_img)      # [9, n*16,  n*16]

    b1, b2 = params["block1"], params["block2"]
    stem_w, stem_b = _fold_dense(params["stem_w"], params["stem_s"], params["stem_b"])
    b1_w1, b1_b1 = _fold_1x1(b1["w1"], b1["s1"], b1["b1"])
    b1_w2, b1_b2 = _fold_dense(b1["w2"], b1["s2"], b1["b2"])
    b1_w3, b1_b3 = _fold_1x1(b1["w3"], b1["s3"], b1["b3"])
    b1_wd, b1_bd = _fold_1x1(b1["wd"], b1["sd"], b1["bd"])
    b2_w1, b2_b1 = _fold_1x1(b2["w1"], b2["s1"], b2["b1"])
    b2_w2, b2_b2 = _fold_dense(b2["w2"], b2["s2"], b2["b2"])
    b2_w3, b2_b3 = _fold_1x1(b2["w3"], b2["s3"], b2["b3"])

    hw2 = 16                                                    # 4x4 final spatial
    pool_t = np.zeros((n_img, n_img * hw2), np.float32)         # per-image lane-sum
    for b in range(n_img):
        pool_t[b, b * hw2:(b + 1) * hw2] = 1.0

    proj_w = params["proj_w"] / hw2                             # pool 1/HW folded
    proj_b = params["proj_b"].reshape(1, -1)

    def w(a):  return jnp.asarray(a, bf16)   # MXU operands -> bf16
    def b_(a): return jnp.asarray(a, f32)    # bias/epilogue constants stay f32

    return (w(g_stem), w(stem_w), b_(stem_b),
            w(b1_w1), b_(b1_b1),
            w(g2_1), w(b1_w2), b_(b1_b2),
            w(gd_1), w(b1_wd), b_(b1_bd),
            w(b1_w3), b_(b1_b3),
            w(b2_w1), b_(b2_b1),
            w(g2_2), w(b2_w2), b_(b2_b2),
            w(b2_w3), b_(b2_b3),
            w(pool_t), w(proj_w), b_(proj_b))


# ---------------------------------------------------------------------------
# Forward pass: one tiny host transpose + ONE fused pallas_call
# ---------------------------------------------------------------------------
@jax.jit
def resnet_spline_forward(x_nchw, kparams):
    B, C, H, W = x_nchw.shape
    hw = H * W
    nout = OUTSIZE[0] * OUTSIZE[1]
    n_img = kparams[-3].shape[0]            # images per slab (from pool_t)
    assert B % n_img == 0
    num_slabs = B // n_img

    # Channels-major, image-major lane packing: [Cin, B*H*W], bf16 MXU operand.
    xp = jnp.transpose(x_nchw.reshape(B, C, hw), (1, 0, 2)).reshape(C, B * hw)
    xp = xp.astype(jnp.bfloat16)

    def const_spec(a):
        # Whole-array resident constant (grid-invariant index map).  Total
        # constant footprint <2 MiB, so no pipeline_mode / tile shrinking.
        return pl.BlockSpec(a.shape, lambda s, _nd=a.ndim: (0,) * _nd)

    in_specs = [pl.BlockSpec((C, n_img * hw), lambda s: (0, s))]
    in_specs += [const_spec(a) for a in kparams]

    out = pl.pallas_call(
        _fused_forward_kernel,
        out_shape=jax.ShapeDtypeStruct((B, nout), jnp.float32),
        grid=(num_slabs,),                                       # one lane-packed slab / step
        in_specs=in_specs,
        out_specs=pl.BlockSpec((n_img, nout), lambda s: (s, 0)),
        compiler_params=pltpu.CompilerParams(
            dimension_semantics=("parallel",)),                  # v7x: slabs across 2 TCs
    )(xp, *kparams)
    return out.reshape(B, *OUTSIZE)                              # [B, 2, 10]


# ---------------------------------------------------------------------------
# Plain-JAX f32 reference (correctness check of the fused bf16-MXU kernel)
# ---------------------------------------------------------------------------
def _ref_conv_bn(x, w, s, b, stride, pad, residual=None, relu=True):
    y = lax.conv_general_dilated(
        x, w, (stride, stride), ((pad, pad), (pad, pad)),
        dimension_numbers=("NHWC", "HWIO", "NHWC"),
        precision=lax.Precision.HIGHEST)
    y = y * s + b
    if residual is not None:
        y = y + residual
    return jnp.maximum(y, 0.0) if relu else y


def _reference_forward(x_nchw, params):
    x = jnp.transpose(x_nchw, (0, 2, 3, 1)).astype(jnp.float32)
    x = _ref_conv_bn(x, params["stem_w"], params["stem_s"], params["stem_b"], 2, 1)
    p = params["block1"]
    o = _ref_conv_bn(x, p["w1"], p["s1"], p["b1"], 1, 0)
    o = _ref_conv_bn(o, p["w2"], p["s2"], p["b2"], 2, 1)
    idn = _ref_conv_bn(x, p["wd"], p["sd"], p["bd"], 2, 0, relu=False)
    o = _ref_conv_bn(o, p["w3"], p["s3"], p["b3"], 1, 0, residual=idn)
    p = params["block2"]
    q = _ref_conv_bn(o, p["w1"], p["s1"], p["b1"], 1, 0)
    q = _ref_conv_bn(q, p["w2"], p["s2"], p["b2"], 1, 1)
    q = _ref_conv_bn(q, p["w3"], p["s3"], p["b3"], 1, 0, residual=o)
    feats = q.mean(axis=(1, 2))
    out = feats @ params["proj_w"] + params["proj_b"]
    return out.reshape(-1, *OUTSIZE)


if __name__ == "__main__":
    key = jax.random.PRNGKey(0)
    k_x, k_p = jax.random.split(key)
    B = 2
    x = jax.random.normal(k_x, (B, *INSIZE), jnp.float32)       # [B, C, H, W] = [2, 4, 16, 16]
    params = make_params(k_p)

    n_img = min(B, 8)                                            # images lane-packed per slab
    assert B % n_img == 0
    kparams = prepare_kernel_params(params, n_img)

    out = resnet_spline_forward(x, kparams)
    out = jax.block_until_ready(out)
    assert out.shape == (B, *OUTSIZE), out.shape
    assert out.dtype == jnp.float32

    ref = jax.block_until_ready(_reference_forward(x, params))
    # Tolerance slightly relaxed vs the pure-f32 kernel: MXU operands are bf16
    # (f32 accumulation, f32 epilogues).
    max_err = float(jnp.max(jnp.abs(out - ref)))
    assert max_err < 1e-1, max_err

    print("KERNEL_OK")
</pallas_src>

<mosaic_0001>
module attributes {stable_mosaic.version = 11 : i64} {
  func.func @_fused_forward_kernel(%arg0: i32, %arg1: memref<4x512xbf16, #tpu.memory_space<vmem>>, %arg2: memref<9x512x128xbf16, #tpu.memory_space<vmem>>, %arg3: memref<8x36xbf16, #tpu.memory_space<vmem>>, %arg4: memref<8x1xf32, #tpu.memory_space<vmem>>, %arg5: memref<4x8xbf16, #tpu.memory_space<vmem>>, %arg6: memref<4x1xf32, #tpu.memory_space<vmem>>, %arg7: memref<9x128x32xbf16, #tpu.memory_space<vmem>>, %arg8: memref<4x36xbf16, #tpu.memory_space<vmem>>, %arg9: memref<4x1xf32, #tpu.memory_space<vmem>>, %arg10: memref<128x32xbf16, #tpu.memory_space<vmem>>, %arg11: memref<16x8xbf16, #tpu.memory_space<vmem>>, %arg12: memref<16x1xf32, #tpu.memory_space<vmem>>, %arg13: memref<16x4xbf16, #tpu.memory_space<vmem>>, %arg14: memref<16x1xf32, #tpu.memory_space<vmem>>, %arg15: memref<8x16xbf16, #tpu.memory_space<vmem>>, %arg16: memref<8x1xf32, #tpu.memory_space<vmem>>, %arg17: memref<9x32x32xbf16, #tpu.memory_space<vmem>>, %arg18: memref<8x72xbf16, #tpu.memory_space<vmem>>, %arg19: memref<8x1xf32, #tpu.memory_space<vmem>>, %arg20: memref<16x8xbf16, #tpu.memory_space<vmem>>, %arg21: memref<16x1xf32, #tpu.memory_space<vmem>>, %arg22: memref<2x32xbf16, #tpu.memory_space<vmem>>, %arg23: memref<16x20xbf16, #tpu.memory_space<vmem>>, %arg24: memref<1x20xf32, #tpu.memory_space<vmem>>, %arg25: memref<2x20xf32, #tpu.memory_space<vmem>>) attributes {dimension_semantics = [#tpu.dimension_semantics<parallel>], iteration_bounds = array<i64: 1>, scalar_prefetch = 0 : i64, scratch_operands = 0 : i64, tpu.core_type = #tpu.core_type<tc>, window_params = [{transform_indices = @transform_0, window_bounds = array<i64: 4, 512>}, {pipeline_mode = #tpu.pipeline_mode<synchronous>, transform_indices = @transform_1, window_bounds = array<i64: 9, 512, 128>}, {pipeline_mode = #tpu.pipeline_mode<synchronous>, transform_indices = @transform_2, window_bounds = array<i64: 8, 36>}, {pipeline_mode = #tpu.pipeline_mode<synchronous>, transform_indices = @transform_3, window_bounds = array<i64: 8, 1>}, {pipeline_mode = #tpu.pipeline_mode<synchronous>, transform_indices = @transform_4, window_bounds = array<i64: 4, 8>}, {pipeline_mode = #tpu.pipeline_mode<synchronous>, transform_indices = @transform_5, window_bounds = array<i64: 4, 1>}, {pipeline_mode = #tpu.pipeline_mode<synchronous>, transform_indices = @transform_6, window_bounds = array<i64: 9, 128, 32>}, {pipeline_mode = #tpu.pipeline_mode<synchronous>, transform_indices = @transform_7, window_bounds = array<i64: 4, 36>}, {pipeline_mode = #tpu.pipeline_mode<synchronous>, transform_indices = @transform_8, window_bounds = array<i64: 4, 1>}, {pipeline_mode = #tpu.pipeline_mode<synchronous>, transform_indices = @transform_9, window_bounds = array<i64: 128, 32>}, {pipeline_mode = #tpu.pipeline_mode<synchronous>, transform_indices = @transform_10, window_bounds = array<i64: 16, 8>}, {pipeline_mode = #tpu.pipeline_mode<synchronous>, transform_indices = @transform_11, window_bounds = array<i64: 16, 1>}, {pipeline_mode = #tpu.pipeline_mode<synchronous>, transform_indices = @transform_12, window_bounds = array<i64: 16, 4>}, {pipeline_mode = #tpu.pipeline_mode<synchronous>, transform_indices = @transform_13, window_bounds = array<i64: 16, 1>}, {pipeline_mode = #tpu.pipeline_mode<synchronous>, transform_indices = @transform_14, window_bounds = array<i64: 8, 16>}, {pipeline_mode = #tpu.pipeline_mode<synchronous>, transform_indices = @transform_15, window_bounds = array<i64: 8, 1>}, {pipeline_mode = #tpu.pipeline_mode<synchronous>, transform_indices = @transform_16, window_bounds = array<i64: 9, 32, 32>}, {pipeline_mode = #tpu.pipeline_mode<synchronous>, transform_indices = @transform_17, window_bounds = array<i64: 8, 72>}, {pipeline_mode = #tpu.pipeline_mode<synchronous>, transform_indices = @transform_18, window_bounds = array<i64: 8, 1>}, {pipeline_mode = #tpu.pipeline_mode<synchronous>, transform_indices = @transform_19, window_bounds = array<i64: 16, 8>}, {pipeline_mode = #tpu.pipeline_mode<synchronous>, transform_indices = @transform_20, window_bounds = array<i64: 16, 1>}, {pipeline_mode = #tpu.pipeline_mode<synchronous>, transform_indices = @transform_21, window_bounds = array<i64: 2, 32>}, {pipeline_mode = #tpu.pipeline_mode<synchronous>, transform_indices = @transform_22, window_bounds = array<i64: 16, 20>}, {pipeline_mode = #tpu.pipeline_mode<synchronous>, transform_indices = @transform_23, window_bounds = array<i64: 1, 20>}, {transform_indices = @transform_24, window_bounds = array<i64: 2, 20>}]} {
    %c0 = arith.constant 0 : index
    %c0_0 = arith.constant 0 : index
    %0 = vector.load %arg1[%c0, %c0_0] : memref<4x512xbf16, #tpu.memory_space<vmem>>, vector<4x512xbf16>
    %c0_1 = arith.constant 0 : index
    %c0_2 = arith.constant 0 : index
    %c0_3 = arith.constant 0 : index
    %1 = vector.load %arg2[%c0_1, %c0_2, %c0_3] : memref<9x512x128xbf16, #tpu.memory_space<vmem>>, vector<1x512x128xbf16>
    %2 = vector.shape_cast %1 : vector<1x512x128xbf16> to vector<512x128xbf16>
    %cst = arith.constant dense<0.000000e+00> : vector<4x128xf32>
    %3 = tpu.matmul %0, %2, %cst {dimension_numbers = #tpu.dot_dimension_numbers<[1], [0], [0], [1], [0, 0, 1, 1], [], []>} : vector<4x512xbf16>, vector<512x128xbf16>, vector<4x128xf32> -> vector<4x128xf32>
    %c1 = arith.constant 1 : index
    %c0_4 = arith.constant 0 : index
    %c0_5 = arith.constant 0 : index
    %4 = vector.load %arg2[%c1, %c0_4, %c0_5] : memref<9x512x128xbf16, #tpu.memory_space<vmem>>, vector<1x512x128xbf16>
    %5 = vector.shape_cast %4 : vector<1x512x128xbf16> to vector<512x128xbf16>
    %cst_6 = arith.constant dense<0.000000e+00> : vector<4x128xf32>
    %6 = tpu.matmul %0, %5, %cst_6 {dimension_numbers = #tpu.dot_dimension_numbers<[1], [0], [0], [1], [0, 0, 1, 1], [], []>} : vector<4x512xbf16>, vector<512x128xbf16>, vector<4x128xf32> -> vector<4x128xf32>
    %c2 = arith.constant 2 : index
    %c0_7 = arith.constant 0 : index
    %c0_8 = arith.constant 0 : index
    %7 = vector.load %arg2[%c2, %c0_7, %c0_8] : memref<9x512x128xbf16, #tpu.memory_space<vmem>>, vector<1x512x128xbf16>
    %8 = vector.shape_cast %7 : vector<1x512x128xbf16> to vector<512x128xbf16>
    %cst_9 = arith.constant dense<0.000000e+00> : vector<4x128xf32>
    %9 = tpu.matmul %0, %8, %cst_9 {dimension_numbers = #tpu.dot_dimension_numbers<[1], [0], [0], [1], [0, 0, 1, 1], [], []>} : vector<4x512xbf16>, vector<512x128xbf16>, vector<4x128xf32> -> vector<4x128xf32>
    %c3 = arith.constant 3 : index
    %c0_10 = arith.constant 0 : index
    %c0_11 = arith.constant 0 : index
    %10 = vector.load %arg2[%c3, %c0_10, %c0_11] : memref<9x512x128xbf16, #tpu.memory_space<vmem>>, vector<1x512x128xbf16>
    %11 = vector.shape_cast %10 : vector<1x512x128xbf16> to vector<512x128xbf16>
    %cst_12 = arith.constant dense<0.000000e+00> : vector<4x128xf32>
    %12 = tpu.matmul %0, %11, %cst_12 {dimension_numbers = #tpu.dot_dimension_numbers<[1], [0], [0], [1], [0, 0, 1, 1], [], []>} : vector<4x512xbf16>, vector<512x128xbf16>, vector<4x128xf32> -> vector<4x128xf32>
    %c4 = arith.constant 4 : index
    %c0_13 = arith.constant 0 : index
    %c0_14 = arith.constant 0 : index
    %13 = vector.load %arg2[%c4, %c0_13, %c0_14] : memref<9x512x128xbf16, #tpu.memory_space<vmem>>, vector<1x512x128xbf16>
    %14 = vector.shape_cast %13 : vector<1x512x128xbf16> to vector<512x128xbf16>
    %cst_15 = arith.constant dense<0.000000e+00> : vector<4x128xf32>
    %15 = tpu.matmul %0, %14, %cst_15 {dimension_numbers = #tpu.dot_dimension_numbers<[1], [0], [0], [1], [0, 0, 1, 1], [], []>} : vector<4x512xbf16>, vector<512x128xbf16>, vector<4x128xf32> -> vector<4x128xf32>
    %c5 = arith.constant 5 : index
    %c0_16 = arith.constant 0 : index
    %c0_17 = arith.constant 0 : index
    %16 = vector.load %arg2[%c5, %c0_16, %c0_17] : memref<9x512x128xbf16, #tpu.memory_space<vmem>>, vector<1x512x128xbf16>
    %17 = vector.shape_cast %16 : vector<1x512x128xbf16> to vector<512x128xbf16>
    %cst_18 = arith.constant dense<0.000000e+00> : vector<4x128xf32>
    %18 = tpu.matmul %0, %17, %cst_18 {dimension_numbers = #tpu.dot_dimension_numbers<[1], [0], [0], [1], [0, 0, 1, 1], [], []>} : vector<4x512xbf16>, vector<512x128xbf16>, vector<4x128xf32> -> vector<4x128xf32>
    %c6 = arith.constant 6 : index
    %c0_19 = arith.constant 0 : index
    %c0_20 = arith.constant 0 : index
    %19 = vector.load %arg2[%c6, %c0_19, %c0_20] : memref<9x512x128xbf16, #tpu.memory_space<vmem>>, vector<1x512x128xbf16>
    %20 = vector.shape_cast %19 : vector<1x512x128xbf16> to vector<512x128xbf16>
    %cst_21 = arith.constant dense<0.000000e+00> : vector<4x128xf32>
    %21 = tpu.matmul %0, %20, %cst_21 {dimension_numbers = #tpu.dot_dimension_numbers<[1], [0], [0], [1], [0, 0, 1, 1], [], []>} : vector<4x512xbf16>, vector<512x128xbf16>, vector<4x128xf32> -> vector<4x128xf32>
    %c7 = arith.constant 7 : index
    %c0_22 = arith.constant 0 : index
    %c0_23 = arith.constant 0 : index
    %22 = vector.load %arg2[%c7, %c0_22, %c0_23] : memref<9x512x128xbf16, #tpu.memory_space<vmem>>, vector<1x512x128xbf16>
    %23 = vector.shape_cast %22 : vector<1x512x128xbf16> to vector<512x128xbf16>
    %cst_24 = arith.constant dense<0.000000e+00> : vector<4x128xf32>
    %24 = tpu.matmul %0, %23, %cst_24 {dimension_numbers = #tpu.dot_dimension_numbers<[1], [0], [0], [1], [0, 0, 1, 1], [], []>} : vector<4x512xbf16>, vector<512x128xbf16>, vector<4x128xf32> -> vector<4x128xf32>
    %c8 = arith.constant 8 : index
    %c0_25 = arith.constant 0 : index
    %c0_26 = arith.constant 0 : index
    %25 = vector.load %arg2[%c8, %c0_25, %c0_26] : memref<9x512x128xbf16, #tpu.memory_space<vmem>>, vector<1x512x128xbf16>
    %26 = vector.shape_cast %25 : vector<1x512x128xbf16> to vector<512x128xbf16>
    %cst_27 = arith.constant dense<0.000000e+00> : vector<4x128xf32>
    %27 = tpu.matmul %0, %26, %cst_27 {dimension_numbers = #tpu.dot_dimension_numbers<[1], [0], [0], [1], [0, 0, 1, 1], [], []>} : vector<4x512xbf16>, vector<512x128xbf16>, vector<4x128xf32> -> vector<4x128xf32>
    %28 = tpu.concatenate %3, %6, %9, %12, %15, %18, %21, %24, %27 in 0 : vector<4x128xf32>, vector<4x128xf32>, vector<4x128xf32>, vector<4x128xf32>, vector<4x128xf32>, vector<4x128xf32>, vector<4x128xf32>, vector<4x128xf32>, vector<4x128xf32> -> vector<36x128xf32>
    %29 = arith.truncf %28 : vector<36x128xf32> to vector<36x128xbf16>
    %c0_28 = arith.constant 0 : index
    %c0_29 = arith.constant 0 : index
    %30 = vector.load %arg3[%c0_28, %c0_29] : memref<8x36xbf16, #tpu.memory_space<vmem>>, vector<8x36xbf16>
    %cst_30 = arith.constant dense<0.000000e+00> : vector<8x128xf32>
    %31 = tpu.matmul %30, %29, %cst_30 {dimension_numbers = #tpu.dot_dimension_numbers<[1], [0], [0], [1], [0, 0, 1, 1], [], []>} : vector<8x36xbf16>, vector<36x128xbf16>, vector<8x128xf32> -> vector<8x128xf32>
    %c0_31 = arith.constant 0 : index
    %c0_32 = arith.constant 0 : index
    %32 = vector.load %arg4[%c0_31, %c0_32] : memref<8x1xf32, #tpu.memory_space<vmem>>, vector<8x1xf32>
    %33 = vector.broadcast %32 : vector<8x1xf32> to vector<8x128xf32>
    %34 = arith.addf %31, %33 : vector<8x128xf32>
    %cst_33 = arith.constant 0.000000e+00 : f32
    %35 = vector.broadcast %cst_33 : f32 to vector<8x128xf32>
    %36 = arith.maximumf %34, %35 : vector<8x128xf32>
    %37 = arith.truncf %36 : vector<8x128xf32> to vector<8x128xbf16>
    %c0_34 = arith.constant 0 : index
    %c0_35 = arith.constant 0 : index
    %38 = vector.load %arg5[%c0_34, %c0_35] : memref<4x8xbf16, #tpu.memory_space<vmem>>, vector<4x8xbf16>
    %cst_36 = arith.constant dense<0.000000e+00> : vector<4x128xf32>
    %39 = tpu.matmul %38, %37, %cst_36 {dimension_numbers = #tpu.dot_dimension_numbers<[1], [0], [0], [1], [0, 0, 1, 1], [], []>} : vector<4x8xbf16>, vector<8x128xbf16>, vector<4x128xf32> -> vector<4x128xf32>
    %c0_37 = arith.constant 0 : index
    %c0_38 = arith.constant 0 : index
    %40 = vector.load %arg6[%c0_37, %c0_38] : memref<4x1xf32, #tpu.memory_space<vmem>>, vector<4x1xf32>
    %41 = vector.broadcast %40 : vector<4x1xf32> to vector<4x128xf32>
    %42 = arith.addf %39, %41 : vector<4x128xf32>
    %cst_39 = arith.constant 0.000000e+00 : f32
    %43 = vector.broadcast %cst_39 : f32 to vector<4x128xf32>
    %44 = arith.maximumf %42, %43 : vector<4x128xf32>
    %45 = arith.truncf %44 : vector<4x128xf32> to vector<4x128xbf16>
    %c0_40 = arith.constant 0 : index
    %c0_41 = arith.constant 0 : index
    %c0_42 = arith.constant 0 : index
    %46 = vector.load %arg7[%c0_40, %c0_41, %c0_42] : memref<9x128x32xbf16, #tpu.memory_space<vmem>>, vector<1x128x32xbf16>
    %47 = vector.shape_cast %46 : vector<1x128x32xbf16> to vector<128x32xbf16>
    %cst_43 = arith.constant dense<0.000000e+00> : vector<4x32xf32>
    %48 = tpu.matmul %45, %47, %cst_43 {dimension_numbers = #tpu.dot_dimension_numbers<[1], [0], [0], [1], [0, 0, 1, 1], [], []>} : vector<4x128xbf16>, vector<128x32xbf16>, vector<4x32xf32> -> vector<4x32xf32>
    %c1_44 = arith.constant 1 : index
    %c0_45 = arith.constant 0 : index
    %c0_46 = arith.constant 0 : index
    %49 = vector.load %arg7[%c1_44, %c0_45, %c0_46] : memref<9x128x32xbf16, #tpu.memory_space<vmem>>, vector<1x128x32xbf16>
    %50 = vector.shape_cast %49 : vector<1x128x32xbf16> to vector<128x32xbf16>
    %cst_47 = arith.constant dense<0.000000e+00> : vector<4x32xf32>
    %51 = tpu.matmul %45, %50, %cst_47 {dimension_numbers = #tpu.dot_dimension_numbers<[1], [0], [0], [1], [0, 0, 1, 1], [], []>} : vector<4x128xbf16>, vector<128x32xbf16>, vector<4x32xf32> -> vector<4x32xf32>
    %c2_48 = arith.constant 2 : index
    %c0_49 = arith.constant 0 : index
    %c0_50 = arith.constant 0 : index
    %52 = vector.load %arg7[%c2_48, %c0_49, %c0_50] : memref<9x128x32xbf16, #tpu.memory_space<vmem>>, vector<1x128x32xbf16>
    %53 = vector.shape_cast %52 : vector<1x128x32xbf16> to vector<128x32xbf16>
    %cst_51 = arith.constant dense<0.000000e+00> : vector<4x32xf32>
    %54 = tpu.matmul %45, %53, %cst_51 {dimension_numbers = #tpu.dot_dimension_numbers<[1], [0], [0], [1], [0, 0, 1, 1], [], []>} : vector<4x128xbf16>, vector<128x32xbf16>, vector<4x32xf32> -> vector<4x32xf32>
    %c3_52 = arith.constant 3 : index
    %c0_53 = arith.constant 0 : index
    %c0_54 = arith.constant 0 : index
    %55 = vector.load %arg7[%c3_52, %c0_53, %c0_54] : memref<9x128x32xbf16, #tpu.memory_space<vmem>>, vector<1x128x32xbf16>
    %56 = vector.shape_cast %55 : vector<1x128x32xbf16> to vector<128x32xbf16>
    %cst_55 = arith.constant dense<0.000000e+00> : vector<4x32xf32>
    %57 = tpu.matmul %45, %56, %cst_55 {dimension_numbers = #tpu.dot_dimension_numbers<[1], [0], [0], [1], [0, 0, 1, 1], [], []>} : vector<4x128xbf16>, vector<128x32xbf16>, vector<4x32xf32> -> vector<4x32xf32>
    %c4_56 = arith.constant 4 : index
    %c0_57 = arith.constant 0 : index
    %c0_58 = arith.constant 0 : index
    %58 = vector.load %arg7[%c4_56, %c0_57, %c0_58] : memref<9x128x32xbf16, #tpu.memory_space<vmem>>, vector<1x128x32xbf16>
    %59 = vector.shape_cast %58 : vector<1x128x32xbf16> to vector<128x32xbf16>
    %cst_59 = arith.constant dense<0.000000e+00> : vector<4x32xf32>
    %60 = tpu.matmul %45, %59, %cst_59 {dimension_numbers = #tpu.dot_dimension_numbers<[1], [0], [0], [1], [0, 0, 1, 1], [], []>} : vector<4x128xbf16>, vector<128x32xbf16>, vector<4x32xf32> -> vector<4x32xf32>
    %c5_60 = arith.constant 5 : index
    %c0_61 = arith.constant 0 : index
    %c0_62 = arith.constant 0 : index
    %61 = vector.load %arg7[%c5_60, %c0_61, %c0_62] : memref<9x128x32xbf16, #tpu.memory_space<vmem>>, vector<1x128x32xbf16>
    %62 = vector.shape_cast %61 : vector<1x128x32xbf16> to vector<128x32xbf16>
    %cst_63 = arith.constant dense<0.000000e+00> : vector<4x32xf32>
    %63 = tpu.matmul %45, %62, %cst_63 {dimension_numbers = #tpu.dot_dimension_numbers<[1], [0], [0], [1], [0, 0, 1, 1], [], []>} : vector<4x128xbf16>, vector<128x32xbf16>, vector<4x32xf32> -> vector<4x32xf32>
    %c6_64 = arith.constant 6 : index
    %c0_65 = arith.constant 0 : index
    %c0_66 = arith.constant 0 : index
    %64 = vector.load %arg7[%c6_64, %c0_65, %c0_66] : memref<9x128x32xbf16, #tpu.memory_space<vmem>>, vector<1x128x32xbf16>
    %65 = vector.shape_cast %64 : vector<1x128x32xbf16> to vector<128x32xbf16>
    %cst_67 = arith.constant dense<0.000000e+00> : vector<4x32xf32>
    %66 = tpu.matmul %45, %65, %cst_67 {dimension_numbers = #tpu.dot_dimension_numbers<[1], [0], [0], [1], [0, 0, 1, 1], [], []>} : vector<4x128xbf16>, vector<128x32xbf16>, vector<4x32xf32> -> vector<4x32xf32>
    %c7_68 = arith.constant 7 : index
    %c0_69 = arith.constant 0 : index
    %c0_70 = arith.constant 0 : index
    %67 = vector.load %arg7[%c7_68, %c0_69, %c0_70] : memref<9x128x32xbf16, #tpu.memory_space<vmem>>, vector<1x128x32xbf16>
    %68 = vector.shape_cast %67 : vector<1x128x32xbf16> to vector<128x32xbf16>
    %cst_71 = arith.constant dense<0.000000e+00> : vector<4x32xf32>
    %69 = tpu.matmul %45, %68, %cst_71 {dimension_numbers = #tpu.dot_dimension_numbers<[1], [0], [0], [1], [0, 0, 1, 1], [], []>} : vector<4x128xbf16>, vector<128x32xbf16>, vector<4x32xf32> -> vector<4x32xf32>
    %c8_72 = arith.constant 8 : index
    %c0_73 = arith.constant 0 : index
    %c0_74 = arith.constant 0 : index
    %70 = vector.load %arg7[%c8_72, %c0_73, %c0_74] : memref<9x128x32xbf16, #tpu.memory_space<vmem>>, vector<1x128x32xbf16>
    %71 = vector.shape_cast %70 : vector<1x128x32xbf16> to vector<128x32xbf16>
    %cst_75 = arith.constant dense<0.000000e+00> : vector<4x32xf32>
    %72 = tpu.matmul %45, %71, %cst_75 {dimension_numbers = #tpu.dot_dimension_numbers<[1], [0], [0], [1], [0, 0, 1, 1], [], []>} : vector<4x128xbf16>, vector<128x32xbf16>, vector<4x32xf32> -> vector<4x32xf32>
    %73 = tpu.concatenate %48, %51, %54, %57, %60, %63, %66, %69, %72 in 0 : vector<4x32xf32>, vector<4x32xf32>, vector<4x32xf32>, vector<4x32xf32>, vector<4x32xf32>, vector<4x32xf32>, vector<4x32xf32>, vector<4x32xf32>, vector<4x32xf32> -> vector<36x32xf32>
    %74 = arith.truncf %73 : vector<36x32xf32> to vector<36x32xbf16>
    %c0_76 = arith.constant 0 : index
    %c0_77 = arith.constant 0 : index
    %75 = vector.load %arg8[%c0_76, %c0_77] : memref<4x36xbf16, #tpu.memory_space<vmem>>, vector<4x36xbf16>
    %cst_78 = arith.constant dense<0.000000e+00> : vector<4x32xf32>
    %76 = tpu.matmul %75, %74, %cst_78 {dimension_numbers = #tpu.dot_dimension_numbers<[1], [0], [0], [1], [0, 0, 1, 1], [], []>} : vector<4x36xbf16>, vector<36x32xbf16>, vector<4x32xf32> -> vector<4x32xf32>
    %c0_79 = arith.constant 0 : index
    %c0_80 = arith.constant 0 : index
    %77 = vector.load %arg9[%c0_79, %c0_80] : memref<4x1xf32, #tpu.memory_space<vmem>>, vector<4x1xf32>
    %78 = vector.broadcast %77 : vector<4x1xf32> to vector<4x32xf32>
    %79 = arith.addf %76, %78 : vector<4x32xf32>
    %cst_81 = arith.constant 0.000000e+00 : f32
    %80 = vector.broadcast %cst_81 : f32 to vector<4x32xf32>
    %81 = arith.maximumf %79, %80 : vector<4x32xf32>
    %c0_82 = arith.constant 0 : index
    %c0_83 = arith.constant 0 : index
    %82 = vector.load %arg11[%c0_82, %c0_83] : memref<16x8xbf16, #tpu.memory_space<vmem>>, vector<16x8xbf16>
    %c0_84 = arith.constant 0 : index
    %c0_85 = arith.constant 0 : index
    %83 = vector.load %arg10[%c0_84, %c0_85] : memref<128x32xbf16, #tpu.memory_space<vmem>>, vector<128x32xbf16>
    %cst_86 = arith.constant dense<0.000000e+00> : vector<8x32xf32>
    %84 = tpu.matmul %37, %83, %cst_86 {dimension_numbers = #tpu.dot_dimension_numbers<[1], [0], [0], [1], [0, 0, 1, 1], [], []>} : vector<8x128xbf16>, vector<128x32xbf16>, vector<8x32xf32> -> vector<8x32xf32>
    %85 = arith.truncf %84 : vector<8x32xf32> to vector<8x32xbf16>
    %cst_87 = arith.constant dense<0.000000e+00> : vector<16x32xf32>
    %86 = tpu.matmul %82, %85, %cst_87 {dimension_numbers = #tpu.dot_dimension_numbers<[1], [0], [0], [1], [0, 0, 1, 1], [], []>} : vector<16x8xbf16>, vector<8x32xbf16>, vector<16x32xf32> -> vector<16x32xf32>
    %c0_88 = arith.constant 0 : index
    %c0_89 = arith.constant 0 : index
    %87 = vector.load %arg12[%c0_88, %c0_89] : memref<16x1xf32, #tpu.memory_space<vmem>>, vector<16x1xf32>
    %88 = vector.broadcast %87 : vector<16x1xf32> to vector<16x32xf32>
    %89 = arith.addf %86, %88 : vector<16x32xf32>
    %90 = arith.truncf %81 : vector<4x32xf32> to vector<4x32xbf16>
    %c0_90 = arith.constant 0 : index
    %c0_91 = arith.constant 0 : index
    %91 = vector.load %arg13[%c0_90, %c0_91] : memref<16x4xbf16, #tpu.memory_space<vmem>>, vector<16x4xbf16>
    %cst_92 = arith.constant dense<0.000000e+00> : vector<16x32xf32>
    %92 = tpu.matmul %91, %90, %cst_92 {dimension_numbers = #tpu.dot_dimension_numbers<[1], [0], [0], [1], [0, 0, 1, 1], [], []>} : vector<16x4xbf16>, vector<4x32xbf16>, vector<16x32xf32> -> vector<16x32xf32>
    %c0_93 = arith.constant 0 : index
    %c0_94 = arith.constant 0 : index
    %93 = vector.load %arg14[%c0_93, %c0_94] : memref<16x1xf32, #tpu.memory_space<vmem>>, vector<16x1xf32>
    %94 = vector.broadcast %93 : vector<16x1xf32> to vector<16x32xf32>
    %95 = arith.addf %92, %94 : vector<16x32xf32>
    %96 = arith.addf %95, %89 : vector<16x32xf32>
    %cst_95 = arith.constant 0.000000e+00 : f32
    %97 = vector.broadcast %cst_95 : f32 to vector<16x32xf32>
    %98 = arith.maximumf %96, %97 : vector<16x32xf32>
    %99 = arith.truncf %98 : vector<16x32xf32> to vector<16x32xbf16>
    %c0_96 = arith.constant 0 : index
    %c0_97 = arith.constant 0 : index
    %100 = vector.load %arg15[%c0_96, %c0_97] : memref<8x16xbf16, #tpu.memory_space<vmem>>, vector<8x16xbf16>
    %cst_98 = arith.constant dense<0.000000e+00> : vector<8x32xf32>
    %101 = tpu.matmul %100, %99, %cst_98 {dimension_numbers = #tpu.dot_dimension_numbers<[1], [0], [0], [1], [0, 0, 1, 1], [], []>} : vector<8x16xbf16>, vector<16x32xbf16>, vector<8x32xf32> -> vector<8x32xf32>
    %c0_99 = arith.constant 0 : index
    %c0_100 = arith.constant 0 : index
    %102 = vector.load %arg16[%c0_99, %c0_100] : memref<8x1xf32, #tpu.memory_space<vmem>>, vector<8x1xf32>
    %103 = vector.broadcast %102 : vector<8x1xf32> to vector<8x32xf32>
    %104 = arith.addf %101, %103 : vector<8x32xf32>
    %cst_101 = arith.constant 0.000000e+00 : f32
    %105 = vector.broadcast %cst_101 : f32 to vector<8x32xf32>
    %106 = arith.maximumf %104, %105 : vector<8x32xf32>
    %107 = arith.truncf %106 : vector<8x32xf32> to vector<8x32xbf16>
    %c0_102 = arith.constant 0 : index
    %c0_103 = arith.constant 0 : index
    %c0_104 = arith.constant 0 : index
    %108 = vector.load %arg17[%c0_102, %c0_103, %c0_104] : memref<9x32x32xbf16, #tpu.memory_space<vmem>>, vector<1x32x32xbf16>
    %109 = vector.shape_cast %108 : vector<1x32x32xbf16> to vector<32x32xbf16>
    %cst_105 = arith.constant dense<0.000000e+00> : vector<8x32xf32>
    %110 = tpu.matmul %107, %109, %cst_105 {dimension_numbers = #tpu.dot_dimension_numbers<[1], [0], [0], [1], [0, 0, 1, 1], [], []>} : vector<8x32xbf16>, vector<32x32xbf16>, vector<8x32xf32> -> vector<8x32xf32>
    %c1_106 = arith.constant 1 : index
    %c0_107 = arith.constant 0 : index
    %c0_108 = arith.constant 0 : index
    %111 = vector.load %arg17[%c1_106, %c0_107, %c0_108] : memref<9x32x32xbf16, #tpu.memory_space<vmem>>, vector<1x32x32xbf16>
    %112 = vector.shape_cast %111 : vector<1x32x32xbf16> to vector<32x32xbf16>
    %cst_109 = arith.constant dense<0.000000e+00> : vector<8x32xf32>
    %113 = tpu.matmul %107, %112, %cst_109 {dimension_numbers = #tpu.dot_dimension_numbers<[1], [0], [0], [1], [0, 0, 1, 1], [], []>} : vector<8x32xbf16>, vector<32x32xbf16>, vector<8x32xf32> -> vector<8x32xf32>
    %c2_110 = arith.constant 2 : index
    %c0_111 = arith.constant 0 : index
    %c0_112 = arith.constant 0 : index
    %114 = vector.load %arg17[%c2_110, %c0_111, %c0_112] : memref<9x32x32xbf16, #tpu.memory_space<vmem>>, vector<1x32x32xbf16>
    %115 = vector.shape_cast %114 : vector<1x32x32xbf16> to vector<32x32xbf16>
    %cst_113 = arith.constant dense<0.000000e+00> : vector<8x32xf32>
    %116 = tpu.matmul %107, %115, %cst_113 {dimension_numbers = #tpu.dot_dimension_numbers<[1], [0], [0], [1], [0, 0, 1, 1], [], []>} : vector<8x32xbf16>, vector<32x32xbf16>, vector<8x32xf32> -> vector<8x32xf32>
    %c3_114 = arith.constant 3 : index
    %c0_115 = arith.constant 0 : index
    %c0_116 = arith.constant 0 : index
    %117 = vector.load %arg17[%c3_114, %c0_115, %c0_116] : memref<9x32x32xbf16, #tpu.memory_space<vmem>>, vector<1x32x32xbf16>
    %118 = vector.shape_cast %117 : vector<1x32x32xbf16> to vector<32x32xbf16>
    %cst_117 = arith.constant dense<0.000000e+00> : vector<8x32xf32>
    %119 = tpu.matmul %107, %118, %cst_117 {dimension_numbers = #tpu.dot_dimension_numbers<[1], [0], [0], [1], [0, 0, 1, 1], [], []>} : vector<8x32xbf16>, vector<32x32xbf16>, vector<8x32xf32> -> vector<8x32xf32>
    %c4_118 = arith.constant 4 : index
    %c0_119 = arith.constant 0 : index
    %c0_120 = arith.constant 0 : index
    %120 = vector.load %arg17[%c4_118, %c0_119, %c0_120] : memref<9x32x32xbf16, #tpu.memory_space<vmem>>, vector<1x32x32xbf16>
    %121 = vector.shape_cast %120 : vector<1x32x32xbf16> to vector<32x32xbf16>
    %cst_121 = arith.constant dense<0.000000e+00> : vector<8x32xf32>
    %122 = tpu.matmul %107, %121, %cst_121 {dimension_numbers = #tpu.dot_dimension_numbers<[1], [0], [0], [1], [0, 0, 1, 1], [], []>} : vector<8x32xbf16>, vector<32x32xbf16>, vector<8x32xf32> -> vector<8x32xf32>
    %c5_122 = arith.constant 5 : index
    %c0_123 = arith.constant 0 : index
    %c0_124 = arith.constant 0 : index
    %123 = vector.load %arg17[%c5_122, %c0_123, %c0_124] : memref<9x32x32xbf16, #tpu.memory_space<vmem>>, vector<1x32x32xbf16>
    %124 = vector.shape_cast %123 : vector<1x32x32xbf16> to vector<32x32xbf16>
    %cst_125 = arith.constant dense<0.000000e+00> : vector<8x32xf32>
    %125 = tpu.matmul %107, %124, %cst_125 {dimension_numbers = #tpu.dot_dimension_numbers<[1], [0], [0], [1], [0, 0, 1, 1], [], []>} : vector<8x32xbf16>, vector<32x32xbf16>, vector<8x32xf32> -> vector<8x32xf32>
    %c6_126 = arith.constant 6 : index
    %c0_127 = arith.constant 0 : index
    %c0_128 = arith.constant 0 : index
    %126 = vector.load %arg17[%c6_126, %c0_127, %c0_128] : memref<9x32x32xbf16, #tpu.memory_space<vmem>>, vector<1x32x32xbf16>
    %127 = vector.shape_cast %126 : vector<1x32x32xbf16> to vector<32x32xbf16>
    %cst_129 = arith.constant dense<0.000000e+00> : vector<8x32xf32>
    %128 = tpu.matmul %107, %127, %cst_129 {dimension_numbers = #tpu.dot_dimension_numbers<[1], [0], [0], [1], [0, 0, 1, 1], [], []>} : vector<8x32xbf16>, vector<32x32xbf16>, vector<8x32xf32> -> vector<8x32xf32>
    %c7_130 = arith.constant 7 : index
    %c0_131 = arith.constant 0 : index
    %c0_132 = arith.constant 0 : index
    %129 = vector.load %arg17[%c7_130, %c0_131, %c0_132] : memref<9x32x32xbf16, #tpu.memory_space<vmem>>, vector<1x32x32xbf16>
    %130 = vector.shape_cast %129 : vector<1x32x32xbf16> to vector<32x32xbf16>
    %cst_133 = arith.constant dense<0.000000e+00> : vector<8x32xf32>
    %131 = tpu.matmul %107, %130, %cst_133 {dimension_numbers = #tpu.dot_dimension_numbers<[1], [0], [0], [1], [0, 0, 1, 1], [], []>} : vector<8x32xbf16>, vector<32x32xbf16>, vector<8x32xf32> -> vector<8x32xf32>
    %c8_134 = arith.constant 8 : index
    %c0_135 = arith.constant 0 : index
    %c0_136 = arith.constant 0 : index
    %132 = vector.load %arg17[%c8_134, %c0_135, %c0_136] : memref<9x32x32xbf16, #tpu.memory_space<vmem>>, vector<1x32x32xbf16>
    %133 = vector.shape_cast %132 : vector<1x32x32xbf16> to vector<32x32xbf16>
    %cst_137 = arith.constant dense<0.000000e+00> : vector<8x32xf32>
    %134 = tpu.matmul %107, %133, %cst_137 {dimension_numbers = #tpu.dot_dimension_numbers<[1], [0], [0], [1], [0, 0, 1, 1], [], []>} : vector<8x32xbf16>, vector<32x32xbf16>, vector<8x32xf32> -> vector<8x32xf32>
    %135 = tpu.concatenate %110, %113, %116, %119, %122, %125, %128, %131, %134 in 0 : vector<8x32xf32>, vector<8x32xf32>, vector<8x32xf32>, vector<8x32xf32>, vector<8x32xf32>, vector<8x32xf32>, vector<8x32xf32>, vector<8x32xf32>, vector<8x32xf32> -> vector<72x32xf32>
    %136 = arith.truncf %135 : vector<72x32xf32> to vector<72x32xbf16>
    %c0_138 = arith.constant 0 : index
    %c0_139 = arith.constant 0 : index
    %137 = vector.load %arg18[%c0_138, %c0_139] : memref<8x72xbf16, #tpu.memory_space<vmem>>, vector<8x72xbf16>
    %cst_140 = arith.constant dense<0.000000e+00> : vector<8x32xf32>
    %138 = tpu.matmul %137, %136, %cst_140 {dimension_numbers = #tpu.dot_dimension_numbers<[1], [0], [0], [1], [0, 0, 1, 1], [], []>} : vector<8x72xbf16>, vector<72x32xbf16>, vector<8x32xf32> -> vector<8x32xf32>
    %c0_141 = arith.constant 0 : index
    %c0_142 = arith.constant 0 : index
    %139 = vector.load %arg19[%c0_141, %c0_142] : memref<8x1xf32, #tpu.memory_space<vmem>>, vector<8x1xf32>
    %140 = vector.broadcast %139 : vector<8x1xf32> to vector<8x32xf32>
    %141 = arith.addf %138, %140 : vector<8x32xf32>
    %cst_143 = arith.constant 0.000000e+00 : f32
    %142 = vector.broadcast %cst_143 : f32 to vector<8x32xf32>
    %143 = arith.maximumf %141, %142 : vector<8x32xf32>
    %144 = arith.truncf %143 : vector<8x32xf32> to vector<8x32xbf16>
    %c0_144 = arith.constant 0 : index
    %c0_145 = arith.constant 0 : index
    %145 = vector.load %arg20[%c0_144, %c0_145] : memref<16x8xbf16, #tpu.memory_space<vmem>>, vector<16x8xbf16>
    %cst_146 = arith.constant dense<0.000000e+00> : vector<16x32xf32>
    %146 = tpu.matmul %145, %144, %cst_146 {dimension_numbers = #tpu.dot_dimension_numbers<[1], [0], [0], [1], [0, 0, 1, 1], [], []>} : vector<16x8xbf16>, vector<8x32xbf16>, vector<16x32xf32> -> vector<16x32xf32>
    %c0_147 = arith.constant 0 : index
    %c0_148 = arith.constant 0 : index
    %147 = vector.load %arg21[%c0_147, %c0_148] : memref<16x1xf32, #tpu.memory_space<vmem>>, vector<16x1xf32>
    %148 = vector.broadcast %147 : vector<16x1xf32> to vector<16x32xf32>
    %149 = arith.addf %146, %148 : vector<16x32xf32>
    %150 = arith.addf %149, %98 : vector<16x32xf32>
    %cst_149 = arith.constant 0.000000e+00 : f32
    %151 = vector.broadcast %cst_149 : f32 to vector<16x32xf32>
    %152 = arith.maximumf %150, %151 : vector<16x32xf32>
    %c0_150 = arith.constant 0 : index
    %c0_151 = arith.constant 0 : index
    %153 = vector.load %arg22[%c0_150, %c0_151] : memref<2x32xbf16, #tpu.memory_space<vmem>>, vector<2x32xbf16>
    %154 = arith.truncf %152 : vector<16x32xf32> to vector<16x32xbf16>
    %cst_152 = arith.constant dense<0.000000e+00> : vector<2x16xf32>
    %155 = tpu.matmul %153, %154, %cst_152 {dimension_numbers = #tpu.dot_dimension_numbers<[1], [1], [0], [0], [0, 0, 1, 0], [], []>} : vector<2x32xbf16>, vector<16x32xbf16>, vector<2x16xf32> -> vector<2x16xf32>
    %156 = arith.truncf %155 : vector<2x16xf32> to vector<2x16xbf16>
    %c0_153 = arith.constant 0 : index
    %c0_154 = arith.constant 0 : index
    %157 = vector.load %arg23[%c0_153, %c0_154] : memref<16x20xbf16, #tpu.memory_space<vmem>>, vector<16x20xbf16>
    %cst_155 = arith.constant dense<0.000000e+00> : vector<2x20xf32>
    %158 = tpu.matmul %156, %157, %cst_155 {dimension_numbers = #tpu.dot_dimension_numbers<[1], [0], [0], [1], [0, 0, 1, 1], [], []>} : vector<2x16xbf16>, vector<16x20xbf16>, vector<2x20xf32> -> vector<2x20xf32>
    %c0_156 = arith.constant 0 : index
    %c0_157 = arith.constant 0 : index
    %159 = vector.load %arg24[%c0_156, %c0_157] : memref<1x20xf32, #tpu.memory_space<vmem>>, vector<1x20xf32>
    %160 = vector.broadcast %159 : vector<1x20xf32> to vector<2x20xf32>
    %161 = arith.addf %158, %160 : vector<2x20xf32>
    %c0_158 = arith.constant 0 : index
    %c0_159 = arith.constant 0 : index
    %162 = vector.load %arg25[%c0_158, %c0_159] : memref<2x20xf32, #tpu.memory_space<vmem>>, vector<2x20xf32>
    tpu.vector_store %arg25[%c0_158, %c0_159], %161 {strides = array<i32>} : memref<2x20xf32, #tpu.memory_space<vmem>>, vector<2x20xf32>,
    return
  }
  func.func @transform_0(%arg0: i32) -> (i32, i32) {
    %c0_i32 = arith.constant 0 : i32
    %c0_i32_0 = arith.constant 0 : i32
    return %c0_i32, %arg0 : i32, i32
  }
  func.func @transform_1(%arg0: i32) -> (i32, i32, i32) {
    %c0_i32 = arith.constant 0 : i32
    %c0_i32_0 = arith.constant 0 : i32
    %c0_i32_1 = arith.constant 0 : i32
    %c0_i32_2 = arith.constant 0 : i32
    return %c0_i32, %c0_i32_0, %c0_i32_1 : i32, i32, i32
  }
  func.func @transform_2(%arg0: i32) -> (i32, i32) {
    %c0_i32 = arith.constant 0 : i32
    %c0_i32_0 = arith.constant 0 : i32
    %c0_i32_1 = arith.constant 0 : i32
    return %c0_i32, %c0_i32_0 : i32, i32
  }
  func.func @transform_3(%arg0: i32) -> (i32, i32) {
    %c0_i32 = arith.constant 0 : i32
    %c0_i32_0 = arith.constant 0 : i32
    %c0_i32_1 = arith.constant 0 : i32
    return %c0_i32, %c0_i32_0 : i32, i32
  }
  func.func @transform_4(%arg0: i32) -> (i32, i32) {
    %c0_i32 = arith.constant 0 : i32
    %c0_i32_0 = arith.constant 0 : i32
    %c0_i32_1 = arith.constant 0 : i32
    return %c0_i32, %c0_i32_0 : i32, i32
  }
  func.func @transform_5(%arg0: i32) -> (i32, i32) {
    %c0_i32 = arith.constant 0 : i32
    %c0_i32_0 = arith.constant 0 : i32
    %c0_i32_1 = arith.constant 0 : i32
    return %c0_i32, %c0_i32_0 : i32, i32
  }
  func.func @transform_6(%arg0: i32) -> (i32, i32, i32) {
    %c0_i32 = arith.constant 0 : i32
    %c0_i32_0 = arith.constant 0 : i32
    %c0_i32_1 = arith.constant 0 : i32
    %c0_i32_2 = arith.constant 0 : i32
    return %c0_i32, %c0_i32_0, %c0_i32_1 : i32, i32, i32
  }
  func.func @transform_7(%arg0: i32) -> (i32, i32) {
    %c0_i32 = arith.constant 0 : i32
    %c0_i32_0 = arith.constant 0 : i32
    %c0_i32_1 = arith.constant 0 : i32
    return %c0_i32, %c0_i32_0 : i32, i32
  }
  func.func @transform_8(%arg0: i32) -> (i32, i32) {
    %c0_i32 = arith.constant 0 : i32
    %c0_i32_0 = arith.constant 0 : i32
    %c0_i32_1 = arith.constant 0 : i32
    return %c0_i32, %c0_i32_0 : i32, i32
  }
  func.func @transform_9(%arg0: i32) -> (i32, i32) {
    %c0_i32 = arith.constant 0 : i32
    %c0_i32_0 = arith.constant 0 : i32
    %c0_i32_1 = arith.constant 0 : i32
    return %c0_i32, %c0_i32_0 : i32, i32
  }
  func.func @transform_10(%arg0: i32) -> (i32, i32) {
    %c0_i32 = arith.constant 0 : i32
    %c0_i32_0 = arith.constant 0 : i32
    %c0_i32_1 = arith.constant 0 : i32
    return %c0_i32, %c0_i32_0 : i32, i32
  }
  func.func @transform_11(%arg0: i32) -> (i32, i32) {
    %c0_i32 = arith.constant 0 : i32
    %c0_i32_0 = arith.constant 0 : i32
    %c0_i32_1 = arith.constant 0 : i32
    return %c0_i32, %c0_i32_0 : i32, i32
  }
  func.func @transform_12(%arg0: i32) -> (i32, i32) {
    %c0_i32 = arith.constant 0 : i32
    %c0_i32_0 = arith.constant 0 : i32
    %c0_i32_1 = arith.constant 0 : i32
    return %c0_i32, %c0_i32_0 : i32, i32
  }
  func.func @transform_13(%arg0: i32) -> (i32, i32) {
    %c0_i32 = arith.constant 0 : i32
    %c0_i32_0 = arith.constant 0 : i32
    %c0_i32_1 = arith.constant 0 : i32
    return %c0_i32, %c0_i32_0 : i32, i32
  }
  func.func @transform_14(%arg0: i32) -> (i32, i32) {
    %c0_i32 = arith.constant 0 : i32
    %c0_i32_0 = arith.constant 0 : i32
    %c0_i32_1 = arith.constant 0 : i32
    return %c0_i32, %c0_i32_0 : i32, i32
  }
  func.func @transform_15(%arg0: i32) -> (i32, i32) {
    %c0_i32 = arith.constant 0 : i32
    %c0_i32_0 = arith.constant 0 : i32
    %c0_i32_1 = arith.constant 0 : i32
    return %c0_i32, %c0_i32_0 : i32, i32
  }
  func.func @transform_16(%arg0: i32) -> (i32, i32, i32) {
    %c0_i32 = arith.constant 0 : i32
    %c0_i32_0 = arith.constant 0 : i32
    %c0_i32_1 = arith.constant 0 : i32
    %c0_i32_2 = arith.constant 0 : i32
    return %c0_i32, %c0_i32_0, %c0_i32_1 : i32, i32, i32
  }
  func.func @transform_17(%arg0: i32) -> (i32, i32) {
    %c0_i32 = arith.constant 0 : i32
    %c0_i32_0 = arith.constant 0 : i32
    %c0_i32_1 = arith.constant 0 : i32
    return %c0_i32, %c0_i32_0 : i32, i32
  }
  func.func @transform_18(%arg0: i32) -> (i32, i32) {
    %c0_i32 = arith.constant 0 : i32
    %c0_i32_0 = arith.constant 0 : i32
    %c0_i32_1 = arith.constant 0 : i32
    return %c0_i32, %c0_i32_0 : i32, i32
  }
  func.func @transform_19(%arg0: i32) -> (i32, i32) {
    %c0_i32 = arith.constant 0 : i32
    %c0_i32_0 = arith.constant 0 : i32
    %c0_i32_1 = arith.constant 0 : i32
    return %c0_i32, %c0_i32_0 : i32, i32
  }
  func.func @transform_20(%arg0: i32) -> (i32, i32) {
    %c0_i32 = arith.constant 0 : i32
    %c0_i32_0 = arith.constant 0 : i32
    %c0_i32_1 = arith.constant 0 : i32
    return %c0_i32, %c0_i32_0 : i32, i32
  }
  func.func @transform_21(%arg0: i32) -> (i32, i32) {
    %c0_i32 = arith.constant 0 : i32
    %c0_i32_0 = arith.constant 0 : i32
    %c0_i32_1 = arith.constant 0 : i32
    return %c0_i32, %c0_i32_0 : i32, i32
  }
  func.func @transform_22(%arg0: i32) -> (i32, i32) {
    %c0_i32 = arith.constant 0 : i32
    %c0_i32_0 = arith.constant 0 : i32
    %c0_i32_1 = arith.constant 0 : i32
    return %c0_i32, %c0_i32_0 : i32, i32
  }
  func.func @transform_23(%arg0: i32) -> (i32, i32) {
    %c0_i32 = arith.constant 0 : i32
    %c0_i32_0 = arith.constant 0 : i32
    %c0_i32_1 = arith.constant 0 : i32
    return %c0_i32, %c0_i32_0 : i32, i32
  }
  func.func @transform_24(%arg0: i32) -> (i32, i32) {
    %c0_i32 = arith.constant 0 : i32
    %c0_i32_0 = arith.constant 0 : i32
    return %arg0, %c0_i32 : i32, i32
  }
}

</mosaic_0001>

<bundles_post_ra>
// kernel: resnet_spline_forward.1
= control target key start
LH: loop header
LB: loop body
LE: loop exit
PB: predicated region body
PF: predicated region fallthrough
CT: control target
= control target key end

     0   :  { %s8397_s0 = inlined_call_operand.vmem [shape: bf16[4,512], index: 0, kind: input, shape index: {}]   ;;  %s8398_s1 = inlined_call_operand.hbm [shape: bf16[9,512,128], index: 1, kind: input, shape index: {}]   ;;  %s8399_s2 = inlined_call_operand.hbm [shape: bf16[8,36], index: 2, kind: input, shape index: {}]   ;;  %s8400_s3 = inlined_call_operand.vmem [shape: f32[8,1], index: 3, kind: input, shape index: {}]   ;;  %s8401_s4 = inlined_call_operand.hbm [shape: bf16[4,8], index: 4, kind: input, shape index: {}]   ;;  %s8402_s5 = inlined_call_operand.vmem [shape: f32[4,1], index: 5, kind: input, shape index: {}]   ;;  %s8403_s6 = inlined_call_operand.vmem [shape: bf16[9,128,32], index: 6, kind: input, shape index: {}]   ;;  %s8404_s7 = inlined_call_operand.hbm [shape: bf16[4,36], index: 7, kind: input, shape index: {}]   ;;  %s8405_s8 = inlined_call_operand.vmem [shape: f32[4,1], index: 8, kind: input, shape index: {}]   ;;  %s8406_s9 = inlined_call_operand.vmem [shape: bf16[128,32], index: 9, kind: input, shape index: {}]   ;;  %s8407_s10 = inlined_call_operand.vmem [shape: bf16[16,8], index: 10, kind: input, shape index: {}]   ;;  %s8408_s11 = inlined_call_operand.vmem [shape: f32[16,1], index: 11, kind: input, shape index: {}]   ;;  %s8409_s12 = inlined_call_operand.vmem [shape: bf16[16,4], index: 12, kind: input, shape index: {}]   ;;  %s8410_s13 = inlined_call_operand.vmem [shape: f32[16,1], index: 13, kind: input, shape index: {}]   ;;  %s8411_s14 = inlined_call_operand.hbm [shape: bf16[8,16], index: 14, kind: input, shape index: {}]   ;;  %s8412_s15 = inlined_call_operand.vmem [shape: f32[8,1], index: 15, kind: input, shape index: {}]   ;;  %s8413_s16 = inlined_call_operand.hbm [shape: bf16[9,32,32], index: 16, kind: input, shape index: {}]   ;;  %s8414_s17 = inlined_call_operand.hbm [shape: bf16[8,72], index: 17, kind: input, shape index: {}]   ;;  %s8415_s18 = inlined_call_operand.vmem [shape: f32[8,1], index: 18, kind: input, shape index: {}]   ;;  %s8416_s19 = inlined_call_operand.vmem [shape: bf16[16,8], index: 19, kind: input, shape index: {}]   ;;  %s8417_s20 = inlined_call_operand.vmem [shape: f32[16,1], index: 20, kind: input, shape index: {}]   ;;  %s8418_s21 = inlined_call_operand.hbm [shape: bf16[2,32], index: 21, kind: input, shape index: {}]   ;;  %s8419_s22 = inlined_call_operand.hbm [shape: bf16[16,20], index: 22, kind: input, shape index: {}]   ;;  %s8420_s23 = inlined_call_operand.hbm [shape: f32[1,20], index: 23, kind: input, shape index: {}]   ;;  %s8421_s24 = inlined_call_operand.vmem [shape: f32[2,20], index: 24, kind: output, shape index: {}]  }
   0x1   :  { %8429 = sst [smem:[#allocation24_spill]] %s8397_s0 }
   0x2   :  { %8430 = sst [smem:[#allocation25_spill]] %s8398_s1 }
   0x3   :  { %8431 = sst [smem:[#allocation26_spill]] %s8399_s2 }
   0x4   :  { %8432 = sst [smem:[#allocation27_spill]] %s8400_s3 }
   0x5   :  { %8433 = sst [smem:[#allocation28_spill]] %s8401_s4 }
   0x6   :  { %8434 = sst [smem:[#allocation29_spill]] %s8402_s5 }
   0x7   :  { %8435 = sst [smem:[#allocation30_spill]] %s8403_s6 }
   0x8   :  { %8436 = sst [smem:[#allocation31_spill]] %s8404_s7 }
   0x9   :  { %8437 = sst [smem:[#allocation32_spill]] %s8405_s8 }
   0xa   :  { %29 = vsyncpa [#allocation3], 0 }
   0xb   :  { %30 = vsyncpa [#allocation5], 0 }
   0xc   :  { %31 = vsyncpa [#allocation8], 0 }
   0xd   :  { %32 = vsyncpa [#allocation11], 0 }
   0xe   :  { %33 = vsyncpa [#allocation14], 0 }
   0xf   :  { %34 = vsyncpa [#allocation17], 0  ;;  %s7544_s5 = smov [#allocation4]   ;;  %s7545_s27 = smov [#allocation7]  }
  0x10   :  { %s55_s26 = sshll.u32 %s7544_s5, 4  ;;  %s81_s28 = sshll.u32 %s7545_s27, 4  ;;  %s56_s26 = int_to_ptr.vmem [resolvable:$true] %s55_s26  ;;  %s82_s28 = int_to_ptr.vmem [resolvable:$true] %s81_s28 }
  0x11   :  { %s8438_s29 = sld [smem:[#allocation26_spill]] }
  0x17   :  { %s7312_s0 = scalar_lea.hbm %s8438_s29, 64 }
  0x18   :  { %p7313_p0 = scmp.ne.s32.totalorder %s8438_s29, %s7312_s0  ;;  %p7316_p1 = scmp.lt.u32.totalorder %s7312_s0, %s8438_s29 }
  0x1a   :  { %p7318_p2 = pnand %p7316_p1, %p7313_p0 }
  0x1c   :  { %7321 = shalt.err (!%p7318_p2)
}
  0x1d   :  { %s7322_s8 = scalar_lea.vmem %s56_s26, 64  ;;  %p7327_p4 = scmp.lt.s32.totalorder %s56_s26, %s56_s26 }
  0x1e   :  { %p7323_p3 = scmp.ne.s32.totalorder %s56_s26, %s7322_s8  ;;  %p7328_p5 = scmp.lt.s32.totalorder %s7322_s8, %s7322_s8 }
  0x20   :  { %p7329_p6 = por %p7328_p5, %p7327_p4 }
  0x22   :  { %p7330_p7 = pnand %p7329_p6, %p7323_p3 }
  0x24   :  { %7333 = shalt.err (!%p7330_p7)
}
  0x25   :  { %58 = dma.hbm_to_vmem [thread:$0]  %s8438_s29, 64, %s56_s26, [#allocation5]  }
  0x26   :  { %s8439_s6 = sld [smem:[#allocation31_spill]] }
  0x2c   :  { %s7334_s2 = scalar_lea.hbm %s8439_s6, 32 }
  0x2d   :  { %p7335_p8 = scmp.ne.s32.totalorder %s8439_s6, %s7334_s2  ;;  %p7338_p9 = scmp.lt.u32.totalorder %s7334_s2, %s8439_s6 }
  0x2f   :  { %p7340_p10 = pnand %p7338_p9, %p7335_p8 }
  0x31   :  { %7343 = shalt.err (!%p7340_p10)
}
  0x32   :  { %s7344_s25 = scalar_lea.vmem %s82_s28, 32  ;;  %p7349_p12 = scmp.lt.s32.totalorder %s82_s28, %s82_s28 }
  0x33   :  { %p7345_p11 = scmp.ne.s32.totalorder %s82_s28, %s7344_s25  ;;  %p7350_p13 = scmp.lt.s32.totalorder %s7344_s25, %s7344_s25 }
  0x35   :  { %p7351_p0 = por %p7350_p13, %p7349_p12 }
  0x37   :  { %p7352_p1 = pnand %p7351_p0, %p7345_p11 }
  0x39   :  { %7355 = shalt.err (!%p7352_p1)
}
  0x3a   :  { %84 = dma.hbm_to_vmem [thread:$0]  %s8439_s6, 32, %s82_s28, [#allocation8]  }
  0x3b   :  { %s7546_s8 = smov [#allocation10]   ;;  %s7547_s1 = smov [#allocation13]  }
  0x3c   :  { %s114_s4 = sshll.u32 %s7546_s8, 4  ;;  %s143_s5 = sshll.u32 %s7547_s1, 4  ;;  %s115_s4 = int_to_ptr.vmem [resolvable:$true] %s114_s4  ;;  %s7709_s5 = int_to_ptr.vmem [resolvable:$true] %s143_s5 }
  0x3d   :  { %s7356_s7 = scalar_lea.hbm %s8413_s16, 2304 }
  0x3e   :  { %p7357_p2 = scmp.ne.s32.totalorder %s8413_s16, %s7356_s7  ;;  %p7360_p3 = scmp.lt.u32.totalorder %s7356_s7, %s8413_s16 }
  0x40   :  { %p7362_p4 = pnand %p7360_p3, %p7357_p2 }
  0x42   :  { %7365 = shalt.err (!%p7362_p4)
}
  0x43   :  { %s7366_s28 = scalar_lea.vmem %s115_s4, 2304  ;;  %p7371_p6 = scmp.lt.s32.totalorder %s115_s4, %s115_s4 }
  0x44   :  { %p7367_p5 = scmp.ne.s32.totalorder %s115_s4, %s7366_s28  ;;  %p7372_p7 = scmp.lt.s32.totalorder %s7366_s28, %s7366_s28 }
  0x46   :  { %p7373_p8 = por %p7372_p7, %p7371_p6 }
  0x48   :  { %p7374_p9 = pnand %p7373_p8, %p7367_p5 }
  0x4a   :  { %7377 = shalt.err (!%p7374_p9)
}
  0x4b   :  { %s8427_s6 = smov 64   ;;  %s7549_s26 = smov 4  }
  0x4c   :  { %120 = dma.hbm_to_vmem [thread:$0]  %s8413_s16, 2304, %s115_s4, [#allocation11], %s8427_s6, %s8427_s6, %s7549_s26  }
  0x4d   :  { %s7378_s2 = scalar_lea.hbm %s8418_s21, 16 }
  0x4e   :  { %p7379_p10 = scmp.ne.s32.totalorder %s8418_s21, %s7378_s2  ;;  %p7382_p11 = scmp.lt.u32.totalorder %s7378_s2, %s8418_s21 }
  0x50   :  { %p7384_p12 = pnand %p7382_p11, %p7379_p10 }
  0x52   :  { %7387 = shalt.err (!%p7384_p12)
}
  0x53   :  { %s7388_s25 = scalar_lea.vmem %s7709_s5, 16  ;;  %s7392_s16 = scalar_lea.vmem %s7709_s5, 32 }
  0x54   :  { %p7389_p13 = scmp.ne.s32.totalorder %s7709_s5, %s7388_s25  ;;  %p7393_p0 = scmp.lt.s32.totalorder %s7709_s5, %s7709_s5 }
  0x55   :  { %p7394_p1 = scmp.lt.s32.totalorder %s7392_s16, %s7388_s25 }
  0x57   :  { %p7395_p2 = por %p7394_p1, %p7393_p0 }
  0x59   :  { %p7396_p3 = pnand %p7395_p2, %p7389_p13 }
  0x5b   :  { %7399 = shalt.err (!%p7396_p3)
}
  0x5c   :  { %146 = dma.hbm_to_vmem [thread:$0]  %s8418_s21, 16, %s7709_s5, [#allocation14]  }
  0x5d   :  { %s7550_s29 = smov [#allocation2]   ;;  %s7551_s1 = smov [#allocation6]  }
  0x5e   :  { %s42_s8 = sshll.u32 %s7550_s29, 4  ;;  %s67_s27 = sshll.u32 %s7551_s1, 4  ;;  %s43_s8 = int_to_ptr.vmem [resolvable:$true] %s42_s8  ;;  %s68_s27 = int_to_ptr.vmem [resolvable:$true] %s67_s27 }
  0x5f   :  { %s8440_s30 = sld [smem:[#allocation25_spill]] }
  0x65   :  { %s7400_s0 = scalar_lea.hbm %s8440_s30, 36864 }
  0x66   :  { %p7401_p4 = scmp.ne.s32.totalorder %s8440_s30, %s7400_s0  ;;  %p7404_p5 = scmp.lt.u32.totalorder %s7400_s0, %s8440_s30 }
  0x68   :  { %p7406_p6 = pnand %p7404_p5, %p7401_p4 }
  0x6a   :  { %7409 = shalt.err (!%p7406_p6)
}
  0x6b   :  { %s7410_s21 = scalar_lea.vmem %s43_s8, 36864  ;;  %p7415_p8 = scmp.lt.s32.totalorder %s43_s8, %s43_s8 }
  0x6c   :  { %p7411_p7 = scmp.ne.s32.totalorder %s43_s8, %s7410_s21  ;;  %p7416_p9 = scmp.lt.s32.totalorder %s7410_s21, %s7410_s21 }
  0x6e   :  { %p7417_p10 = por %p7416_p9, %p7415_p8 }
  0x70   :  { %p7418_p11 = pnand %p7417_p10, %p7411_p7 }
  0x72   :  { %7421 = shalt.err (!%p7418_p11)
}
  0x73   :  { %s8441_s5 = smov 64   ;;  %s8442_s6 = sld [smem:[#allocation28_spill]] }
  0x74   :  { %48 = dma.hbm_to_vmem [thread:$0]  %s8440_s30, 36864, %s43_s8, [#allocation3], %s8441_s5, %s8441_s5, %s7549_s26  }
  0x79   :  { %s7422_s2 = scalar_lea.hbm %s8442_s6, 32 }
  0x7a   :  { %p7423_p12 = scmp.ne.s32.totalorder %s8442_s6, %s7422_s2  ;;  %p7426_p13 = scmp.lt.u32.totalorder %s7422_s2, %s8442_s6 }
  0x7c   :  { %p7428_p0 = pnand %p7426_p13, %p7423_p12 }
  0x7e   :  { %7431 = shalt.err (!%p7428_p0)
}
  0x7f   :  { %s7432_s16 = scalar_lea.vmem %s68_s27, 32  ;;  %p7437_p2 = scmp.lt.s32.totalorder %s68_s27, %s68_s27 }
  0x80   :  { %p7433_p1 = scmp.ne.s32.totalorder %s68_s27, %s7432_s16  ;;  %p7438_p3 = scmp.lt.s32.totalorder %s7432_s16, %s7432_s16 }
  0x82   :  { %p7439_p4 = por %p7438_p3, %p7437_p2 }
  0x84   :  { %p7440_p5 = pnand %p7439_p4, %p7433_p1 }
  0x86   :  { %7443 = shalt.err (!%p7440_p5)
}
  0x87   :  { %70 = dma.hbm_to_vmem [thread:$0]  %s8442_s6, 32, %s68_s27, [#allocation5]  }
  0x88   :  { %s7552_s21 = smov [#allocation9]   ;;  %s7553_s28 = smov [#allocation12]  }
  0x89   :  { %s103_s4 = sshll.u32 %s7552_s21, 4  ;;  %s127_s29 = sshll.u32 %s7553_s28, 4  ;;  %s104_s4 = int_to_ptr.vmem [resolvable:$true] %s103_s4  ;;  %s128_s29 = int_to_ptr.vmem [resolvable:$true] %s127_s29 }
  0x8a   :  { %s7444_s7 = scalar_lea.hbm %s8411_s14, 64 }
  0x8b   :  { %p7445_p6 = scmp.ne.s32.totalorder %s8411_s14, %s7444_s7  ;;  %p7448_p7 = scmp.lt.u32.totalorder %s7444_s7, %s8411_s14 }
  0x8d   :  { %p7450_p8 = pnand %p7448_p7, %p7445_p6 }
  0x8f   :  { %7453 = shalt.err (!%p7450_p8)
}
  0x90   :  { %s7454_s27 = scalar_lea.vmem %s104_s4, 64  ;;  %p7459_p10 = scmp.lt.s32.totalorder %s104_s4, %s104_s4 }
  0x91   :  { %p7455_p9 = scmp.ne.s32.totalorder %s104_s4, %s7454_s27  ;;  %p7460_p11 = scmp.lt.s32.totalorder %s7454_s27, %s7454_s27 }
  0x93   :  { %p7461_p12 = por %p7460_p11, %p7459_p10 }
  0x95   :  { %p7462_p13 = pnand %p7461_p12, %p7455_p9 }
  0x97   :  { %7465 = shalt.err (!%p7462_p13)
}
  0x98   :  { %106 = dma.hbm_to_vmem [thread:$0]  %s8411_s14, 64, %s104_s4, [#allocation8]  }
  0x99   :  { %s7466_s28 = scalar_lea.hbm %s8414_s17, 64 }
  0x9a   :  { %p7467_p0 = scmp.ne.s32.totalorder %s8414_s17, %s7466_s28  ;;  %p7470_p1 = scmp.lt.u32.totalorder %s7466_s28, %s8414_s17 }
  0x9c   :  { %p7472_p2 = pnand %p7470_p1, %p7467_p0 }
  0x9e   :  { %7475 = shalt.err (!%p7472_p2)
}
  0x9f   :  { %s7476_s3 = scalar_lea.vmem %s128_s29, 64  ;;  %p7481_p4 = scmp.lt.s32.totalorder %s128_s29, %s128_s29 }
  0xa0   :  { %p7477_p3 = scmp.ne.s32.totalorder %s128_s29, %s7476_s3  ;;  %p7482_p5 = scmp.lt.s32.totalorder %s7476_s3, %s7476_s3 }
  0xa2   :  { %p7483_p6 = por %p7482_p5, %p7481_p4 }
  0xa4   :  { %p7484_p7 = pnand %p7483_p6, %p7477_p3 }
  0xa6   :  { %7487 = shalt.err (!%p7484_p7)
}
  0xa7   :  { %130 = dma.hbm_to_vmem [thread:$0]  %s8414_s17, 64, %s128_s29, [#allocation11]  }
  0xa8   :  { %s7554_s25 = smov [#allocation15]   ;;  %s7555_s27 = smov [#allocation16]  }
  0xa9   :  { %s152_s16 = sshll.u32 %s7554_s25, 4  ;;  %s165_s6 = sshll.u32 %s7555_s27, 4  ;;  %s153_s16 = int_to_ptr.vmem [resolvable:$true] %s152_s16  ;;  %s166_s6 = int_to_ptr.vmem [resolvable:$true] %s165_s6 }
  0xaa   :  { %s7488_s21 = scalar_lea.hbm %s8419_s22, 128 }
  0xab   :  { %p7489_p8 = scmp.ne.s32.totalorder %s8419_s22, %s7488_s21  ;;  %p7492_p9 = scmp.lt.u32.totalorder %s7488_s21, %s8419_s22 }
  0xad   :  { %p7494_p10 = pnand %p7492_p9, %p7489_p8 }
  0xaf   :  { %7497 = shalt.err (!%p7494_p10)
}
  0xb0   :  { %s7498_s17 = scalar_lea.vmem %s153_s16, 128  ;;  %p7503_p12 = scmp.lt.s32.totalorder %s153_s16, %s153_s16 }
  0xb1   :  { %p7499_p11 = scmp.ne.s32.totalorder %s153_s16, %s7498_s17  ;;  %p7504_p13 = scmp.lt.s32.totalorder %s7498_s17, %s7498_s17 }
  0xb3   :  { %p7505_p0 = por %p7504_p13, %p7503_p12 }
  0xb5   :  { %p7506_p1 = pnand %p7505_p0, %p7499_p11 }
  0xb7   :  { %7509 = shalt.err (!%p7506_p1)
}
  0xb8   :  { %158 = dma.hbm_to_vmem [thread:$0]  %s8419_s22, 128, %s153_s16, [#allocation14], %s8441_s5, %s8441_s5, %s7549_s26  }
  0xb9   :  { %s7510_s4 = scalar_lea.hbm %s8420_s23, 16 }
  0xba   :  { %p7511_p2 = scmp.ne.s32.totalorder %s8420_s23, %s7510_s4  ;;  %p7514_p3 = scmp.lt.u32.totalorder %s7510_s4, %s8420_s23 }
  0xbc   :  { %p7516_p4 = pnand %p7514_p3, %p7511_p2 }
  0xbe   :  { %7519 = shalt.err (!%p7516_p4)
}
  0xbf   :  { %s7520_s21 = scalar_lea.vmem %s166_s6, 16  ;;  %s7524_s28 = scalar_lea.vmem %s166_s6, 32 }
  0xc0   :  { %p7521_p5 = scmp.ne.s32.totalorder %s166_s6, %s7520_s21  ;;  %p7525_p6 = scmp.lt.s32.totalorder %s166_s6, %s166_s6 }
  0xc1   :  { %p7526_p7 = scmp.lt.s32.totalorder %s7524_s28, %s7520_s21 }
  0xc3   :  { %p7527_p8 = por %p7526_p7, %p7525_p6 }
  0xc5   :  { %p7528_p9 = pnand %p7527_p8, %p7521_p5 }
  0xc7   :  { %7531 = shalt.err (!%p7528_p9)
}
  0xc8   :  { %168 = dma.hbm_to_vmem [thread:$0]  %s8420_s23, 16, %s166_s6, [#allocation17]  }
  0xc9   :  { %7532 = dma.done.wait [#allocation3], 36864  }
  0xca   :  { %7533 = vsyncadd [#allocation3], 4294930432 }
  0xcb   :  { %7534 = dma.done.wait [#allocation5], 96  }
  0xcc   :  { %7535 = vsyncadd [#allocation5], 4294967200 }
  0xcd   :  { %7536 = dma.done.wait [#allocation8], 96  }
  0xce   :  { %7537 = vsyncadd [#allocation8], 4294967200 }
  0xcf   :  { %7538 = dma.done.wait [#allocation11], 2368  }
  0xd0   :  { %7539 = vsyncadd [#allocation11], 4294964928 }
  0xd1   :  { %7540 = dma.done.wait [#allocation14], 144  }
  0xd2   :  { %7541 = vsyncadd [#allocation14], 4294967152 }
  0xd3   :  { %7542 = dma.done.wait [#allocation17], 16  }
  0xd4   :  { %7543 = vsyncadd [#allocation17], 4294967280  ;;  %v6921_v0 = vld [vmem:[#allocation2 + $0x40] sm:$0xff]   ;;  %v6925_v4 = vld [vmem:[#allocation2 + $0x48] sm:$0xff]   ;;  %v7556_v22 = vmov 1983009808   ;;  %v270_v24 = vlaneseq }
  0xd5   :  { %v6922_v1 = vld [vmem:[#allocation2 + $0xc0] sm:$0xff]   ;;  %6006 = vmatprep.subr.bf16.mxu0 %v6921_v0  ;;  %v6926_v5 = vld [vmem:[#allocation2 + $0xc8] sm:$0xff]   ;;  %v6929_v8 = vld [vmem:[#allocation2 + $0x50] sm:$0xff]   ;;  %v268_v23 = vunpack.c.l.s4 %v7556_v22  ;;  %s8443_s16 = sld [smem:[#allocation24_spill]]  ;;  %vm3267_vm0 = vcmask 1043456   ;;  %vm7558_vm1 = vmmov 0  }
  0xd6   :  { %v6923_v2 = vld [vmem:[#allocation2] sm:$0xff]   ;;  %6028 = vmatprep.subr.bf16.mxu1 %v6922_v1  ;;  %v6927_v6 = vld [vmem:[#allocation2 + $0x8] sm:$0xff]   ;;  %v6930_v9 = vld [vmem:[#allocation2 + $0xd0] sm:$0xff]   ;;  %v271_v30 = vshrl.u32 %v270_v24, 7  ;;  %s8444_s2 = sld [smem:[#allocation27_spill]]  ;;  %s8445_s29 = sld [smem:[#allocation29_spill]] }
  0xd7   :  { %v6924_v3 = vld [vmem:[#allocation2 + $0x80] sm:$0xff]   ;;  %6007 = vmatpush3.bf16.msra.mxu0 %v6923_v2  ;;  %v6928_v7 = vld [vmem:[#allocation2 + $0x88] sm:$0xff]   ;;  %v6931_v10 = vld [vmem:[#allocation2 + $0x10] sm:$0xff]   ;;  %v269_v29 = vunpack.c.0.s8 %v268_v23  ;;  %vm3286_vm2 = vcmask 1041408   ;;  %vm3282_vm3 = vcmask 293888   ;;  %s8446_s28 = sld [smem:[#allocation30_spill]] }
  0xd8   :  { %6029 = vmatpush3.bf16.msra.mxu1 %v6924_v3  ;;  %6008 = vmatprep.subr.bf16.mxu0 %v6925_v4  ;;  %v6932_v11 = vld [vmem:[#allocation2 + $0x90] sm:$0xff]   ;;  %v6933_v12 = vld [vmem:[#allocation2 + $0x58] sm:$0xff]   ;;  %v6937_v16 = vld [vmem:[#allocation2 + $0x60] sm:$0xff]   ;;  %vm3339_vm4 = vcmask 64512   ;;  %s8447_s8 = sld [smem:[#allocation32_spill]]  ;;  %vm4596_vm5 = vcmask 31744  }
  0xd9   :  { %6030 = vmatprep.subr.bf16.mxu1 %v6926_v5  ;;  %v6934_v13 = vld [vmem:[#allocation2 + $0xd8] sm:$0xff]   ;;  %v6938_v17 = vld [vmem:[#allocation2 + $0xe0] sm:$0xff]   ;;  %v6941_v20 = vld [vmem:[#allocation2 + $0x68] sm:$0xff]   ;;  %v272_v35 = vsub.s32 %v269_v29, %v271_v30  ;;  %vm4656_vm6 = vcmask 130048   ;;  %vm4718_vm7 = vcmask 261120   ;;  %vm5230_vm8 = vcmask 588800  }
  0xda   :  { %v6935_v14 = vld [vmem:[#allocation2 + $0x18] sm:$0xff]   ;;  %v6939_v18 = vld [vmem:[#allocation2 + $0x20] sm:$0xff]   ;;  %v6942_v21 = vld [vmem:[#allocation2 + $0xe8] sm:$0xff]   ;;  %vm5456_vm9 = vcmask 156672  }
  0xdb   :  { %6009 = vmatpush3.bf16.msra.mxu0 %v6927_v6  ;;  %v6936_v15 = vld [vmem:[#allocation2 + $0x98] sm:$0xff]   ;;  %v6940_v19 = vld [vmem:[#allocation2 + $0xa0] sm:$0xff]   ;;  %v6943_v25 = vld [vmem:[#allocation2 + $0x28] sm:$0xff]  }
  0xdc   :  { %6031 = vmatpush3.bf16.msra.mxu1 %v6928_v7  ;;  %6010 = vmatprep.subr.bf16.mxu0 %v6929_v8  ;;  %v6944_v26 = vld [vmem:[#allocation2 + $0xa8] sm:$0xff]   ;;  %v6945_v27 = vld [vmem:[#allocation2 + $0x70] sm:$0xff]   ;;  %v6949_v33 = vld [vmem:[#allocation2 + $0x78] sm:$0xff]  }
  0xdd   :  { %6032 = vmatprep.subr.bf16.mxu1 %v6930_v9  ;;  %v6946_v28 = vld [vmem:[#allocation2 + $0xf0] sm:$0xff]   ;;  %v6950_v34 = vld [vmem:[#allocation2 + $0xf8] sm:$0xff]   ;;  %v200_v38 = vld [vmem:[%s8443_s16] sm:$0xff] }
  0xde   :  { %v6947_v31 = vld [vmem:[#allocation2 + $0x30] sm:$0xff]   ;;  %v6951_v36 = vld [vmem:[#allocation2 + $0x38] sm:$0xff]   ;;  %v7825_v39 = vrot.slane %v200_v38, %v272_v35  ;;  %v266_v40 = vcombine.high %v200_v38, %v200_v38  ;;  %v6954_v41 = vld [vmem:[#allocation2 + $0x140] sm:$0xff]  }
  0xdf   :  { %6011 = vmatpush3.bf16.msra.mxu0 %v6931_v10  ;;  %v6948_v32 = vld [vmem:[#allocation2 + $0xb0] sm:$0xff]   ;;  %v6952_v37 = vld [vmem:[#allocation2 + $0xb8] sm:$0xff]   ;;  %v6955_v42 = vld [vmem:[#allocation2 + $0x1c0] sm:$0xff]  }
  0xe0   :  { %6033 = vmatpush3.bf16.msra.mxu1 %v6932_v11  ;;  %6012 = vmatprep.subr.bf16.mxu0 %v6933_v12  ;;  %v7829_v43 = vcombine.high %v7825_v39, %v7825_v39  ;;  %v7831_v44 = vrot.slane %v266_v40, %v272_v35  ;;  %v6956_v45 = vld [vmem:[#allocation2 + $0x100] sm:$0xff]   ;;  %v6958_v48 = vld [vmem:[#allocation2 + $0x148] sm:$0xff]   ;;  %v6962_v52 = vld [vmem:[#allocation2 + $0x150] sm:$0xff]  }
  0xe1   :  { %6034 = vmatprep.subr.bf16.mxu1 %v6934_v13  ;;  %v6957_v46 = vld [vmem:[#allocation2 + $0x180] sm:$0xff]   ;;  %v6959_v49 = vld [vmem:[#allocation2 + $0x1c8] sm:$0xff]   ;;  %v6963_v53 = vld [vmem:[#allocation2 + $0x1d0] sm:$0xff]  }
  0xe2   :  { %511 = vmatprep.mubr.bf16.mxu0 %v7829_v43  ;;  %v7836_v47 = vcombine.high %v7831_v44, %v7831_v44  ;;  %v6960_v50 = vld [vmem:[#allocation2 + $0x108] sm:$0xff]   ;;  %v6964_v54 = vld [vmem:[#allocation2 + $0x110] sm:$0xff]   ;;  %v6966_v56 = vld [vmem:[#allocation2 + $0x158] sm:$0xff]  }
  0xe3   :  { %6013 = vmatpush3.bf16.msra.mxu0 %v6935_v14  ;;  %v6961_v51 = vld [vmem:[#allocation2 + $0x188] sm:$0xff]   ;;  %v6965_v55 = vld [vmem:[#allocation2 + $0x190] sm:$0xff]   ;;  %v6967_v57 = vld [vmem:[#allocation2 + $0x1d8] sm:$0xff]  }
  0xe4   :  { %6035 = vmatpush3.bf16.msra.mxu1 %v6936_v15  ;;  %6014 = vmatprep.subr.bf16.mxu0 %v6937_v16  ;;  %v6968_v58 = vld [vmem:[#allocation2 + $0x118] sm:$0xff]   ;;  %v6970_v60 = vld [vmem:[#allocation2 + $0x160] sm:$0xff]   ;;  %v6974_v0 = vld [vmem:[#allocation2 + $0x168] sm:$0xff]  }
  0xe5   :  { %6036 = vmatprep.subr.bf16.mxu1 %v6938_v17  ;;  %551 = vmatprep.mubr.bf16.mxu1 %v7836_v47  ;;  %v6969_v59 = vld [vmem:[#allocation2 + $0x198] sm:$0xff]   ;;  %v6971_v61 = vld [vmem:[#allocation2 + $0x1e0] sm:$0xff]   ;;  %v6975_v1 = vld [vmem:[#allocation2 + $0x1e8] sm:$0xff]  }
  0xe6   :  { %v6972_v62 = vld [vmem:[#allocation2 + $0x120] sm:$0xff]   ;;  %v6976_v2 = vld [vmem:[#allocation2 + $0x128] sm:$0xff]   ;;  %v6978_v4 = vld [vmem:[#allocation2 + $0x170] sm:$0xff]  }
  0xe7   :  { %6015 = vmatpush3.bf16.msra.mxu0 %v6939_v18  ;;  %v6973_v63 = vld [vmem:[#allocation2 + $0x1a0] sm:$0xff]   ;;  %v6977_v3 = vld [vmem:[#allocation2 + $0x1a8] sm:$0xff]   ;;  %v6979_v5 = vld [vmem:[#allocation2 + $0x1f0] sm:$0xff]  }
  0xe8   :  { %6037 = vmatpush3.bf16.msra.mxu1 %v6940_v19  ;;  %6016 = vmatprep.subr.bf16.mxu0 %v6941_v20  ;;  %v6980_v6 = vld [vmem:[#allocation2 + $0x130] sm:$0xff]   ;;  %v6982_v8 = vld [vmem:[#allocation2 + $0x178] sm:$0xff]   ;;  %v6986_v12 = vld [vmem:[#allocation2 + $0x240] sm:$0xff]  }
  0xe9   :  { %6038 = vmatprep.subr.bf16.mxu1 %v6942_v21  ;;  %v6981_v7 = vld [vmem:[#allocation2 + $0x1b0] sm:$0xff]   ;;  %v6983_v9 = vld [vmem:[#allocation2 + $0x1f8] sm:$0xff]   ;;  %v6987_v13 = vld [vmem:[#allocation2 + $0x2c0] sm:$0xff]  }
  0xea   :  { %v6984_v10 = vld [vmem:[#allocation2 + $0x138] sm:$0xff]   ;;  %v6988_v14 = vld [vmem:[#allocation2 + $0x200] sm:$0xff]   ;;  %v6990_v16 = vld [vmem:[#allocation2 + $0x248] sm:$0xff]  }
  0xeb   :  { %6017 = vmatpush3.bf16.msra.mxu0 %v6943_v25  ;;  %v6985_v11 = vld [vmem:[#allocation2 + $0x1b8] sm:$0xff]   ;;  %v6989_v15 = vld [vmem:[#allocation2 + $0x280] sm:$0xff]   ;;  %v6991_v17 = vld [vmem:[#allocation2 + $0x2c8] sm:$0xff]  }
  0xec   :  { %6039 = vmatpush3.bf16.msra.mxu1 %v6944_v26  ;;  %6018 = vmatprep.subr.bf16.mxu0 %v6945_v27  ;;  %v6992_v18 = vld [vmem:[#allocation2 + $0x208] sm:$0xff]   ;;  %v6994_v20 = vld [vmem:[#allocation2 + $0x250] sm:$0xff]   ;;  %v6998_v24 = vld [vmem:[#allocation2 + $0x258] sm:$0xff]  }
  0xed   :  { %6040 = vmatprep.subr.bf16.mxu1 %v6946_v28  ;;  %v6993_v19 = vld [vmem:[#allocation2 + $0x288] sm:$0xff]   ;;  %v6995_v21 = vld [vmem:[#allocation2 + $0x2d0] sm:$0xff]   ;;  %v6999_v25 = vld [vmem:[#allocation2 + $0x2d8] sm:$0xff]  }
  0xee   :  { %v6996_v22 = vld [vmem:[#allocation2 + $0x210] sm:$0xff]   ;;  %v7000_v26 = vld [vmem:[#allocation2 + $0x218] sm:$0xff]   ;;  %v7002_v28 = vld [vmem:[#allocation2 + $0x260] sm:$0xff]  }
  0xef   :  { %6019 = vmatpush3.bf16.msra.mxu0 %v6947_v31  ;;  %v6997_v23 = vld [vmem:[#allocation2 + $0x290] sm:$0xff]   ;;  %v7001_v27 = vld [vmem:[#allocation2 + $0x298] sm:$0xff]   ;;  %v7003_v29 = vld [vmem:[#allocation2 + $0x2e0] sm:$0xff]  }
  0xf0   :  { %6041 = vmatpush3.bf16.msra.mxu1 %v6948_v32  ;;  %6020 = vmatprep.subr.bf16.mxu0 %v6949_v33  ;;  %v7004_v30 = vld [vmem:[#allocation2 + $0x220] sm:$0xff]   ;;  %v7006_v32 = vld [vmem:[#allocation2 + $0x268] sm:$0xff]   ;;  %v7012_v38 = vld [vmem:[#allocation2 + $0x230] sm:$0xff]  }
  0xf1   :  { %6042 = vmatprep.subr.bf16.mxu1 %v6950_v34  ;;  %v7005_v31 = vld [vmem:[#allocation2 + $0x2a0] sm:$0xff]   ;;  %v7007_v33 = vld [vmem:[#allocation2 + $0x2e8] sm:$0xff]   ;;  %v7013_v40 = vld [vmem:[#allocation2 + $0x2b0] sm:$0xff]  }
  0xf2   :  { %v7008_v34 = vld [vmem:[#allocation2 + $0x228] sm:$0xff]  }
  0xf3   :  { %6021 = vmatpush3.bf16.msra.mxu0 %v6951_v36  ;;  %v7009_v35 = vld [vmem:[#allocation2 + $0x2a8] sm:$0xff]   ;;  %v7010_v36 = vld [vmem:[#allocation2 + $0x270] sm:$0xff]  }
  0xf4   :  { %6043 = vmatpush3.bf16.msra.mxu1 %v6952_v37  ;;  %6050 = vmatprep.subr.bf16.mxu0 %v6954_v41  ;;  %v7011_v37 = vld [vmem:[#allocation2 + $0x2f0] sm:$0xff]   ;;  %v7014_v41 = vld [vmem:[#allocation2 + $0x278] sm:$0xff]  }
  0xf5   :  { %6072 = vmatprep.subr.bf16.mxu1 %v6955_v42  ;;  %v7015_v42 = vld [vmem:[#allocation2 + $0x2f8] sm:$0xff]  }
  0xf6   :  { %512 = vmatmul.mubr.bf16.vlgmr.msra.gmra.mrb[0].mxu0 %v7825_v39 }
  0xf7   :  { %6051 = vmatpush3.bf16.msra.mxu0 %v6956_v45  ;;  %552 = vmatmul.mubr.bf16.vlgmr.msra.gmra.mrb[0].mxu1 %v7831_v44  ;;  %v7016_v45 = vld [vmem:[#allocation2 + $0x238] sm:$0xff]  }
  0xf8   :  { %6052 = vmatprep.subr.bf16.mxu0 %v6958_v48  ;;  %6073 = vmatpush3.bf16.msra.mxu1 %v6957_v46  ;;  %v7017_v46 = vld [vmem:[#allocation2 + $0x2b8] sm:$0xff]   ;;  %v7018_v48 = vld [vmem:[#allocation2 + $0x340] sm:$0xff]  }
  0xf9   :  { %848 = vmatprep.mubr.bf16.mxu0 %v7829_v43  ;;  %6074 = vmatprep.subr.bf16.mxu1 %v6959_v49  ;;  %v7019_v49 = vld [vmem:[#allocation2 + $0x3c0] sm:$0xff]  }
  0xfa   :  { %888 = vmatprep.mubr.bf16.mxu1 %v7836_v47 }
  0xfb   :  { %6053 = vmatpush3.bf16.msra.mxu0 %v6960_v50  ;;  %v7020_v50 = vld [vmem:[#allocation2 + $0x300] sm:$0xff]  }
  0xfc   :  { %6054 = vmatprep.subr.bf16.mxu0 %v6962_v52  ;;  %6075 = vmatpush3.bf16.msra.mxu1 %v6961_v51  ;;  %v7021_v51 = vld [vmem:[#allocation2 + $0x380] sm:$0xff]   ;;  %v7022_v52 = vld [vmem:[#allocation2 + $0x348] sm:$0xff]  }
  0xfd   :  { %6076 = vmatprep.subr.bf16.mxu1 %v6963_v53  ;;  %v7023_v53 = vld [vmem:[#allocation2 + $0x3c8] sm:$0xff]  }
  0xff   :  { %6055 = vmatpush3.bf16.msra.mxu0 %v6964_v54  ;;  %v7024_v54 = vld [vmem:[#allocation2 + $0x308] sm:$0xff]  }
 0x100   :  { %6056 = vmatprep.subr.bf16.mxu0 %v6966_v56  ;;  %6077 = vmatpush3.bf16.msra.mxu1 %v6965_v55  ;;  %v7025_v55 = vld [vmem:[#allocation2 + $0x388] sm:$0xff]   ;;  %v7026_v56 = vld [vmem:[#allocation2 + $0x350] sm:$0xff]  }
 0x101   :  { %6078 = vmatprep.subr.bf16.mxu1 %v6967_v57  ;;  %v7027_v57 = vld [vmem:[#allocation2 + $0x3d0] sm:$0xff]  }
 0x103   :  { %6057 = vmatpush3.bf16.msra.mxu0 %v6968_v58  ;;  %v7028_v58 = vld [vmem:[#allocation2 + $0x310] sm:$0xff]  }
 0x104   :  { %6058 = vmatprep.subr.bf16.mxu0 %v6970_v60  ;;  %6079 = vmatpush3.bf16.msra.mxu1 %v6969_v59  ;;  %v7029_v59 = vld [vmem:[#allocation2 + $0x390] sm:$0xff]   ;;  %v7030_v60 = vld [vmem:[#allocation2 + $0x358] sm:$0xff]  }
 0x105   :  { %6080 = vmatprep.subr.bf16.mxu1 %v6971_v61  ;;  %v7031_v61 = vld [vmem:[#allocation2 + $0x3d8] sm:$0xff]  }
 0x107   :  { %6059 = vmatpush3.bf16.msra.mxu0 %v6972_v62  ;;  %v7032_v62 = vld [vmem:[#allocation2 + $0x318] sm:$0xff]  }
 0x108   :  { %6060 = vmatprep.subr.bf16.mxu0 %v6974_v0  ;;  %6081 = vmatpush3.bf16.msra.mxu1 %v6973_v63  ;;  %v7033_v63 = vld [vmem:[#allocation2 + $0x398] sm:$0xff]   ;;  %v7034_v0 = vld [vmem:[#allocation2 + $0x360] sm:$0xff]  }
 0x109   :  { %6082 = vmatprep.subr.bf16.mxu1 %v6975_v1  ;;  %v7035_v1 = vld [vmem:[#allocation2 + $0x3e0] sm:$0xff]  }
 0x10b   :  { %6061 = vmatpush3.bf16.msra.mxu0 %v6976_v2  ;;  %v7036_v2 = vld [vmem:[#allocation2 + $0x320] sm:$0xff]  }
 0x10c   :  { %6062 = vmatprep.subr.bf16.mxu0 %v6978_v4  ;;  %6083 = vmatpush3.bf16.msra.mxu1 %v6977_v3  ;;  %v7037_v3 = vld [vmem:[#allocation2 + $0x3a0] sm:$0xff]   ;;  %v7038_v4 = vld [vmem:[#allocation2 + $0x368] sm:$0xff]  }
 0x10d   :  { %6084 = vmatprep.subr.bf16.mxu1 %v6979_v5  ;;  %v7039_v5 = vld [vmem:[#allocation2 + $0x3e8] sm:$0xff]  }
 0x10f   :  { %6063 = vmatpush3.bf16.msra.mxu0 %v6980_v6  ;;  %v7040_v6 = vld [vmem:[#allocation2 + $0x328] sm:$0xff]  }
 0x110   :  { %6064 = vmatprep.subr.bf16.mxu0 %v6982_v8  ;;  %6085 = vmatpush3.bf16.msra.mxu1 %v6981_v7  ;;  %v7041_v7 = vld [vmem:[#allocation2 + $0x3a8] sm:$0xff]   ;;  %v7042_v8 = vld [vmem:[#allocation2 + $0x370] sm:$0xff]  }
 0x111   :  { %6086 = vmatprep.subr.bf16.mxu1 %v6983_v9  ;;  %v7043_v9 = vld [vmem:[#allocation2 + $0x3f0] sm:$0xff]  }
 0x113   :  { %6065 = vmatpush3.bf16.msra.mxu0 %v6984_v10  ;;  %v7044_v10 = vld [vmem:[#allocation2 + $0x330] sm:$0xff]  }
 0x114   :  { %6094 = vmatprep.subr.bf16.mxu0 %v6986_v12  ;;  %6087 = vmatpush3.bf16.msra.mxu1 %v6985_v11  ;;  %v7045_v11 = vld [vmem:[#allocation2 + $0x3b0] sm:$0xff]   ;;  %v7046_v12 = vld [vmem:[#allocation2 + $0x378] sm:$0xff]  }
 0x115   :  { %6116 = vmatprep.subr.bf16.mxu1 %v6987_v13  ;;  %v7047_v13 = vld [vmem:[#allocation2 + $0x3f8] sm:$0xff]  }
 0x116   :  { %849 = vmatmul.mubr.bf16.vlgmr.msra.gmra.mrb[4].mxu0 %v7825_v39 }
 0x117   :  { %6095 = vmatpush3.bf16.msra.mxu0 %v6988_v14  ;;  %1185 = vmatprep.mubr.bf16.mxu0 %v7829_v43  ;;  %v7048_v14 = vld [vmem:[#allocation2 + $0x338] sm:$0xff]  }
 0x118   :  { %889 = vmatmul.mubr.bf16.vlgmr.msra.gmra.mrb[4].mxu1 %v7831_v44  ;;  %6096 = vmatprep.subr.bf16.mxu0 %v6990_v16  ;;  %v7050_v16 = vld [vmem:[#allocation2 + $0x440] sm:$0xff]  }
 0x119   :  { %6117 = vmatpush3.bf16.msra.mxu1 %v6989_v15  ;;  %1225 = vmatprep.mubr.bf16.mxu1 %v7836_v47  ;;  %v7049_v15 = vld [vmem:[#allocation2 + $0x3b8] sm:$0xff]  }
 0x11a   :  { %6118 = vmatprep.subr.bf16.mxu1 %v6991_v17  ;;  %v7051_v17 = vld [vmem:[#allocation2 + $0x4c0] sm:$0xff]  }
 0x11b   :  { %6097 = vmatpush3.bf16.msra.mxu0 %v6992_v18  ;;  %v7052_v18 = vld [vmem:[#allocation2 + $0x400] sm:$0xff]  }
 0x11c   :  { %6098 = vmatprep.subr.bf16.mxu0 %v6994_v20  ;;  %v7054_v20 = vld [vmem:[#allocation2 + $0x448] sm:$0xff]  }
 0x11d   :  { %6119 = vmatpush3.bf16.msra.mxu1 %v6993_v19  ;;  %v7053_v19 = vld [vmem:[#allocation2 + $0x480] sm:$0xff]  }
 0x11e   :  { %6120 = vmatprep.subr.bf16.mxu1 %v6995_v21  ;;  %v7055_v21 = vld [vmem:[#allocation2 + $0x4c8] sm:$0xff]  }
 0x11f   :  { %6099 = vmatpush3.bf16.msra.mxu0 %v6996_v22  ;;  %v7056_v22 = vld [vmem:[#allocation2 + $0x408] sm:$0xff]  }
 0x120   :  { %6100 = vmatprep.subr.bf16.mxu0 %v6998_v24  ;;  %v7058_v24 = vld [vmem:[#allocation2 + $0x450] sm:$0xff]  }
 0x121   :  { %6121 = vmatpush3.bf16.msra.mxu1 %v6997_v23  ;;  %v7057_v23 = vld [vmem:[#allocation2 + $0x488] sm:$0xff]  }
 0x122   :  { %6122 = vmatprep.subr.bf16.mxu1 %v6999_v25  ;;  %v7059_v25 = vld [vmem:[#allocation2 + $0x4d0] sm:$0xff]  }
 0x123   :  { %6101 = vmatpush3.bf16.msra.mxu0 %v7000_v26  ;;  %v7060_v26 = vld [vmem:[#allocation2 + $0x410] sm:$0xff]  }
 0x124   :  { %6102 = vmatprep.subr.bf16.mxu0 %v7002_v28  ;;  %v7062_v28 = vld [vmem:[#allocation2 + $0x458] sm:$0xff]  }
 0x125   :  { %6123 = vmatpush3.bf16.msra.mxu1 %v7001_v27  ;;  %v7061_v27 = vld [vmem:[#allocation2 + $0x490] sm:$0xff]  }
 0x126   :  { %6124 = vmatprep.subr.bf16.mxu1 %v7003_v29  ;;  %v7063_v29 = vld [vmem:[#allocation2 + $0x4d8] sm:$0xff]  }
 0x127   :  { %6103 = vmatpush3.bf16.msra.mxu0 %v7004_v30  ;;  %v7064_v30 = vld [vmem:[#allocation2 + $0x418] sm:$0xff]  }
 0x128   :  { %6104 = vmatprep.subr.bf16.mxu0 %v7006_v32  ;;  %v7066_v32 = vld [vmem:[#allocation2 + $0x460] sm:$0xff]  }
 0x129   :  { %6125 = vmatpush3.bf16.msra.mxu1 %v7005_v31  ;;  %v7065_v31 = vld [vmem:[#allocation2 + $0x498] sm:$0xff]  }
 0x12a   :  { %6126 = vmatprep.subr.bf16.mxu1 %v7007_v33  ;;  %v7067_v33 = vld [vmem:[#allocation2 + $0x4e0] sm:$0xff]  }
 0x12b   :  { %6105 = vmatpush3.bf16.msra.mxu0 %v7008_v34  ;;  %v7068_v34 = vld [vmem:[#allocation2 + $0x420] sm:$0xff]  }
 0x12c   :  { %6106 = vmatprep.subr.bf16.mxu0 %v7010_v36  ;;  %v7070_v36 = vld [vmem:[#allocation2 + $0x468] sm:$0xff]  }
 0x12d   :  { %6127 = vmatpush3.bf16.msra.mxu1 %v7009_v35  ;;  %v7069_v35 = vld [vmem:[#allocation2 + $0x4a0] sm:$0xff]  }
 0x12e   :  { %6128 = vmatprep.subr.bf16.mxu1 %v7011_v37  ;;  %v7071_v37 = vld [vmem:[#allocation2 + $0x4e8] sm:$0xff]  }
 0x12f   :  { %6107 = vmatpush3.bf16.msra.mxu0 %v7012_v38  ;;  %v7072_v38 = vld [vmem:[#allocation2 + $0x428] sm:$0xff]  }
 0x130   :  { %6108 = vmatprep.subr.bf16.mxu0 %v7014_v41  ;;  %v7074_v41 = vld [vmem:[#allocation2 + $0x470] sm:$0xff]  }
 0x131   :  { %6129 = vmatpush3.bf16.msra.mxu1 %v7013_v40  ;;  %v7073_v40 = vld [vmem:[#allocation2 + $0x4a8] sm:$0xff]  }
 0x132   :  { %6130 = vmatprep.subr.bf16.mxu1 %v7015_v42  ;;  %v7075_v42 = vld [vmem:[#allocation2 + $0x4f0] sm:$0xff]  }
 0x133   :  { %6109 = vmatpush3.bf16.msra.mxu0 %v7016_v45  ;;  %v7076_v45 = vld [vmem:[#allocation2 + $0x430] sm:$0xff]  }
 0x134   :  { %6138 = vmatprep.subr.bf16.mxu0 %v7018_v48  ;;  %v7078_v48 = vld [vmem:[#allocation2 + $0x478] sm:$0xff]  }
 0x135   :  { %6131 = vmatpush3.bf16.msra.mxu1 %v7017_v46  ;;  %v7077_v46 = vld [vmem:[#allocation2 + $0x4b0] sm:$0xff]  }
 0x136   :  { %1186 = vmatmul.mubr.bf16.vlgmr.msra.gmra.mrb[8].mxu0 %v7825_v39  ;;  %6160 = vmatprep.subr.bf16.mxu1 %v7019_v49  ;;  %v7079_v49 = vld [vmem:[#allocation2 + $0x4f8] sm:$0xff]  }
 0x137   :  { %6139 = vmatpush3.bf16.msra.mxu0 %v7020_v50  ;;  %1522 = vmatprep.mubr.bf16.mxu0 %v7829_v43  ;;  %v7080_v50 = vld [vmem:[#allocation2 + $0x438] sm:$0xff]  }
 0x138   :  { %1226 = vmatmul.mubr.bf16.vlgmr.msra.gmra.mrb[8].mxu1 %v7831_v44  ;;  %6140 = vmatprep.subr.bf16.mxu0 %v7022_v52  ;;  %v7082_v52 = vld [vmem:[#allocation2 + $0x540] sm:$0xff]  }
 0x139   :  { %6161 = vmatpush3.bf16.msra.mxu1 %v7021_v51  ;;  %1562 = vmatprep.mubr.bf16.mxu1 %v7836_v47  ;;  %v7081_v51 = vld [vmem:[#allocation2 + $0x4b8] sm:$0xff]  }
 0x13a   :  { %6162 = vmatprep.subr.bf16.mxu1 %v7023_v53  ;;  %v7083_v53 = vld [vmem:[#allocation2 + $0x5c0] sm:$0xff]  }
 0x13b   :  { %6141 = vmatpush3.bf16.msra.mxu0 %v7024_v54  ;;  %v7084_v54 = vld [vmem:[#allocation2 + $0x500] sm:$0xff]  }
 0x13c   :  { %6142 = vmatprep.subr.bf16.mxu0 %v7026_v56  ;;  %v7086_v56 = vld [vmem:[#allocation2 + $0x548] sm:$0xff]  }
 0x13d   :  { %6163 = vmatpush3.bf16.msra.mxu1 %v7025_v55  ;;  %v7085_v55 = vld [vmem:[#allocation2 + $0x580] sm:$0xff]  }
 0x13e   :  { %6164 = vmatprep.subr.bf16.mxu1 %v7027_v57  ;;  %v7087_v57 = vld [vmem:[#allocation2 + $0x5c8] sm:$0xff]  }
 0x13f   :  { %6143 = vmatpush3.bf16.msra.mxu0 %v7028_v58  ;;  %v7088_v58 = vld [vmem:[#allocation2 + $0x508] sm:$0xff]  }
 0x140   :  { %6144 = vmatprep.subr.bf16.mxu0 %v7030_v60  ;;  %v7090_v60 = vld [vmem:[#allocation2 + $0x550] sm:$0xff]  }
 0x141   :  { %6165 = vmatpush3.bf16.msra.mxu1 %v7029_v59  ;;  %v7089_v59 = vld [vmem:[#allocation2 + $0x588] sm:$0xff]  }
 0x142   :  { %6166 = vmatprep.subr.bf16.mxu1 %v7031_v61  ;;  %v7091_v61 = vld [vmem:[#allocation2 + $0x5d0] sm:$0xff]  }
 0x143   :  { %6145 = vmatpush3.bf16.msra.mxu0 %v7032_v62  ;;  %v7092_v62 = vld [vmem:[#allocation2 + $0x510] sm:$0xff]  }
 0x144   :  { %6146 = vmatprep.subr.bf16.mxu0 %v7034_v0  ;;  %v7094_v0 = vld [vmem:[#allocation2 + $0x558] sm:$0xff]  }
 0x145   :  { %6167 = vmatpush3.bf16.msra.mxu1 %v7033_v63  ;;  %v7093_v63 = vld [vmem:[#allocation2 + $0x590] sm:$0xff]  }
 0x146   :  { %6168 = vmatprep.subr.bf16.mxu1 %v7035_v1  ;;  %v7095_v1 = vld [vmem:[#allocation2 + $0x5d8] sm:$0xff]  }
 0x147   :  { %6147 = vmatpush3.bf16.msra.mxu0 %v7036_v2  ;;  %v7096_v2 = vld [vmem:[#allocation2 + $0x518] sm:$0xff]  }
 0x148   :  { %6148 = vmatprep.subr.bf16.mxu0 %v7038_v4  ;;  %v7098_v4 = vld [vmem:[#allocation2 + $0x560] sm:$0xff]  }
 0x149   :  { %6169 = vmatpush3.bf16.msra.mxu1 %v7037_v3  ;;  %v7097_v3 = vld [vmem:[#allocation2 + $0x598] sm:$0xff]  }
 0x14a   :  { %6170 = vmatprep.subr.bf16.mxu1 %v7039_v5  ;;  %v7099_v5 = vld [vmem:[#allocation2 + $0x5e0] sm:$0xff]  }
 0x14b   :  { %6149 = vmatpush3.bf16.msra.mxu0 %v7040_v6  ;;  %v7100_v6 = vld [vmem:[#allocation2 + $0x520] sm:$0xff]  }
 0x14c   :  { %6150 = vmatprep.subr.bf16.mxu0 %v7042_v8  ;;  %v7102_v8 = vld [vmem:[#allocation2 + $0x568] sm:$0xff]  }
 0x14d   :  { %6171 = vmatpush3.bf16.msra.mxu1 %v7041_v7  ;;  %v7101_v7 = vld [vmem:[#allocation2 + $0x5a0] sm:$0xff]  }
 0x14e   :  { %6172 = vmatprep.subr.bf16.mxu1 %v7043_v9  ;;  %v7103_v9 = vld [vmem:[#allocation2 + $0x5e8] sm:$0xff]  }
 0x14f   :  { %6151 = vmatpush3.bf16.msra.mxu0 %v7044_v10  ;;  %v7104_v10 = vld [vmem:[#allocation2 + $0x528] sm:$0xff]  }
 0x150   :  { %6152 = vmatprep.subr.bf16.mxu0 %v7046_v12  ;;  %v7106_v12 = vld [vmem:[#allocation2 + $0x570] sm:$0xff]  }
 0x151   :  { %6173 = vmatpush3.bf16.msra.mxu1 %v7045_v11  ;;  %v7105_v11 = vld [vmem:[#allocation2 + $0x5a8] sm:$0xff]  }
 0x152   :  { %6174 = vmatprep.subr.bf16.mxu1 %v7047_v13  ;;  %v7107_v13 = vld [vmem:[#allocation2 + $0x5f0] sm:$0xff]  }
 0x153   :  { %6153 = vmatpush3.bf16.msra.mxu0 %v7048_v14  ;;  %v7108_v14 = vld [vmem:[#allocation2 + $0x530] sm:$0xff]  }
 0x154   :  { %6182 = vmatprep.subr.bf16.mxu0 %v7050_v16  ;;  %v7110_v16 = vld [vmem:[#allocation2 + $0x578] sm:$0xff]  }
 0x155   :  { %6175 = vmatpush3.bf16.msra.mxu1 %v7049_v15  ;;  %v7109_v15 = vld [vmem:[#allocation2 + $0x5b0] sm:$0xff]  }
 0x156   :  { %1523 = vmatmul.mubr.bf16.vlgmr.msra.gmra.mrb[12].mxu0 %v7825_v39  ;;  %6204 = vmatprep.subr.bf16.mxu1 %v7051_v17  ;;  %v7111_v17 = vld [vmem:[#allocation2 + $0x5f8] sm:$0xff]  }
 0x157   :  { %6183 = vmatpush3.bf16.msra.mxu0 %v7052_v18  ;;  %1859 = vmatprep.mubr.bf16.mxu0 %v7829_v43  ;;  %v7112_v18 = vld [vmem:[#allocation2 + $0x538] sm:$0xff]  }
 0x158   :  { %1563 = vmatmul.mubr.bf16.vlgmr.msra.gmra.mrb[12].mxu1 %v7831_v44  ;;  %6184 = vmatprep.subr.bf16.mxu0 %v7054_v20  ;;  %v7114_v20 = vld [vmem:[#allocation2 + $0x640] sm:$0xff]  }
 0x159   :  { %6205 = vmatpush3.bf16.msra.mxu1 %v7053_v19  ;;  %1899 = vmatprep.mubr.bf16.mxu1 %v7836_v47  ;;  %v7113_v19 = vld [vmem:[#allocation2 + $0x5b8] sm:$0xff]  }
 0x15a   :  { %6206 = vmatprep.subr.bf16.mxu1 %v7055_v21  ;;  %v7115_v21 = vld [vmem:[#allocation2 + $0x6c0] sm:$0xff]  }
 0x15b   :  { %6185 = vmatpush3.bf16.msra.mxu0 %v7056_v22  ;;  %v7116_v22 = vld [vmem:[#allocation2 + $0x600] sm:$0xff]  }
 0x15c   :  { %6186 = vmatprep.subr.bf16.mxu0 %v7058_v24  ;;  %v7118_v24 = vld [vmem:[#allocation2 + $0x648] sm:$0xff]  }
 0x15d   :  { %6207 = vmatpush3.bf16.msra.mxu1 %v7057_v23  ;;  %v7117_v23 = vld [vmem:[#allocation2 + $0x680] sm:$0xff]  }
 0x15e   :  { %6208 = vmatprep.subr.bf16.mxu1 %v7059_v25  ;;  %v7119_v25 = vld [vmem:[#allocation2 + $0x6c8] sm:$0xff]  }
 0x15f   :  { %6187 = vmatpush3.bf16.msra.mxu0 %v7060_v26  ;;  %v7120_v26 = vld [vmem:[#allocation2 + $0x608] sm:$0xff]  }
 0x160   :  { %6188 = vmatprep.subr.bf16.mxu0 %v7062_v28  ;;  %v7122_v28 = vld [vmem:[#allocation2 + $0x650] sm:$0xff]  }
 0x161   :  { %6209 = vmatpush3.bf16.msra.mxu1 %v7061_v27  ;;  %v7121_v27 = vld [vmem:[#allocation2 + $0x688] sm:$0xff]  }
 0x162   :  { %6210 = vmatprep.subr.bf16.mxu1 %v7063_v29  ;;  %v7123_v29 = vld [vmem:[#allocation2 + $0x6d0] sm:$0xff]  }
 0x163   :  { %6189 = vmatpush3.bf16.msra.mxu0 %v7064_v30  ;;  %v7124_v30 = vld [vmem:[#allocation2 + $0x610] sm:$0xff]  }
 0x164   :  { %6190 = vmatprep.subr.bf16.mxu0 %v7066_v32  ;;  %v7126_v32 = vld [vmem:[#allocation2 + $0x658] sm:$0xff]  }
 0x165   :  { %6211 = vmatpush3.bf16.msra.mxu1 %v7065_v31  ;;  %v7125_v31 = vld [vmem:[#allocation2 + $0x690] sm:$0xff]  }
 0x166   :  { %6212 = vmatprep.subr.bf16.mxu1 %v7067_v33  ;;  %v7127_v33 = vld [vmem:[#allocation2 + $0x6d8] sm:$0xff]  }
 0x167   :  { %6191 = vmatpush3.bf16.msra.mxu0 %v7068_v34  ;;  %v7128_v34 = vld [vmem:[#allocation2 + $0x618] sm:$0xff]  }
 0x168   :  { %6192 = vmatprep.subr.bf16.mxu0 %v7070_v36  ;;  %v7130_v36 = vld [vmem:[#allocation2 + $0x660] sm:$0xff]  }
 0x169   :  { %6213 = vmatpush3.bf16.msra.mxu1 %v7069_v35  ;;  %v7129_v35 = vld [vmem:[#allocation2 + $0x698] sm:$0xff]  }
 0x16a   :  { %6214 = vmatprep.subr.bf16.mxu1 %v7071_v37  ;;  %v7131_v37 = vld [vmem:[#allocation2 + $0x6e0] sm:$0xff]  }
 0x16b   :  { %6193 = vmatpush3.bf16.msra.mxu0 %v7072_v38  ;;  %v7132_v38 = vld [vmem:[#allocation2 + $0x620] sm:$0xff]  }
 0x16c   :  { %6194 = vmatprep.subr.bf16.mxu0 %v7074_v41  ;;  %v7134_v41 = vld [vmem:[#allocation2 + $0x668] sm:$0xff]  }
 0x16d   :  { %6215 = vmatpush3.bf16.msra.mxu1 %v7073_v40  ;;  %v7133_v40 = vld [vmem:[#allocation2 + $0x6a0] sm:$0xff]  }
 0x16e   :  { %6216 = vmatprep.subr.bf16.mxu1 %v7075_v42  ;;  %v7135_v42 = vld [vmem:[#allocation2 + $0x6e8] sm:$0xff]  }
 0x16f   :  { %6195 = vmatpush3.bf16.msra.mxu0 %v7076_v45  ;;  %v7136_v45 = vld [vmem:[#allocation2 + $0x628] sm:$0xff]  }
 0x170   :  { %6196 = vmatprep.subr.bf16.mxu0 %v7078_v48  ;;  %v7138_v48 = vld [vmem:[#allocation2 + $0x670] sm:$0xff]  }
 0x171   :  { %6217 = vmatpush3.bf16.msra.mxu1 %v7077_v46  ;;  %v7137_v46 = vld [vmem:[#allocation2 + $0x6a8] sm:$0xff]  }
 0x172   :  { %6218 = vmatprep.subr.bf16.mxu1 %v7079_v49  ;;  %v7139_v49 = vld [vmem:[#allocation2 + $0x6f0] sm:$0xff]  }
 0x173   :  { %6197 = vmatpush3.bf16.msra.mxu0 %v7080_v50  ;;  %v7140_v50 = vld [vmem:[#allocation2 + $0x630] sm:$0xff]  }
 0x174   :  { %6226 = vmatprep.subr.bf16.mxu0 %v7082_v52  ;;  %v7142_v52 = vld [vmem:[#allocation2 + $0x678] sm:$0xff]  }
 0x175   :  { %6219 = vmatpush3.bf16.msra.mxu1 %v7081_v51  ;;  %v7141_v51 = vld [vmem:[#allocation2 + $0x6b0] sm:$0xff]  }
 0x176   :  { %1860 = vmatmul.mubr.bf16.vlgmr.msra.gmra.mrb[16].mxu0 %v7825_v39  ;;  %6248 = vmatprep.subr.bf16.mxu1 %v7083_v53  ;;  %v7143_v53 = vld [vmem:[#allocation2 + $0x6f8] sm:$0xff]  }
 0x177   :  { %6227 = vmatpush3.bf16.msra.mxu0 %v7084_v54  ;;  %2196 = vmatprep.mubr.bf16.mxu0 %v7829_v43  ;;  %v7144_v54 = vld [vmem:[#allocation2 + $0x638] sm:$0xff]  }
 0x178   :  { %1900 = vmatmul.mubr.bf16.vlgmr.msra.gmra.mrb[16].mxu1 %v7831_v44  ;;  %6228 = vmatprep.subr.bf16.mxu0 %v7086_v56  ;;  %v7146_v56 = vld [vmem:[#allocation2 + $0x740] sm:$0xff]  }
 0x179   :  { %6249 = vmatpush3.bf16.msra.mxu1 %v7085_v55  ;;  %2236 = vmatprep.mubr.bf16.mxu1 %v7836_v47  ;;  %v7145_v55 = vld [vmem:[#allocation2 + $0x6b8] sm:$0xff]  }
 0x17a   :  { %6250 = vmatprep.subr.bf16.mxu1 %v7087_v57  ;;  %v7147_v57 = vld [vmem:[#allocation2 + $0x7c0] sm:$0xff]  }
 0x17b   :  { %6229 = vmatpush3.bf16.msra.mxu0 %v7088_v58  ;;  %v7148_v58 = vld [vmem:[#allocation2 + $0x700] sm:$0xff]  }
 0x17c   :  { %6230 = vmatprep.subr.bf16.mxu0 %v7090_v60  ;;  %v7150_v60 = vld [vmem:[#allocation2 + $0x748] sm:$0xff]  }
 0x17d   :  { %6251 = vmatpush3.bf16.msra.mxu1 %v7089_v59  ;;  %v7149_v59 = vld [vmem:[#allocation2 + $0x780] sm:$0xff]  }
 0x17e   :  { %6252 = vmatprep.subr.bf16.mxu1 %v7091_v61  ;;  %v7151_v61 = vld [vmem:[#allocation2 + $0x7c8] sm:$0xff]  }
 0x17f   :  { %6231 = vmatpush3.bf16.msra.mxu0 %v7092_v62  ;;  %v7152_v62 = vld [vmem:[#allocation2 + $0x708] sm:$0xff]  }
 0x180   :  { %6232 = vmatprep.subr.bf16.mxu0 %v7094_v0  ;;  %v7154_v0 = vld [vmem:[#allocation2 + $0x750] sm:$0xff]  }
 0x181   :  { %6253 = vmatpush3.bf16.msra.mxu1 %v7093_v63  ;;  %v7153_v63 = vld [vmem:[#allocation2 + $0x788] sm:$0xff]  }
 0x182   :  { %6254 = vmatprep.subr.bf16.mxu1 %v7095_v1  ;;  %v7155_v1 = vld [vmem:[#allocation2 + $0x7d0] sm:$0xff]  }
 0x183   :  { %6233 = vmatpush3.bf16.msra.mxu0 %v7096_v2  ;;  %v7156_v2 = vld [vmem:[#allocation2 + $0x710] sm:$0xff]  }
 0x184   :  { %6234 = vmatprep.subr.bf16.mxu0 %v7098_v4  ;;  %v7158_v4 = vld [vmem:[#allocation2 + $0x758] sm:$0xff]  }
 0x185   :  { %6255 = vmatpush3.bf16.msra.mxu1 %v7097_v3  ;;  %v7157_v3 = vld [vmem:[#allocation2 + $0x790] sm:$0xff]  }
 0x186   :  { %6256 = vmatprep.subr.bf16.mxu1 %v7099_v5  ;;  %v7159_v5 = vld [vmem:[#allocation2 + $0x7d8] sm:$0xff]  }
 0x187   :  { %6235 = vmatpush3.bf16.msra.mxu0 %v7100_v6  ;;  %v7160_v6 = vld [vmem:[#allocation2 + $0x718] sm:$0xff]  }
 0x188   :  { %6236 = vmatprep.subr.bf16.mxu0 %v7102_v8  ;;  %v7162_v8 = vld [vmem:[#allocation2 + $0x760] sm:$0xff]  }
 0x189   :  { %6257 = vmatpush3.bf16.msra.mxu1 %v7101_v7  ;;  %v7161_v7 = vld [vmem:[#allocation2 + $0x798] sm:$0xff]  }
 0x18a   :  { %6258 = vmatprep.subr.bf16.mxu1 %v7103_v9  ;;  %v7163_v9 = vld [vmem:[#allocation2 + $0x7e0] sm:$0xff]  }
 0x18b   :  { %6237 = vmatpush3.bf16.msra.mxu0 %v7104_v10  ;;  %v7164_v10 = vld [vmem:[#allocation2 + $0x720] sm:$0xff]  }
 0x18c   :  { %6238 = vmatprep.subr.bf16.mxu0 %v7106_v12  ;;  %v7166_v12 = vld [vmem:[#allocation2 + $0x768] sm:$0xff]  }
 0x18d   :  { %6259 = vmatpush3.bf16.msra.mxu1 %v7105_v11  ;;  %v7165_v11 = vld [vmem:[#allocation2 + $0x7a0] sm:$0xff]  }
 0x18e   :  { %6260 = vmatprep.subr.bf16.mxu1 %v7107_v13  ;;  %v7167_v13 = vld [vmem:[#allocation2 + $0x7e8] sm:$0xff]  }
 0x18f   :  { %6239 = vmatpush3.bf16.msra.mxu0 %v7108_v14  ;;  %v7168_v14 = vld [vmem:[#allocation2 + $0x728] sm:$0xff]  }
 0x190   :  { %6240 = vmatprep.subr.bf16.mxu0 %v7110_v16 }
 0x191   :  { %6261 = vmatpush3.bf16.msra.mxu1 %v7109_v15  ;;  %v7169_v15 = vld [vmem:[#allocation2 + $0x7a8] sm:$0xff]  }
 0x192   :  { %6262 = vmatprep.subr.bf16.mxu1 %v7111_v17  ;;  %v7170_v17 = vld [vmem:[#allocation2 + $0x770] sm:$0xff]  }
 0x193   :  { %6241 = vmatpush3.bf16.msra.mxu0 %v7112_v18 }
 0x194   :  { %6270 = vmatprep.subr.bf16.mxu0 %v7114_v20 }
 0x195   :  { %6263 = vmatpush3.bf16.msra.mxu1 %v7113_v19  ;;  %v7171_v19 = vld [vmem:[#allocation2 + $0x7f0] sm:$0xff]  }
 0x196   :  { %2197 = vmatmul.mubr.bf16.vlgmr.msra.gmra.mrb[20].mxu0 %v7825_v39  ;;  %6292 = vmatprep.subr.bf16.mxu1 %v7115_v21 }
 0x197   :  { %6271 = vmatpush3.bf16.msra.mxu0 %v7116_v22  ;;  %2533 = vmatprep.mubr.bf16.mxu0 %v7829_v43 }
 0x198   :  { %2237 = vmatmul.mubr.bf16.vlgmr.msra.gmra.mrb[20].mxu1 %v7831_v44  ;;  %6272 = vmatprep.subr.bf16.mxu0 %v7118_v24  ;;  %v7173_v24 = vld [vmem:[#allocation2 + $0x7b0] sm:$0xff]  }
 0x199   :  { %6293 = vmatpush3.bf16.msra.mxu1 %v7117_v23  ;;  %2573 = vmatprep.mubr.bf16.mxu1 %v7836_v47  ;;  %v7172_v23 = vld [vmem:[#allocation2 + $0x730] sm:$0xff]  }
 0x19a   :  { %6294 = vmatprep.subr.bf16.mxu1 %v7119_v25 }
 0x19b   :  { %6273 = vmatpush3.bf16.msra.mxu0 %v7120_v26 }
 0x19c   :  { %6274 = vmatprep.subr.bf16.mxu0 %v7122_v28 }
 0x19d   :  { %6295 = vmatpush3.bf16.msra.mxu1 %v7121_v27 }
 0x19e   :  { %6296 = vmatprep.subr.bf16.mxu1 %v7123_v29  ;;  %v7174_v29 = vld [vmem:[#allocation2 + $0x778] sm:$0xff]  }
 0x19f   :  { %6275 = vmatpush3.bf16.msra.mxu0 %v7124_v30 }
 0x1a0   :  { %6276 = vmatprep.subr.bf16.mxu0 %v7126_v32 }
 0x1a1   :  { %6297 = vmatpush3.bf16.msra.mxu1 %v7125_v31  ;;  %v7175_v31 = vld [vmem:[#allocation2 + $0x7f8] sm:$0xff]  }
 0x1a2   :  { %6298 = vmatprep.subr.bf16.mxu1 %v7127_v33  ;;  %v7176_v33 = vld [vmem:[#allocation2 + $0x738] sm:$0xff]  }
 0x1a3   :  { %6277 = vmatpush3.bf16.msra.mxu0 %v7128_v34  ;;  %v7177_v34 = vld [vmem:[#allocation2 + $0x7b8] sm:$0xff]  }
 0x1a4   :  { %6278 = vmatprep.subr.bf16.mxu0 %v7130_v36  ;;  %v7179_v36 = vld [vmem:[#allocation2 + $0x8c0] sm:$0xff]  }
 0x1a5   :  { %6299 = vmatpush3.bf16.msra.mxu1 %v7129_v35  ;;  %v7178_v35 = vld [vmem:[#allocation2 + $0x840] sm:$0xff]  }
 0x1a6   :  { %6300 = vmatprep.subr.bf16.mxu1 %v7131_v37  ;;  %v7180_v37 = vld [vmem:[#allocation2 + $0x800] sm:$0xff]  }
 0x1a7   :  { %6279 = vmatpush3.bf16.msra.mxu0 %v7132_v38  ;;  %v7181_v38 = vld [vmem:[#allocation2 + $0x880] sm:$0xff]  }
 0x1a8   :  { %6280 = vmatprep.subr.bf16.mxu0 %v7134_v41  ;;  %v7183_v41 = vld [vmem:[#allocation2 + $0x8c8] sm:$0xff]  }
 0x1a9   :  { %6301 = vmatpush3.bf16.msra.mxu1 %v7133_v40  ;;  %v7182_v40 = vld [vmem:[#allocation2 + $0x848] sm:$0xff]  }
 0x1aa   :  { %6302 = vmatprep.subr.bf16.mxu1 %v7135_v42  ;;  %v7184_v42 = vld [vmem:[#allocation2 + $0x808] sm:$0xff]  }
 0x1ab   :  { %6281 = vmatpush3.bf16.msra.mxu0 %v7136_v45  ;;  %v7185_v45 = vld [vmem:[#allocation2 + $0x888] sm:$0xff]  }
 0x1ac   :  { %6282 = vmatprep.subr.bf16.mxu0 %v7138_v48  ;;  %v7187_v48 = vld [vmem:[#allocation2 + $0x8d0] sm:$0xff]  }
 0x1ad   :  { %6303 = vmatpush3.bf16.msra.mxu1 %v7137_v46  ;;  %v7186_v46 = vld [vmem:[#allocation2 + $0x850] sm:$0xff]  }
 0x1ae   :  { %6304 = vmatprep.subr.bf16.mxu1 %v7139_v49  ;;  %v7188_v49 = vld [vmem:[#allocation2 + $0x810] sm:$0xff]  }
 0x1af   :  { %6283 = vmatpush3.bf16.msra.mxu0 %v7140_v50  ;;  %v7189_v50 = vld [vmem:[#allocation2 + $0x890] sm:$0xff]  }
 0x1b0   :  { %6284 = vmatprep.subr.bf16.mxu0 %v7142_v52  ;;  %v7191_v52 = vld [vmem:[#allocation2 + $0x8d8] sm:$0xff]  }
 0x1b1   :  { %6305 = vmatpush3.bf16.msra.mxu1 %v7141_v51  ;;  %v7190_v51 = vld [vmem:[#allocation2 + $0x858] sm:$0xff]  }
 0x1b2   :  { %6306 = vmatprep.subr.bf16.mxu1 %v7143_v53  ;;  %v7193_v53 = vld [vmem:[#allocation2 + $0x898] sm:$0xff]  }
 0x1b3   :  { %6285 = vmatpush3.bf16.msra.mxu0 %v7144_v54  ;;  %v7194_v54 = vld [vmem:[#allocation2 + $0x860] sm:$0xff]  }
 0x1b4   :  { %6314 = vmatprep.subr.bf16.mxu0 %v7146_v56  ;;  %v7197_v56 = vld [vmem:[#allocation2 + $0x8a0] sm:$0xff]  }
 0x1b5   :  { %6307 = vmatpush3.bf16.msra.mxu1 %v7145_v55  ;;  %v7195_v55 = vld [vmem:[#allocation2 + $0x8e0] sm:$0xff]  }
 0x1b6   :  { %2534 = vmatmul.mubr.bf16.vlgmr.msra.gmra.mrb[24].mxu0 %v7825_v39  ;;  %6336 = vmatprep.subr.bf16.mxu1 %v7147_v57  ;;  %v7198_v57 = vld [vmem:[#allocation2 + $0x868] sm:$0xff]  }
 0x1b7   :  { %6315 = vmatpush3.bf16.msra.mxu0 %v7148_v58  ;;  %2870 = vmatprep.mubr.bf16.mxu0 %v7829_v43  ;;  %v7199_v58 = vld [vmem:[#allocation2 + $0x8e8] sm:$0xff]  }
 0x1b8   :  { %2574 = vmatmul.mubr.bf16.vlgmr.msra.gmra.mrb[24].mxu1 %v7831_v44  ;;  %6316 = vmatprep.subr.bf16.mxu0 %v7150_v60  ;;  %v7201_v60 = vld [vmem:[#allocation2 + $0x8a8] sm:$0xff]  }
 0x1b9   :  { %6337 = vmatpush3.bf16.msra.mxu1 %v7149_v59  ;;  %2910 = vmatprep.mubr.bf16.mxu1 %v7836_v47  ;;  %v7200_v59 = vld [vmem:[#allocation2 + $0x828] sm:$0xff]  }
 0x1ba   :  { %6338 = vmatprep.subr.bf16.mxu1 %v7151_v61 }
 0x1bb   :  { %6317 = vmatpush3.bf16.msra.mxu0 %v7152_v62  ;;  %v7202_v62 = vld [vmem:[#allocation2 + $0x870] sm:$0xff]  }
 0x1bc   :  { %6318 = vmatprep.subr.bf16.mxu0 %v7154_v0  ;;  %v7203_v0 = vld [vmem:[#allocation2 + $0x8f0] sm:$0xff]  }
 0x1bd   :  { %6339 = vmatpush3.bf16.msra.mxu1 %v7153_v63 }
 0x1be   :  { %6340 = vmatprep.subr.bf16.mxu1 %v7155_v1 }
 0x1bf   :  { %6319 = vmatpush3.bf16.msra.mxu0 %v7156_v2 }
 0x1c0   :  { %6320 = vmatprep.subr.bf16.mxu0 %v7158_v4  ;;  %v7204_v4 = vld [vmem:[#allocation2 + $0x830] sm:$0xff]  }
 0x1c1   :  { %6341 = vmatpush3.bf16.msra.mxu1 %v7157_v3 }
 0x1c2   :  { %6342 = vmatprep.subr.bf16.mxu1 %v7159_v5  ;;  %v7205_v5 = vld [vmem:[#allocation2 + $0x8b0] sm:$0xff]  }
 0x1c3   :  { %6321 = vmatpush3.bf16.msra.mxu0 %v7160_v6 }
 0x1c4   :  { %6322 = vmatprep.subr.bf16.mxu0 %v7162_v8 }
 0x1c5   :  { %6343 = vmatpush3.bf16.msra.mxu1 %v7161_v7 }
 0x1c6   :  { %6344 = vmatprep.subr.bf16.mxu1 %v7163_v9 }
 0x1c7   :  { %6323 = vmatpush3.bf16.msra.mxu0 %v7164_v10  ;;  %v7206_v10 = vld [vmem:[#allocation2 + $0x878] sm:$0xff]  }
 0x1c8   :  { %6324 = vmatprep.subr.bf16.mxu0 %v7166_v12  ;;  %v7207_v12 = vld [vmem:[#allocation2 + $0x8f8] sm:$0xff]  }
 0x1c9   :  { %6345 = vmatpush3.bf16.msra.mxu1 %v7165_v11  ;;  %v6022_v16 = vpop.f32.mrb[0].mxu0 }
 0x1ca   :  { %v6023_v18 = vpop.f32.mrb[1].mxu0  ;;  %6346 = vmatprep.subr.bf16.mxu1 %v7167_v13  ;;  %v6044_v20 = vpop.f32.mrb[0].mxu1 }
 0x1cb   :  { %v6024_v21 = vadd.f32 %v6023_v18, %v6022_v16  ;;  %v6025_v22 = vpop.f32.mrb[2].mxu0  ;;  %6325 = vmatpush3.bf16.msra.mxu0 %v7168_v14  ;;  %v6045_v25 = vpop.f32.mrb[1].mxu1  ;;  %v7208_v14 = vld [vmem:[#allocation2 + $0x838] sm:$0xff]   ;;  %v7557_v18 = vmov 0.0  }
 0x1cc   :  { %v6026_v26 = vpop.f32.mrb[3].mxu0  ;;  %6326 = vmatprep.subr.bf16.mxu0 %v7170_v17  ;;  %v6046_v27 = vadd.f32 %v6045_v25, %v6044_v20  ;;  %v6047_v28 = vpop.f32.mrb[2].mxu1  ;;  %v7209_v16 = vld [vmem:[#allocation2 + $0x8b8] sm:$0xff]  }
 0x1cd   :  { %6347 = vmatpush3.bf16.msra.mxu1 %v7169_v15  ;;  %v6048_v30 = vpop.f32.mrb[3].mxu1 }
 0x1ce   :  { %6348 = vmatprep.subr.bf16.mxu1 %v7171_v19  ;;  %v7867_v32 = vadd.f32 %v6046_v27, %v6024_v21 }
 0x1cf   :  { %6327 = vmatpush3.bf16.msra.mxu0 %v7172_v23 }
 0x1d0   :  { %6328 = vmatprep.subr.bf16.mxu0 %v7174_v29 }
 0x1d1   :  { %6349 = vmatpush3.bf16.msra.mxu1 %v7173_v24 }
 0x1d2   :  { %6350 = vmatprep.subr.bf16.mxu1 %v7175_v31 }
 0x1d3   :  { %6329 = vmatpush3.bf16.msra.mxu0 %v7176_v33 }
 0x1d4   :  { %6358 = vmatprep.subr.bf16.mxu0 %v7178_v35 }
 0x1d5   :  { %6351 = vmatpush3.bf16.msra.mxu1 %v7177_v34 }
 0x1d6   :  { %2871 = vmatmul.mubr.bf16.vlgmr.msra.gmra.mrb[28].mxu0 %v7825_v39  ;;  %6380 = vmatprep.subr.bf16.mxu1 %v7179_v36 }
 0x1d7   :  { %6359 = vmatpush3.bf16.msra.mxu0 %v7180_v37  ;;  %3207 = vmatprep.mubr.bf16.mxu0 %v7829_v43  ;;  %v7192_v43 = vld [vmem:[#allocation2 + $0x818] sm:$0xff]  }
 0x1d8   :  { %2911 = vmatmul.mubr.bf16.vlgmr.msra.gmra.mrb[28].mxu1 %v7831_v44  ;;  %6360 = vmatprep.subr.bf16.mxu0 %v7182_v40 }
 0x1d9   :  { %6381 = vmatpush3.bf16.msra.mxu1 %v7181_v38  ;;  %3247 = vmatprep.mubr.bf16.mxu1 %v7836_v47  ;;  %v7196_v47 = vld [vmem:[#allocation2 + $0x820] sm:$0xff]  }
 0x1da   :  { %6382 = vmatprep.subr.bf16.mxu1 %v7183_v41 }
 0x1db   :  { %6361 = vmatpush3.bf16.msra.mxu0 %v7184_v42 }
 0x1dc   :  { %6362 = vmatprep.subr.bf16.mxu0 %v7186_v46 }
 0x1dd   :  { %6383 = vmatpush3.bf16.msra.mxu1 %v7185_v45 }
 0x1de   :  { %6384 = vmatprep.subr.bf16.mxu1 %v7187_v48 }
 0x1df   :  { %6363 = vmatpush3.bf16.msra.mxu0 %v7188_v49 }
 0x1e0   :  { %6364 = vmatprep.subr.bf16.mxu0 %v7190_v51 }
 0x1e1   :  { %6385 = vmatpush3.bf16.msra.mxu1 %v7189_v50 }
 0x1e2   :  { %6386 = vmatprep.subr.bf16.mxu1 %v7191_v52 }
 0x1e3   :  { %6365 = vmatpush3.bf16.msra.mxu0 %v7192_v43 }
 0x1e4   :  { %6366 = vmatprep.subr.bf16.mxu0 %v7194_v54 }
 0x1e5   :  { %6387 = vmatpush3.bf16.msra.mxu1 %v7193_v53 }
 0x1e6   :  { %6388 = vmatprep.subr.bf16.mxu1 %v7195_v55 }
 0x1e7   :  { %6367 = vmatpush3.bf16.msra.mxu0 %v7196_v47  ;;  %v3276_v47 = vld [vmem:[%s8444_s2] sm:$0xff] }
 0x1e8   :  { %6368 = vmatprep.subr.bf16.mxu0 %v7198_v57  ;;  %v3333_v57 = vld [vmem:[%s8445_s29] sm:$0xf] }
 0x1e9   :  { %6389 = vmatpush3.bf16.msra.mxu1 %v7197_v56  ;;  %v6066_v61 = vpop.f32.mrb[4].mxu0  ;;  %v7559_v56 = vmov 0  }
 0x1ea   :  { %v6067_v63 = vpop.f32.mrb[5].mxu0  ;;  %6390 = vmatprep.subr.bf16.mxu1 %v7199_v58  ;;  %6919 = vset.pattern.permute.xlu0 %v7559_v56  ;;  %v4513_v58 = vld [vmem:[%s8408_s11 + $0x8] sm:$0xff] }
 0x1eb   :  { %v6088_v1 = vpop.f32.mrb[4].mxu1  ;;  %v6068_v2 = vadd.f32 %v6067_v63, %v6066_v61  ;;  %v6069_v3 = vpop.f32.mrb[6].mxu0  ;;  %6369 = vmatpush3.bf16.msra.mxu0 %v7200_v59  ;;  %6920 = vset.pattern.permute.xlu1 %v7559_v56  ;;  %v4580_v59 = vld [vmem:[%s8410_s13 + $0x8] sm:$0xff] }
 0x1ec   :  { %v6089_v6 = vpop.f32.mrb[5].mxu1  ;;  %v6070_v7 = vpop.f32.mrb[7].mxu0  ;;  %6370 = vmatprep.subr.bf16.mxu0 %v7202_v62  ;;  %3279 = vperm.xlu0 %6919, %v3276_v47   ;;  %v5282_v63 = vld [vmem:[%s8417_s20 + $0x8] sm:$0xff]  ;;  %v7219_v47 = vld [vmem:[%s8446_s28 + $0x60] sm:$0xff]  }
 0x1ed   :  { %v6090_v8 = vadd.f32 %v6089_v6, %v6088_v1  ;;  %v6091_v9 = vpop.f32.mrb[6].mxu1  ;;  %6391 = vmatpush3.bf16.msra.mxu1 %v7201_v60  ;;  %v5224_v60 = vld [vmem:[%s8415_s18] sm:$0xff]  ;;  %v7221_v56 = vld [vmem:[%s8446_s28 + $0x68] sm:$0xff]  }
 0x1ee   :  { %v6092_v11 = vpop.f32.mrb[7].mxu1  ;;  %6392 = vmatprep.subr.bf16.mxu1 %v7203_v0 }
 0x1ef   :  { %v891_v13 = vadd.f32 %v6090_v8, %v6068_v2  ;;  %6371 = vmatpush3.bf16.msra.mxu0 %v7204_v4 }
 0x1f0   :  { %6372 = vmatprep.subr.bf16.mxu0 %v7206_v10  ;;  %3336 = vperm.xlu0 %6919, %v3333_v57   ;;  %v7223_v57 = vld [vmem:[%s8446_s28 + $0x70] sm:$0xff]  }
 0x1f1   :  { %v3256_v15 = vrot.slane %v891_v13, 4  ;;  %6393 = vmatpush3.bf16.msra.mxu1 %v7205_v5 }
 0x1f2   :  { %6394 = vmatprep.subr.bf16.mxu1 %v7207_v12 }
 0x1f3   :  { %v3268_v17 = vsel %vm3267_vm0, %v7867_v32, %v3256_v15  ;;  %6373 = vmatpush3.bf16.msra.mxu0 %v7208_v14 }
 0x1f4   :  { %6547 = vmatprep.subr.bf16.mxu0 %v7557_v18  ;;  %4521 = vperm.xlu0 %6919, %v4513_v58  }
 0x1f5   :  { %6395 = vmatpush3.bf16.msra.mxu1 %v7209_v16 }
 0x1f6   :  { %3208 = vmatmul.mubr.bf16.vlgmr.msra.gmra.mrb[32].mxu0 %v7825_v39  ;;  %6557 = vmatprep.subr.bf16.mxu1 %v7557_v18 }
 0x1f7   :  { %6553 = vmatprep.mubr.msk.bf16.mxu0 %vm7558_vm1, %v7557_v18 }
 0x1f8   :  { %3248 = vmatmul.mubr.bf16.vlgmr.msra.gmra.mrb[32].mxu1 %v7831_v44  ;;  %4588 = vperm.xlu0 %6919, %v4580_v59  }
 0x1f9   :  { %6559 = vmatprep.mubr.msk.bf16.mxu1 %vm7558_vm1, %v7557_v18 }
 0x1fc   :  { %5227 = vperm.xlu0 %6919, %v5224_v60  }
 0x200   :  { %5290 = vperm.xlu0 %6919, %v5282_v63  }
 0x209   :  { %v6110_v19 = vpop.f32.mrb[8].mxu0 }
 0x20a   :  { %v6111_v20 = vpop.f32.mrb[9].mxu0 }
 0x20b   :  { %v6132_v21 = vpop.f32.mrb[8].mxu1  ;;  %v6112_v22 = vadd.f32 %v6111_v20, %v6110_v19  ;;  %v6113_v23 = vpop.f32.mrb[10].mxu0 }
 0x20c   :  { %v6133_v24 = vpop.f32.mrb[9].mxu1  ;;  %v6114_v25 = vpop.f32.mrb[11].mxu0 }
 0x20d   :  { %v6134_v26 = vadd.f32 %v6133_v24, %v6132_v21  ;;  %v6135_v27 = vpop.f32.mrb[10].mxu1 }
 0x20e   :  { %v6136_v28 = vpop.f32.mrb[11].mxu1 }
 0x20f   :  { %v1228_v29 = vadd.f32 %v6134_v26, %v6112_v22 }
 0x229   :  { %v6154_v30 = vpop.f32.mrb[12].mxu0 }
 0x22a   :  { %v6155_v31 = vpop.f32.mrb[13].mxu0 }
 0x22b   :  { %v6176_v32 = vpop.f32.mrb[12].mxu1  ;;  %v6156_v33 = vadd.f32 %v6155_v31, %v6154_v30  ;;  %v6157_v39 = vpop.f32.mrb[14].mxu0 }
 0x22c   :  { %v6177_v34 = vpop.f32.mrb[13].mxu1  ;;  %v6158_v35 = vpop.f32.mrb[15].mxu0 }
 0x22d   :  { %v6178_v36 = vadd.f32 %v6177_v34, %v6176_v32  ;;  %v6179_v44 = vpop.f32.mrb[14].mxu1 }
 0x22e   :  { %v6180_v37 = vpop.f32.mrb[15].mxu1 }
 0x22f   :  { %v1565_v38 = vadd.f32 %v6178_v36, %v6156_v33 }
 0x231   :  { %v3259_v40 = vrot.slane %v1565_v38, 4 }
 0x233   :  { %v3269_v41 = vsel %vm3267_vm0, %v1228_v29, %v3259_v40 }
 0x234   :  { %v3272_v42 = vpack.c.bf16 %v3269_v41, %v3268_v17 }
 0x236   :  { %6548 = vmatpush3.bf16.msra.mxu0 %v3272_v42 }
 0x237   :  { %6549 = vmatprep.subr.bf16.mxu0 %v7557_v18 }
 0x249   :  { %v6198_v45 = vpop.f32.mrb[16].mxu0 }
 0x24a   :  { %v6199_v46 = vpop.f32.mrb[17].mxu0 }
 0x24b   :  { %v6220_v48 = vpop.f32.mrb[16].mxu1  ;;  %v6200_v49 = vadd.f32 %v6199_v46, %v6198_v45  ;;  %v6201_v50 = vpop.f32.mrb[18].mxu0 }
 0x24c   :  { %v6221_v51 = vpop.f32.mrb[17].mxu1  ;;  %v6202_v52 = vpop.f32.mrb[19].mxu0 }
 0x24d   :  { %v6222_v43 = vadd.f32 %v6221_v51, %v6220_v48  ;;  %v6223_v53 = vpop.f32.mrb[18].mxu1  ;;  %v3275_v52 = vld [vmem:[#allocation4] sm:$0xf] }
 0x24e   :  { %v6224_v54 = vpop.f32.mrb[19].mxu1  ;;  %v7213_v53 = vld [vmem:[%s8446_s28 + $0x48] sm:$0xff]  }
 0x24f   :  { %v1902_v55 = vadd.f32 %v6222_v43, %v6200_v49  ;;  %v7211_v43 = vld [vmem:[%s8446_s28 + $0x40] sm:$0xff]   ;;  %v7215_v54 = vld [vmem:[%s8446_s28 + $0x50] sm:$0xff]  }
 0x269   :  { %v6242_v61 = vpop.f32.mrb[20].mxu0 }
 0x26a   :  { %v6243_v62 = vpop.f32.mrb[21].mxu0 }
 0x26b   :  { %v6264_v0 = vpop.f32.mrb[20].mxu1  ;;  %v6244_v1 = vadd.f32 %v6243_v62, %v6242_v61  ;;  %v6245_v2 = vpop.f32.mrb[22].mxu0 }
 0x26c   :  { %v6265_v3 = vpop.f32.mrb[21].mxu1  ;;  %v6246_v4 = vpop.f32.mrb[23].mxu0 }
 0x26d   :  { %v6266_v5 = vadd.f32 %v6265_v3, %v6264_v0  ;;  %v6267_v6 = vpop.f32.mrb[22].mxu1  ;;  %v3280_v58 = vpop.permute.xlu0 %3279  ;;  %v3332_v3 = vld [vmem:[#allocation6] sm:$0x3] }
 0x26e   :  { %v6268_v7 = vpop.f32.mrb[23].mxu1  ;;  %v7210_v4 = vld [vmem:[%s8446_s28] sm:$0xff]   ;;  %v7214_v6 = vld [vmem:[%s8446_s28 + $0x10] sm:$0xff]  }
 0x26f   :  { %v2239_v8 = vadd.f32 %v6266_v5, %v6244_v1  ;;  %v7212_v5 = vld [vmem:[%s8446_s28 + $0x8] sm:$0xff]   ;;  %v7216_v7 = vld [vmem:[%s8446_s28 + $0x18] sm:$0xff]  }
 0x271   :  { %v3262_v9 = vrot.slane %v2239_v8, 4  ;;  %v7218_v8 = vld [vmem:[%s8446_s28 + $0x20] sm:$0xff]  }
 0x273   :  { %v3270_v10 = vsel %vm3267_vm0, %v1902_v55, %v3262_v9  ;;  %v7217_v55 = vld [vmem:[%s8446_s28 + $0x58] sm:$0xff]   ;;  %v7220_v9 = vld [vmem:[%s8446_s28 + $0x28] sm:$0xff]  }
 0x289   :  { %v6286_v11 = vpop.f32.mrb[24].mxu0 }
 0x28a   :  { %v6287_v12 = vpop.f32.mrb[25].mxu0 }
 0x28b   :  { %v6308_v13 = vpop.f32.mrb[24].mxu1  ;;  %v6288_v14 = vadd.f32 %v6287_v12, %v6286_v11  ;;  %v6289_v15 = vpop.f32.mrb[26].mxu0  ;;  %v7224_v11 = vld [vmem:[%s8446_s28 + $0x38] sm:$0xff]  }
 0x28c   :  { %v6309_v16 = vpop.f32.mrb[25].mxu1  ;;  %v6290_v17 = vpop.f32.mrb[27].mxu0  ;;  %v7225_v12 = vld [vmem:[%s8446_s28 + $0x78] sm:$0xff]  }
 0x28d   :  { %v6310_v19 = vadd.f32 %v6309_v16, %v6308_v13  ;;  %v6311_v20 = vpop.f32.mrb[26].mxu1  ;;  %v3337_v13 = vpop.permute.xlu0 %3336 }
 0x28e   :  { %v6312_v21 = vpop.f32.mrb[27].mxu1 }
 0x28f   :  { %v2576_v22 = vadd.f32 %v6310_v19, %v6288_v14  ;;  %v7226_v21 = vld [vmem:[%s8446_s28 + $0x80] sm:$0xff]  }
 0x2a9   :  { %v6330_v23 = vpop.f32.mrb[28].mxu0 }
 0x2aa   :  { %v6331_v24 = vpop.f32.mrb[29].mxu0 }
 0x2ab   :  { %v6352_v25 = vpop.f32.mrb[28].mxu1  ;;  %v6332_v26 = vadd.f32 %v6331_v24, %v6330_v23  ;;  %v6333_v27 = vpop.f32.mrb[30].mxu0  ;;  %v7228_v24 = vld [vmem:[%s8446_s28 + $0x88] sm:$0xff]  }
 0x2ac   :  { %v6353_v28 = vpop.f32.mrb[29].mxu1  ;;  %v6334_v29 = vpop.f32.mrb[31].mxu0  ;;  %v7231_v27 = vld [vmem:[%s8446_s28 + $0xd0] sm:$0xff]  }
 0x2ad   :  { %v6354_v30 = vadd.f32 %v6353_v28, %v6352_v25  ;;  %v6355_v31 = vpop.f32.mrb[30].mxu1  ;;  %v7229_v25 = vld [vmem:[%s8446_s28 + $0xc8] sm:$0xff]   ;;  %v7232_v28 = vld [vmem:[%s8446_s28 + $0x98] sm:$0xff]  }
 0x2ae   :  { %v6356_v32 = vpop.f32.mrb[31].mxu1  ;;  %v7233_v29 = vld [vmem:[%s8446_s28 + $0xd8] sm:$0xff]   ;;  %v7235_v31 = vld [vmem:[%s8446_s28 + $0xe0] sm:$0xff]  }
 0x2af   :  { %v2913_v33 = vadd.f32 %v6354_v30, %v6332_v26  ;;  %v7230_v26 = vld [vmem:[%s8446_s28 + $0x90] sm:$0xff]   ;;  %v7234_v30 = vld [vmem:[%s8446_s28 + $0xa0] sm:$0xff]   ;;  %v7236_v32 = vld [vmem:[%s8446_s28 + $0xa8] sm:$0xff]  }
 0x2b1   :  { %v3265_v39 = vrot.slane %v2913_v33, 4  ;;  %v7237_v33 = vld [vmem:[%s8446_s28 + $0xe8] sm:$0xff]  }
 0x2b3   :  { %v3271_v34 = vsel %vm3267_vm0, %v2576_v22, %v3265_v39  ;;  %v7227_v22 = vld [vmem:[%s8446_s28 + $0xc0] sm:$0xff]   ;;  %v7238_v39 = vld [vmem:[%s8446_s28 + $0xb0] sm:$0xff]  }
 0x2b4   :  { %v3273_v35 = vpack.c.bf16 %v3271_v34, %v3270_v10  ;;  %v7222_v10 = vld [vmem:[%s8446_s28 + $0x30] sm:$0xff]  }
 0x2b5   :  { %v7239_v34 = vld [vmem:[%s8446_s28 + $0xf0] sm:$0xff]  }
 0x2b6   :  { %6550 = vmatpush3.bf16.msra.mxu0 %v3273_v35  ;;  %v7240_v35 = vld [vmem:[%s8446_s28 + $0xb8] sm:$0xff]  }
 0x2b7   :  { %6551 = vmatprep.subr.bf16.mxu0 %v7557_v18 }
 0x2c9   :  { %v6374_v36 = vpop.f32.mrb[32].mxu0 }
 0x2ca   :  { %v6375_v44 = vpop.f32.mrb[33].mxu0 }
 0x2cb   :  { %v6396_v37 = vpop.f32.mrb[32].mxu1  ;;  %v6376_v38 = vadd.f32 %v6375_v44, %v6374_v36  ;;  %v6377_v40 = vpop.f32.mrb[34].mxu0  ;;  %v7241_v36 = vld [vmem:[%s8446_s28 + $0xf8] sm:$0xff]   ;;  %v7242_v44 = vld [vmem:[%s8446_s28 + $0x100] sm:$0xff]  }
 0x2cc   :  { %v6397_v41 = vpop.f32.mrb[33].mxu1  ;;  %v6378_v42 = vpop.f32.mrb[35].mxu0  ;;  %v7245_v40 = vld [vmem:[%s8446_s28 + $0x148] sm:$0xff]  }
 0x2cd   :  { %v6398_v45 = vadd.f32 %v6397_v41, %v6396_v37  ;;  %v6399_v46 = vpop.f32.mrb[34].mxu1  ;;  %v7243_v37 = vld [vmem:[%s8446_s28 + $0x140] sm:$0xff]   ;;  %v7246_v41 = vld [vmem:[%s8446_s28 + $0x110] sm:$0xff]  }
 0x2ce   :  { %v6400_v48 = vpop.f32.mrb[35].mxu1  ;;  %v7247_v42 = vld [vmem:[%s8446_s28 + $0x150] sm:$0xff]   ;;  %v7249_v46 = vld [vmem:[%s8446_s28 + $0x158] sm:$0xff]  }
 0x2cf   :  { %v3250_v49 = vadd.f32 %v6398_v45, %v6376_v38  ;;  %v7244_v38 = vld [vmem:[%s8446_s28 + $0x108] sm:$0xff]   ;;  %v7248_v45 = vld [vmem:[%s8446_s28 + $0x118] sm:$0xff]   ;;  %v7250_v48 = vld [vmem:[%s8446_s28 + $0x120] sm:$0xff]  }
 0x2d1   :  { %v3274_v50 = vpack.c.bf16 %v3250_v49, %v3250_v49  ;;  %v7251_v49 = vld [vmem:[%s8446_s28 + $0x160] sm:$0xff]  }
 0x2d3   :  { %v3288_v51 = vsel %vm3286_vm2, %v3274_v50, 0  ;;  %v7252_v50 = vld [vmem:[%s8446_s28 + $0x128] sm:$0xff]  }
 0x2d4   :  { %6552 = vmatpush3.bf16.msra.mxu0 %v3288_v51  ;;  %v7253_v51 = vld [vmem:[%s8446_s28 + $0x168] sm:$0xff]  }
 0x2d5   :  { %6583 = vmatprep.subr.bf16.mxu0 %v7557_v18 }
 0x2d7   :  { %6554 = vmatmul.mubr.msk.bf16.vlgmr.msra.gmra.mrb[36].mxu0 %vm3282_vm3, %v3275_v52  ;;  %v7254_v52 = vld [vmem:[%s8446_s28 + $0x130] sm:$0xff]  }
 0x2d8   :  { %6599 = vmatprep.mubr.msk.bf16.mxu0 %vm7558_vm1, %v7557_v18  ;;  %6584 = vmatpush3.bf16.msra.mxu0 %v7211_v43  ;;  %v7255_v43 = vld [vmem:[%s8446_s28 + $0x170] sm:$0xff]  }
 0x2d9   :  { %6585 = vmatprep.subr.bf16.mxu0 %v7557_v18 }
 0x2dc   :  { %6586 = vmatpush3.bf16.msra.mxu0 %v7213_v53  ;;  %v7256_v53 = vld [vmem:[%s8446_s28 + $0x138] sm:$0xff]  }
 0x2dd   :  { %6587 = vmatprep.subr.bf16.mxu0 %v7557_v18 }
 0x2e0   :  { %6588 = vmatpush3.bf16.msra.mxu0 %v7215_v54  ;;  %v7257_v54 = vld [vmem:[%s8446_s28 + $0x178] sm:$0xff]  }
 0x2e1   :  { %6589 = vmatprep.subr.bf16.mxu0 %v7557_v18 }
 0x2e4   :  { %6590 = vmatpush3.bf16.msra.mxu0 %v7217_v55  ;;  %v7258_v55 = vld [vmem:[%s8446_s28 + $0x180] sm:$0xff]  }
 0x2e5   :  { %6591 = vmatprep.subr.bf16.mxu0 %v7557_v18 }
 0x2e8   :  { %6592 = vmatpush3.bf16.msra.mxu0 %v7219_v47  ;;  %v7259_v47 = vld [vmem:[%s8446_s28 + $0x1c0] sm:$0xff]  }
 0x2e9   :  { %6593 = vmatprep.subr.bf16.mxu0 %v7557_v18 }
 0x2ec   :  { %6594 = vmatpush3.bf16.msra.mxu0 %v7221_v56  ;;  %v7260_v56 = vld [vmem:[%s8446_s28 + $0x188] sm:$0xff]  }
 0x2ed   :  { %6595 = vmatprep.subr.bf16.mxu0 %v7557_v18 }
 0x2f0   :  { %6596 = vmatpush3.bf16.msra.mxu0 %v7223_v57  ;;  %v7261_v57 = vld [vmem:[%s8446_s28 + $0x1c8] sm:$0xff]  }
 0x2f1   :  { %6597 = vmatprep.subr.bf16.mxu0 %v7557_v18 }
 0x2f4   :  { %6598 = vmatpush3.bf16.msra.mxu0 %v7225_v12  ;;  %v7279_v12 = vld [vmem:[%s8446_s28 + $0x228] sm:$0xff]  }
 0x2f5   :  { %6623 = vmatprep.subr.bf16.mxu0 %v7557_v18 }
 0x3aa   :  { %v3324_v59 = vpop.f32.mrb[36].mxu0 }
 0x3ab   :  { %v3325_v60 = vadd.f32 %v3324_v59, %v3280_v58  ;;  %v6555_v61 = vpop.f32.mrb[37].mxu0  ;;  %v7262_v58 = vld [vmem:[%s8446_s28 + $0x190] sm:$0xff]  }
 0x3ac   :  { %v3327_v62 = vpop.f32.mrb[38].mxu0  ;;  %v7263_v59 = vld [vmem:[%s8446_s28 + $0x1d0] sm:$0xff]   ;;  %v7265_v61 = vld [vmem:[%s8446_s28 + $0x1d8] sm:$0xff]  }
 0x3ad   :  { %v3330_v63 = vmax.f32 %v3325_v60, 0.0  ;;  %v6556_v0 = vpop.f32.mrb[39].mxu0  ;;  %v7264_v60 = vld [vmem:[%s8446_s28 + $0x198] sm:$0xff]   ;;  %v7266_v62 = vld [vmem:[%s8446_s28 + $0x1a0] sm:$0xff]  }
 0x3ae   :  { %v7268_v0 = vld [vmem:[%s8446_s28 + $0x1a8] sm:$0xff]  }
 0x3af   :  { %v7939_v1 = vpack.c.bf16 %v3330_v63, %v3330_v63  ;;  %v7267_v63 = vld [vmem:[%s8446_s28 + $0x1e0] sm:$0xff]  }
 0x3b1   :  { %v3344_v2 = vsel %vm3267_vm0, %v7939_v1, 0 }
 0x3b2   :  { %6558 = vmatpush3.bf16.msra.mxu1 %v3344_v2  ;;  %v7269_v2 = vld [vmem:[%s8446_s28 + $0x1e8] sm:$0xff]  }
 0x3b3   :  { %6563 = vmatprep.subr.bf16.mxu1 %v7557_v18 }
 0x3b5   :  { %6560 = vmatmul.mubr.msk.bf16.vlgmr.msra.gmra.mrb[36].mxu1 %vm3339_vm4, %v3332_v3  ;;  %v7270_v3 = vld [vmem:[%s8446_s28 + $0x1b0] sm:$0xff]  }
 0x3b6   :  { %6564 = vmatpush3.bf16.msra.mxu1 %v7210_v4  ;;  %6579 = vmatprep.mubr.msk.bf16.mxu1 %vm7558_vm1, %v7557_v18  ;;  %v7271_v4 = vld [vmem:[%s8446_s28 + $0x1f0] sm:$0xff]  }
 0x3b7   :  { %6565 = vmatprep.subr.bf16.mxu1 %v7557_v18 }
 0x3ba   :  { %6566 = vmatpush3.bf16.msra.mxu1 %v7212_v5  ;;  %v7272_v5 = vld [vmem:[%s8446_s28 + $0x1b8] sm:$0xff]  }
 0x3bb   :  { %6567 = vmatprep.subr.bf16.mxu1 %v7557_v18 }
 0x3be   :  { %6568 = vmatpush3.bf16.msra.mxu1 %v7214_v6  ;;  %v7273_v6 = vld [vmem:[%s8446_s28 + $0x1f8] sm:$0xff]  }
 0x3bf   :  { %6569 = vmatprep.subr.bf16.mxu1 %v7557_v18 }
 0x3c2   :  { %6570 = vmatpush3.bf16.msra.mxu1 %v7216_v7  ;;  %v7274_v7 = vld [vmem:[%s8446_s28 + $0x200] sm:$0xff]  }
 0x3c3   :  { %6571 = vmatprep.subr.bf16.mxu1 %v7557_v18 }
 0x3c6   :  { %6572 = vmatpush3.bf16.msra.mxu1 %v7218_v8  ;;  %v7275_v8 = vld [vmem:[%s8446_s28 + $0x208] sm:$0xff]  }
 0x3c7   :  { %6573 = vmatprep.subr.bf16.mxu1 %v7557_v18 }
 0x3ca   :  { %6574 = vmatpush3.bf16.msra.mxu1 %v7220_v9  ;;  %v7276_v9 = vld [vmem:[%s8446_s28 + $0x210] sm:$0xff]  }
 0x3cb   :  { %6575 = vmatprep.subr.bf16.mxu1 %v7557_v18 }
 0x3ce   :  { %6576 = vmatpush3.bf16.msra.mxu1 %v7222_v10  ;;  %v7277_v10 = vld [vmem:[%s8446_s28 + $0x218] sm:$0xff]  }
 0x3cf   :  { %6577 = vmatprep.subr.bf16.mxu1 %v7557_v18 }
 0x3d2   :  { %6578 = vmatpush3.bf16.msra.mxu1 %v7224_v11  ;;  %v7278_v11 = vld [vmem:[%s8446_s28 + $0x220] sm:$0xff]  }
 0x3d3   :  { %6603 = vmatprep.subr.bf16.mxu1 %v7557_v18 }
 0x488   :  { %v3380_v14 = vpop.f32.mrb[36].mxu1 }
 0x489   :  { %v3381_v15 = vadd.f32 %v3380_v14, %v3337_v13  ;;  %v6561_v16 = vpop.f32.mrb[37].mxu1  ;;  %v7280_v13 = vld [vmem:[%s8446_s28 + $0x230] sm:$0xff]   ;;  %v7281_v14 = vld [vmem:[%s8446_s28 + $0x238] sm:$0xff]  }
 0x48a   :  { %v3383_v17 = vpop.f32.mrb[38].mxu1 }
 0x48b   :  { %v3386_v19 = vmax.f32 %v3381_v15, 0.0  ;;  %v6562_v20 = vpop.f32.mrb[39].mxu1 }
 0x48d   :  { %v7989_v23 = vpack.c.bf16 %v3386_v19, %v3386_v19 }
 0x48f   :  { %6580 = vmatmul.mubr.bf16.vlgmr.msra.gmra.mrb[40].mxu1 %v7989_v23  ;;  %6600 = vmatmul.mubr.bf16.vlgmr.msra.gmra.mrb[40].mxu0 %v7989_v23 }
 0x490   :  { %6604 = vmatpush3.bf16.msra.mxu1 %v7226_v21  ;;  %6624 = vmatpush3.bf16.msra.mxu0 %v7227_v22 }
 0x491   :  { %6605 = vmatprep.subr.bf16.mxu1 %v7557_v18  ;;  %6625 = vmatprep.subr.bf16.mxu0 %v7557_v18 }
 0x492   :  { %6619 = vmatprep.mubr.msk.bf16.mxu1 %vm7558_vm1, %v7557_v18  ;;  %6639 = vmatprep.mubr.msk.bf16.mxu0 %vm7558_vm1, %v7557_v18 }
 0x494   :  { %6606 = vmatpush3.bf16.msra.mxu1 %v7228_v24  ;;  %6626 = vmatpush3.bf16.msra.mxu0 %v7229_v25 }
 0x495   :  { %6607 = vmatprep.subr.bf16.mxu1 %v7557_v18  ;;  %6627 = vmatprep.subr.bf16.mxu0 %v7557_v18 }
 0x498   :  { %6608 = vmatpush3.bf16.msra.mxu1 %v7230_v26  ;;  %6628 = vmatpush3.bf16.msra.mxu0 %v7231_v27 }
 0x499   :  { %6609 = vmatprep.subr.bf16.mxu1 %v7557_v18  ;;  %6629 = vmatprep.subr.bf16.mxu0 %v7557_v18 }
 0x49c   :  { %6610 = vmatpush3.bf16.msra.mxu1 %v7232_v28  ;;  %6630 = vmatpush3.bf16.msra.mxu0 %v7233_v29 }
 0x49d   :  { %6611 = vmatprep.subr.bf16.mxu1 %v7557_v18  ;;  %6631 = vmatprep.subr.bf16.mxu0 %v7557_v18 }
 0x4a0   :  { %6612 = vmatpush3.bf16.msra.mxu1 %v7234_v30  ;;  %6632 = vmatpush3.bf16.msra.mxu0 %v7235_v31 }
 0x4a1   :  { %6613 = vmatprep.subr.bf16.mxu1 %v7557_v18  ;;  %6633 = vmatprep.subr.bf16.mxu0 %v7557_v18 }
 0x4a4   :  { %6614 = vmatpush3.bf16.msra.mxu1 %v7236_v32  ;;  %6634 = vmatpush3.bf16.msra.mxu0 %v7237_v33 }
 0x4a5   :  { %6615 = vmatprep.subr.bf16.mxu1 %v7557_v18  ;;  %6635 = vmatprep.subr.bf16.mxu0 %v7557_v18 }
 0x4a8   :  { %6616 = vmatpush3.bf16.msra.mxu1 %v7238_v39  ;;  %6636 = vmatpush3.bf16.msra.mxu0 %v7239_v34 }
 0x4a9   :  { %6617 = vmatprep.subr.bf16.mxu1 %v7557_v18  ;;  %6637 = vmatprep.subr.bf16.mxu0 %v7557_v18 }
 0x4ac   :  { %6618 = vmatpush3.bf16.msra.mxu1 %v7240_v35  ;;  %6638 = vmatpush3.bf16.msra.mxu0 %v7241_v36  ;;  %v4352_v36 = vld [vmem:[%s8447_s8] sm:$0xf] }
 0x4ad   :  { %6643 = vmatprep.subr.bf16.mxu1 %v7557_v18  ;;  %6663 = vmatprep.subr.bf16.mxu0 %v7557_v18 }
 0x4ae   :  { %4355 = vperm.xlu1 %6920, %v4352_v36  }
 0x4af   :  { %6620 = vmatmul.mubr.bf16.vlgmr.msra.gmra.mrb[44].mxu1 %v7989_v23  ;;  %6640 = vmatmul.mubr.bf16.vlgmr.msra.gmra.mrb[44].mxu0 %v7989_v23 }
 0x4b0   :  { %6644 = vmatpush3.bf16.msra.mxu1 %v7242_v44  ;;  %6664 = vmatpush3.bf16.msra.mxu0 %v7243_v37  ;;  %v4512_v44 = vld [vmem:[%s8408_s11] sm:$0xff] }
 0x4b1   :  { %6645 = vmatprep.subr.bf16.mxu1 %v7557_v18  ;;  %6665 = vmatprep.subr.bf16.mxu0 %v7557_v18  ;;  %v4579_v37 = vld [vmem:[%s8410_s13] sm:$0xff] }
 0x4b2   :  { %6659 = vmatprep.mubr.msk.bf16.mxu1 %vm7558_vm1, %v7557_v18  ;;  %6679 = vmatprep.mubr.msk.bf16.mxu0 %vm7558_vm1, %v7557_v18 }
 0x4b3   :  { %4516 = vperm.xlu1 %6920, %v4512_v44  }
 0x4b4   :  { %6646 = vmatpush3.bf16.msra.mxu1 %v7244_v38  ;;  %6666 = vmatpush3.bf16.msra.mxu0 %v7245_v40  ;;  %v4650_v38 = vld [vmem:[%s8412_s15] sm:$0xff] }
 0x4b5   :  { %6647 = vmatprep.subr.bf16.mxu1 %v7557_v18  ;;  %6667 = vmatprep.subr.bf16.mxu0 %v7557_v18  ;;  %v5281_v40 = vld [vmem:[%s8417_s20] sm:$0xff] }
 0x4b7   :  { %4583 = vperm.xlu1 %6920, %v4579_v37  }
 0x4b8   :  { %6648 = vmatpush3.bf16.msra.mxu1 %v7246_v41  ;;  %6668 = vmatpush3.bf16.msra.mxu0 %v7247_v42 }
 0x4b9   :  { %6649 = vmatprep.subr.bf16.mxu1 %v7557_v18  ;;  %6669 = vmatprep.subr.bf16.mxu0 %v7557_v18 }
 0x4bb   :  { %4653 = vperm.xlu1 %6920, %v4650_v38  }
 0x4bc   :  { %6650 = vmatpush3.bf16.msra.mxu1 %v7248_v45  ;;  %6670 = vmatpush3.bf16.msra.mxu0 %v7249_v46 }
 0x4bd   :  { %6651 = vmatprep.subr.bf16.mxu1 %v7557_v18  ;;  %6671 = vmatprep.subr.bf16.mxu0 %v7557_v18 }
 0x4bf   :  { %5285 = vperm.xlu1 %6920, %v5281_v40  }
 0x4c0   :  { %6652 = vmatpush3.bf16.msra.mxu1 %v7250_v48  ;;  %6672 = vmatpush3.bf16.msra.mxu0 %v7251_v49 }
 0x4c1   :  { %6653 = vmatprep.subr.bf16.mxu1 %v7557_v18  ;;  %6673 = vmatprep.subr.bf16.mxu0 %v7557_v18 }
 0x4c4   :  { %6654 = vmatpush3.bf16.msra.mxu1 %v7252_v50  ;;  %6674 = vmatpush3.bf16.msra.mxu0 %v7253_v51 }
 0x4c5   :  { %6655 = vmatprep.subr.bf16.mxu1 %v7557_v18  ;;  %6675 = vmatprep.subr.bf16.mxu0 %v7557_v18 }
 0x4c8   :  { %6656 = vmatpush3.bf16.msra.mxu1 %v7254_v52  ;;  %6676 = vmatpush3.bf16.msra.mxu0 %v7255_v43 }
 0x4c9   :  { %6657 = vmatprep.subr.bf16.mxu1 %v7557_v18  ;;  %6677 = vmatprep.subr.bf16.mxu0 %v7557_v18 }
 0x4cc   :  { %6658 = vmatpush3.bf16.msra.mxu1 %v7256_v53  ;;  %6678 = vmatpush3.bf16.msra.mxu0 %v7257_v54 }
 0x4cd   :  { %6683 = vmatprep.subr.bf16.mxu1 %v7557_v18  ;;  %6703 = vmatprep.subr.bf16.mxu0 %v7557_v18 }
 0x4cf   :  { %6660 = vmatmul.mubr.bf16.vlgmr.msra.gmra.mrb[48].mxu1 %v7989_v23  ;;  %6680 = vmatmul.mubr.bf16.vlgmr.msra.gmra.mrb[48].mxu0 %v7989_v23 }
 0x4d0   :  { %6684 = vmatpush3.bf16.msra.mxu1 %v7258_v55  ;;  %6704 = vmatpush3.bf16.msra.mxu0 %v7259_v47 }
 0x4d1   :  { %6685 = vmatprep.subr.bf16.mxu1 %v7557_v18  ;;  %6705 = vmatprep.subr.bf16.mxu0 %v7557_v18 }
 0x4d2   :  { %6699 = vmatprep.mubr.msk.bf16.mxu1 %vm7558_vm1, %v7557_v18  ;;  %6719 = vmatprep.mubr.msk.bf16.mxu0 %vm7558_vm1, %v7557_v18 }
 0x4d4   :  { %6686 = vmatpush3.bf16.msra.mxu1 %v7260_v56  ;;  %6706 = vmatpush3.bf16.msra.mxu0 %v7261_v57 }
 0x4d5   :  { %6687 = vmatprep.subr.bf16.mxu1 %v7557_v18  ;;  %6707 = vmatprep.subr.bf16.mxu0 %v7557_v18 }
 0x4d8   :  { %6688 = vmatpush3.bf16.msra.mxu1 %v7262_v58  ;;  %6708 = vmatpush3.bf16.msra.mxu0 %v7263_v59 }
 0x4d9   :  { %6689 = vmatprep.subr.bf16.mxu1 %v7557_v18  ;;  %6709 = vmatprep.subr.bf16.mxu0 %v7557_v18 }
 0x4dc   :  { %6690 = vmatpush3.bf16.msra.mxu1 %v7264_v60  ;;  %6710 = vmatpush3.bf16.msra.mxu0 %v7265_v61 }
 0x4dd   :  { %6691 = vmatprep.subr.bf16.mxu1 %v7557_v18  ;;  %6711 = vmatprep.subr.bf16.mxu0 %v7557_v18 }
 0x4e0   :  { %6692 = vmatpush3.bf16.msra.mxu1 %v7266_v62  ;;  %6712 = vmatpush3.bf16.msra.mxu0 %v7267_v63 }
 0x4e1   :  { %6693 = vmatprep.subr.bf16.mxu1 %v7557_v18  ;;  %6713 = vmatprep.subr.bf16.mxu0 %v7557_v18 }
 0x4e4   :  { %6694 = vmatpush3.bf16.msra.mxu1 %v7268_v0  ;;  %6714 = vmatpush3.bf16.msra.mxu0 %v7269_v2 }
 0x4e5   :  { %6695 = vmatprep.subr.bf16.mxu1 %v7557_v18  ;;  %6715 = vmatprep.subr.bf16.mxu0 %v7557_v18 }
 0x4e8   :  { %6696 = vmatpush3.bf16.msra.mxu1 %v7270_v3  ;;  %6716 = vmatpush3.bf16.msra.mxu0 %v7271_v4 }
 0x4e9   :  { %6697 = vmatprep.subr.bf16.mxu1 %v7557_v18  ;;  %6717 = vmatprep.subr.bf16.mxu0 %v7557_v18 }
 0x4ec   :  { %6698 = vmatpush3.bf16.msra.mxu1 %v7272_v5  ;;  %6718 = vmatpush3.bf16.msra.mxu0 %v7273_v6  ;;  %v4351_v6 = vld [vmem:[#allocation7] sm:$0x3] }
 0x4ed   :  { %6723 = vmatprep.subr.bf16.mxu1 %v7557_v18  ;;  %6743 = vmatprep.subr.bf16.mxu0 %v7557_v18 }
 0x4ef   :  { %6700 = vmatmul.mubr.bf16.vlgmr.msra.gmra.mrb[52].mxu1 %v7989_v23  ;;  %6720 = vmatmul.mubr.bf16.vlgmr.msra.gmra.mrb[52].mxu0 %v7989_v23 }
 0x4f0   :  { %6724 = vmatpush3.bf16.msra.mxu1 %v7274_v7  ;;  %6739 = vmatprep.mubr.msk.bf16.mxu1 %vm7558_vm1, %v7557_v18  ;;  %v7282_v7 = vld [vmem:[%s8406_s9] sm:$0xff]  }
 0x4f1   :  { %6725 = vmatprep.subr.bf16.mxu1 %v7557_v18  ;;  %6749 = vmatprep.mubr.msk.bf16.mxu0 %vm7558_vm1, %v7557_v18 }
 0x4f4   :  { %6726 = vmatpush3.bf16.msra.mxu1 %v7275_v8  ;;  %v7283_v8 = vld [vmem:[%s8406_s9 + $0x8] sm:$0xff]  }
 0x4f5   :  { %6727 = vmatprep.subr.bf16.mxu1 %v7557_v18 }
 0x4f8   :  { %6728 = vmatpush3.bf16.msra.mxu1 %v7276_v9  ;;  %v7284_v9 = vld [vmem:[%s8406_s9 + $0x10] sm:$0xff]  }
 0x4f9   :  { %6729 = vmatprep.subr.bf16.mxu1 %v7557_v18 }
 0x4fc   :  { %6730 = vmatpush3.bf16.msra.mxu1 %v7277_v10  ;;  %v7285_v10 = vld [vmem:[%s8406_s9 + $0x18] sm:$0xff]  }
 0x4fd   :  { %6731 = vmatprep.subr.bf16.mxu1 %v7557_v18 }
 0x500   :  { %6732 = vmatpush3.bf16.msra.mxu1 %v7278_v11  ;;  %v7286_v11 = vld [vmem:[%s8406_s9 + $0x20] sm:$0xff]  }
 0x501   :  { %6733 = vmatprep.subr.bf16.mxu1 %v7557_v18 }
 0x504   :  { %6734 = vmatpush3.bf16.msra.mxu1 %v7279_v12  ;;  %v7287_v12 = vld [vmem:[%s8406_s9 + $0x28] sm:$0xff]  }
 0x505   :  { %6735 = vmatprep.subr.bf16.mxu1 %v7557_v18 }
 0x508   :  { %6736 = vmatpush3.bf16.msra.mxu1 %v7280_v13  ;;  %v7288_v13 = vld [vmem:[%s8406_s9 + $0x30] sm:$0xff]  }
 0x509   :  { %6737 = vmatprep.subr.bf16.mxu1 %v7557_v18 }
 0x50c   :  { %6738 = vmatpush3.bf16.msra.mxu1 %v7281_v14  ;;  %v7289_v14 = vld [vmem:[%s8406_s9 + $0x38] sm:$0xff]  }
 0x50d   :  { %6773 = vmatprep.subr.bf16.mxu1 %v7557_v18 }
 0x50f   :  { %6740 = vmatmul.mubr.bf16.vlgmr.msra.gmra.mrb[56].mxu1 %v7989_v23 }
 0x510   :  { %6775 = vmatprep.mubr.msk.bf16.mxu1 %vm7558_vm1, %v7557_v18 }
 0x562   :  { %v3486_v15 = vpop.f32.mrb[40].mxu1  ;;  %v3591_v16 = vpop.f32.mrb[40].mxu0 }
 0x563   :  { %v4333_v17 = vrot.slane %v3591_v16, 4  ;;  %v6581_v19 = vpop.f32.mrb[41].mxu1  ;;  %v6601_v20 = vpop.f32.mrb[41].mxu0 }
 0x564   :  { %v3489_v21 = vpop.f32.mrb[42].mxu1  ;;  %v3594_v22 = vpop.f32.mrb[42].mxu0 }
 0x565   :  { %v4344_v24 = vsel %vm3267_vm0, %v3486_v15, %v4333_v17  ;;  %v6582_v25 = vpop.f32.mrb[43].mxu1  ;;  %v6602_v26 = vpop.f32.mrb[43].mxu0 }
 0x566   :  { %v4356_v20 = vpop.permute.xlu1 %4355 }
 0x582   :  { %v3696_v27 = vpop.f32.mrb[44].mxu1  ;;  %v3801_v28 = vpop.f32.mrb[44].mxu0 }
 0x583   :  { %v4336_v29 = vrot.slane %v3801_v28, 4  ;;  %v6621_v30 = vpop.f32.mrb[45].mxu1  ;;  %v6641_v31 = vpop.f32.mrb[45].mxu0 }
 0x584   :  { %v3699_v23 = vpop.f32.mrb[46].mxu1  ;;  %v3804_v32 = vpop.f32.mrb[46].mxu0 }
 0x585   :  { %v4345_v33 = vsel %vm3267_vm0, %v3696_v27, %v4336_v29  ;;  %v6622_v39 = vpop.f32.mrb[47].mxu1  ;;  %v6642_v34 = vpop.f32.mrb[47].mxu0  ;;  %v7291_v23 = vld [vmem:[%s8409_s12] sm:$0xff]  }
 0x586   :  { %v4348_v35 = vpack.c.bf16 %v4345_v33, %v4344_v24  ;;  %v4517_v32 = vpop.permute.xlu1 %4516  ;;  %v4522_v33 = vpop.permute.xlu0 %4521 }
 0x588   :  { %6744 = vmatpush3.bf16.msra.mxu0 %v4348_v35 }
 0x589   :  { %6745 = vmatprep.subr.bf16.mxu0 %v7557_v18 }
 0x58a   :  { %v4584_v39 = vpop.permute.xlu1 %4583  ;;  %v4589_v35 = vpop.permute.xlu0 %4588 }
 0x58b   :  { %v6895_v34 = vadd.f32 %v4584_v39, %v4517_v32  ;;  %v6897_v44 = vadd.f32 %v4589_v35, %v4522_v33 }
 0x5a2   :  { %v3906_v41 = vpop.f32.mrb[48].mxu1  ;;  %v4011_v42 = vpop.f32.mrb[48].mxu0 }
 0x5a3   :  { %v4339_v45 = vrot.slane %v4011_v42, 4  ;;  %v6661_v46 = vpop.f32.mrb[49].mxu1  ;;  %v6681_v48 = vpop.f32.mrb[49].mxu0 }
 0x5a4   :  { %v3909_v49 = vpop.f32.mrb[50].mxu1  ;;  %v4014_v50 = vpop.f32.mrb[50].mxu0 }
 0x5a5   :  { %v4346_v51 = vsel %vm3267_vm0, %v3906_v41, %v4339_v45  ;;  %v6662_v52 = vpop.f32.mrb[51].mxu1  ;;  %v6682_v43 = vpop.f32.mrb[51].mxu0  ;;  %v4649_v49 = vld [vmem:[#allocation9] sm:$0xf]  ;;  %v7292_v50 = vld [vmem:[#allocation10] sm:$0xff]  }
 0x5a6   :  { %v7294_v52 = vld [vmem:[#allocation10 + $0x8] sm:$0xff]   ;;  %v7295_v43 = vld [vmem:[#allocation10 + $0x18] sm:$0xff]  }
 0x5c2   :  { %v4116_v53 = vpop.f32.mrb[52].mxu1  ;;  %v4221_v54 = vpop.f32.mrb[52].mxu0 }
 0x5c3   :  { %v4342_v55 = vrot.slane %v4221_v54, 4  ;;  %v6701_v47 = vpop.f32.mrb[53].mxu1  ;;  %v6721_v56 = vpop.f32.mrb[53].mxu0 }
 0x5c4   :  { %v4119_v57 = vpop.f32.mrb[54].mxu1  ;;  %v4224_v58 = vpop.f32.mrb[54].mxu0 }
 0x5c5   :  { %v4347_v59 = vsel %vm3267_vm0, %v4116_v53, %v4342_v55  ;;  %v6702_v60 = vpop.f32.mrb[55].mxu1  ;;  %v6722_v61 = vpop.f32.mrb[55].mxu0 }
 0x5c6   :  { %v4349_v62 = vpack.c.bf16 %v4347_v59, %v4346_v51  ;;  %v7293_v51 = vld [vmem:[#allocation10 + $0x10] sm:$0xff]   ;;  %v4654_v53 = vpop.permute.xlu1 %4653  ;;  %v7296_v59 = vld [vmem:[#allocation10 + $0x20] sm:$0xff]  }
 0x5c7   :  { %v7297_v60 = vld [vmem:[#allocation10 + $0x30] sm:$0xff]  }
 0x5c8   :  { %6746 = vmatpush3.bf16.msra.mxu0 %v4349_v62  ;;  %v7298_v62 = vld [vmem:[#allocation10 + $0x28] sm:$0xff]  }
 0x5c9   :  { %6747 = vmatprep.subr.bf16.mxu0 %v7557_v18 }
 0x5e2   :  { %v4326_v63 = vpop.f32.mrb[56].mxu1 }
 0x5e3   :  { %v4350_v0 = vpack.c.bf16 %v4326_v63, %v4326_v63  ;;  %v6741_v2 = vpop.f32.mrb[57].mxu1  ;;  %v7299_v63 = vld [vmem:[#allocation10 + $0x38] sm:$0xff]  }
 0x5e4   :  { %v4329_v3 = vpop.f32.mrb[58].mxu1  ;;  %v7301_v2 = vld [vmem:[#allocation10 + $0x50] sm:$0xff]  }
 0x5e5   :  { %v4362_v4 = vsel %vm3286_vm2, %v4350_v0, 0  ;;  %v6742_v5 = vpop.f32.mrb[59].mxu1  ;;  %v7300_v0 = vld [vmem:[#allocation10 + $0x40] sm:$0xff]   ;;  %v7302_v3 = vld [vmem:[#allocation10 + $0x48] sm:$0xff]  }
 0x5e6   :  { %6748 = vmatpush3.bf16.msra.mxu0 %v4362_v4  ;;  %v7303_v4 = vld [vmem:[#allocation10 + $0x58] sm:$0xff]   ;;  %v7304_v5 = vld [vmem:[#allocation10 + $0x60] sm:$0xff]  }
 0x5e7   :  { %6753 = vmatprep.subr.bf16.mxu0 %v7557_v18 }
 0x5e9   :  { %6750 = vmatmul.mubr.msk.bf16.vlgmr.msra.gmra.mrb[56].mxu0 %vm3282_vm3, %v4351_v6  ;;  %v7305_v6 = vld [vmem:[#allocation10 + $0x70] sm:$0xff]  }
 0x5ea   :  { %6754 = vmatpush3.bf16.msra.mxu0 %v7282_v7  ;;  %6769 = vmatprep.mubr.msk.bf16.mxu0 %vm7558_vm1, %v7557_v18  ;;  %v7306_v7 = vld [vmem:[#allocation10 + $0x68] sm:$0xff]  }
 0x5eb   :  { %6755 = vmatprep.subr.bf16.mxu0 %v7557_v18 }
 0x5ee   :  { %6756 = vmatpush3.bf16.msra.mxu0 %v7283_v8  ;;  %v7307_v8 = vld [vmem:[#allocation10 + $0x78] sm:$0xff]  }
 0x5ef   :  { %6757 = vmatprep.subr.bf16.mxu0 %v7557_v18 }
 0x5f2   :  { %6758 = vmatpush3.bf16.msra.mxu0 %v7284_v9  ;;  %v7308_v9 = vld [vmem:[#allocation10 + $0x80] sm:$0xff]  }
 0x5f3   :  { %6759 = vmatprep.subr.bf16.mxu0 %v7557_v18 }
 0x5f6   :  { %6760 = vmatpush3.bf16.msra.mxu0 %v7285_v10  ;;  %v7309_v10 = vld [vmem:[#allocation10 + $0x88] sm:$0xff]  }
 0x5f7   :  { %6761 = vmatprep.subr.bf16.mxu0 %v7557_v18 }
 0x5fa   :  { %6762 = vmatpush3.bf16.msra.mxu0 %v7286_v11 }
 0x5fb   :  { %6763 = vmatprep.subr.bf16.mxu0 %v7557_v18 }
 0x5fe   :  { %6764 = vmatpush3.bf16.msra.mxu0 %v7287_v12 }
 0x5ff   :  { %6765 = vmatprep.subr.bf16.mxu0 %v7557_v18 }
 0x602   :  { %6766 = vmatpush3.bf16.msra.mxu0 %v7288_v13 }
 0x603   :  { %6767 = vmatprep.subr.bf16.mxu0 %v7557_v18 }
 0x606   :  { %6768 = vmatpush3.bf16.msra.mxu0 %v7289_v14 }
 0x607   :  { %6785 = vmatprep.subr.bf16.mxu0 %v7557_v18 }
 0x609   :  { %6770 = vmatmul.mubr.bf16.vlgmr.msra.gmra.mrb[60].mxu0 %v7939_v1  ;;  %v7290_v1 = vld [vmem:[%s8407_s10] sm:$0xff]  }
 0x60a   :  { %6787 = vmatprep.mubr.msk.bf16.mxu0 %vm7558_vm1, %v7557_v18 }
 0x6bc   :  { %v4398_v15 = vpop.f32.mrb[56].mxu0 }
 0x6bd   :  { %v6751_v16 = vpop.f32.mrb[57].mxu0  ;;  %v4399_v21 = vadd.f32 %v4398_v15, %v4356_v20 }
 0x6be   :  { %v4401_v17 = vpop.f32.mrb[58].mxu0 }
 0x6bf   :  { %v6752_v19 = vpop.f32.mrb[59].mxu0  ;;  %v4404_v22 = vmax.f32 %v4399_v21, 0.0 }
 0x6c1   :  { %v4576_v28 = vpack.c.bf16 %v4404_v22, %v4404_v22 }
 0x6c3   :  { %v4601_v31 = vsel %vm3286_vm2, %v4576_v28, 0 }
 0x6dc   :  { %v4505_v24 = vpop.f32.mrb[60].mxu0 }
 0x6dd   :  { %v4511_v25 = vpack.c.bf16 %v4505_v24, %v4505_v24  ;;  %v6771_v26 = vpop.f32.mrb[61].mxu0 }
 0x6de   :  { %v4508_v27 = vpop.f32.mrb[62].mxu0 }
 0x6df   :  { %v4533_v29 = vsel %vm3267_vm0, %v4511_v25, 0  ;;  %v6772_v30 = vpop.f32.mrb[63].mxu0 }
 0x6e0   :  { %6774 = vmatpush3.bf16.msra.mxu1 %v4533_v29 }
 0x6e1   :  { %6779 = vmatprep.subr.bf16.mxu1 %v7557_v18 }
 0x6e3   :  { %6776 = vmatmul.mubr.msk.bf16.vlgmr.msra.gmra.mrb[60].mxu1 %vm3339_vm4, %v7290_v1 }
 0x6e4   :  { %6780 = vmatpush3.bf16.msra.mxu1 %v4601_v31  ;;  %6781 = vmatprep.mubr.msk.bf16.mxu1 %vm7558_vm1, %v7557_v18 }
 0x6e5   :  { %6791 = vmatprep.subr.bf16.mxu1 %v7557_v18 }
 0x6ef   :  { %6782 = vmatmul.mubr.msk.bf16.vlgmr.msra.gmra.mrb[60].mxu1 %vm4596_vm5, %v7291_v23 }
 0x6f0   :  { %6795 = vmatprep.mubr.msk.bf16.mxu1 %vm7558_vm1, %v7557_v18  ;;  %6792 = vmatpush3.bf16.msra.mxu1 %v7292_v50 }
 0x6f1   :  { %6793 = vmatprep.subr.bf16.mxu1 %v7557_v18 }
 0x6f4   :  { %6794 = vmatpush3.bf16.msra.mxu1 %v7294_v52 }
 0x6f5   :  { %6807 = vmatprep.subr.bf16.mxu1 %v7557_v18 }
 0x7c2   :  { %v4637_v36 = vpop.f32.mrb[60].mxu1 }
 0x7c3   :  { %v8312_v37 = vadd.f32 %v6895_v34, %v4637_v36  ;;  %v6783_v38 = vpop.f32.mrb[61].mxu1 }
 0x7c4   :  { %v4640_v40 = vpop.f32.mrb[62].mxu1 }
 0x7c5   :  { %v8314_v41 = vadd.f32 %v6897_v44, %v4640_v40  ;;  %v6784_v42 = vpop.f32.mrb[63].mxu1  ;;  %v4646_v45 = vmax.f32 %v8312_v37, 0.0 }
 0x7c7   :  { %v4647_v46 = vmax.f32 %v8314_v41, 0.0 }
 0x7c9   :  { %v4648_v48 = vpack.c.bf16 %v4647_v46, %v4646_v45 }
 0x7cb   :  { %6786 = vmatpush3.bf16.msra.mxu0 %v4648_v48 }
 0x7cc   :  { %6799 = vmatprep.subr.bf16.mxu0 %v7557_v18 }
 0x7ce   :  { %6788 = vmatmul.mubr.msk.bf16.vlgmr.msra.gmra.mrb[64].mxu0 %vm4656_vm6, %v4649_v49 }
 0x7cf   :  { %6803 = vmatprep.mubr.msk.bf16.mxu0 %vm7558_vm1, %v7557_v18  ;;  %6800 = vmatpush3.bf16.msra.mxu0 %v7293_v51 }
 0x7d0   :  { %6801 = vmatprep.subr.bf16.mxu0 %v7557_v18 }
 0x7d3   :  { %6802 = vmatpush3.bf16.msra.mxu0 %v7295_v43 }
 0x7d4   :  { %6815 = vmatprep.subr.bf16.mxu0 %v7557_v18 }
 0x8a1   :  { %v4694_v54 = vpop.f32.mrb[64].mxu0 }
 0x8a2   :  { %v4695_v55 = vadd.f32 %v4694_v54, %v4654_v53  ;;  %v6789_v47 = vpop.f32.mrb[65].mxu0 }
 0x8a3   :  { %v4697_v56 = vpop.f32.mrb[66].mxu0 }
 0x8a4   :  { %v4700_v57 = vmax.f32 %v4695_v55, 0.0  ;;  %v6790_v58 = vpop.f32.mrb[67].mxu0 }
 0x8a5   :  { %v5228_v58 = vpop.permute.xlu0 %5227 }
 0x8a6   :  { %v4701_v61 = vpack.c.bf16 %v4700_v57, %v4700_v57  ;;  %v5223_v57 = vld [vmem:[#allocation12] sm:$0xf] }
 0x8a8   :  { %6796 = vmatmul.mubr.msk.bf16.vlgmr.msra.gmra.mrb[64].mxu1 %vm4718_vm7, %v4701_v61  ;;  %6804 = vmatmul.mubr.msk.bf16.vlgmr.msra.gmra.mrb[68].mxu0 %vm4718_vm7, %v4701_v61 }
 0x8a9   :  { %6808 = vmatpush3.bf16.msra.mxu1 %v7296_v59  ;;  %6816 = vmatpush3.bf16.msra.mxu0 %v7297_v60 }
 0x8aa   :  { %6809 = vmatprep.subr.bf16.mxu1 %v7557_v18  ;;  %6817 = vmatprep.subr.bf16.mxu0 %v7557_v18 }
 0x8ab   :  { %6811 = vmatprep.mubr.msk.bf16.mxu1 %vm7558_vm1, %v7557_v18  ;;  %6819 = vmatprep.mubr.msk.bf16.mxu0 %vm7558_vm1, %v7557_v18 }
 0x8ad   :  { %6810 = vmatpush3.bf16.msra.mxu1 %v7298_v62  ;;  %6818 = vmatpush3.bf16.msra.mxu0 %v7299_v63 }
 0x8ae   :  { %6823 = vmatprep.subr.bf16.mxu1 %v7557_v18  ;;  %6831 = vmatprep.subr.bf16.mxu0 %v7557_v18 }
 0x8b0   :  { %6812 = vmatmul.mubr.msk.bf16.vlgmr.msra.gmra.mrb[68].mxu1 %vm4718_vm7, %v4701_v61  ;;  %6820 = vmatmul.mubr.msk.bf16.vlgmr.msra.gmra.mrb[72].mxu0 %vm4718_vm7, %v4701_v61 }
 0x8b1   :  { %6824 = vmatpush3.bf16.msra.mxu1 %v7300_v0  ;;  %6832 = vmatpush3.bf16.msra.mxu0 %v7301_v2 }
 0x8b2   :  { %6825 = vmatprep.subr.bf16.mxu1 %v7557_v18  ;;  %6833 = vmatprep.subr.bf16.mxu0 %v7557_v18 }
 0x8b3   :  { %6827 = vmatprep.mubr.msk.bf16.mxu1 %vm7558_vm1, %v7557_v18  ;;  %6835 = vmatprep.mubr.msk.bf16.mxu0 %vm7558_vm1, %v7557_v18 }
 0x8b5   :  { %6826 = vmatpush3.bf16.msra.mxu1 %v7302_v3  ;;  %6834 = vmatpush3.bf16.msra.mxu0 %v7303_v4  ;;  %v7310_v4 = vld [vmem:[%s8416_s19] sm:$0xff]  }
 0x8b6   :  { %6839 = vmatprep.subr.bf16.mxu1 %v7557_v18  ;;  %6847 = vmatprep.subr.bf16.mxu0 %v7557_v18 }
 0x8b8   :  { %6828 = vmatmul.mubr.msk.bf16.vlgmr.msra.gmra.mrb[72].mxu1 %vm4718_vm7, %v4701_v61  ;;  %6836 = vmatmul.mubr.msk.bf16.vlgmr.msra.gmra.mrb[76].mxu0 %vm4718_vm7, %v4701_v61 }
 0x8b9   :  { %6840 = vmatpush3.bf16.msra.mxu1 %v7304_v5  ;;  %6848 = vmatpush3.bf16.msra.mxu0 %v7305_v6  ;;  %v5286_v5 = vpop.permute.xlu1 %5285 }
 0x8ba   :  { %6841 = vmatprep.subr.bf16.mxu1 %v7557_v18  ;;  %6849 = vmatprep.subr.bf16.mxu0 %v7557_v18 }
 0x8bb   :  { %6843 = vmatprep.mubr.msk.bf16.mxu1 %vm7558_vm1, %v7557_v18  ;;  %6851 = vmatprep.mubr.msk.bf16.mxu0 %vm7558_vm1, %v7557_v18 }
 0x8bd   :  { %6842 = vmatpush3.bf16.msra.mxu1 %v7306_v7  ;;  %6850 = vmatpush3.bf16.msra.mxu0 %v7307_v8 }
 0x8be   :  { %6855 = vmatprep.subr.bf16.mxu1 %v7557_v18  ;;  %6863 = vmatprep.subr.bf16.mxu0 %v7557_v18 }
 0x8c0   :  { %6844 = vmatmul.mubr.msk.bf16.vlgmr.msra.gmra.mrb[76].mxu1 %vm4718_vm7, %v4701_v61  ;;  %6852 = vmatmul.mubr.msk.bf16.vlgmr.msra.gmra.mrb[80].mxu0 %vm4718_vm7, %v4701_v61 }
 0x8c1   :  { %6856 = vmatpush3.bf16.msra.mxu1 %v7308_v9  ;;  %6859 = vmatprep.mubr.msk.bf16.mxu1 %vm7558_vm1, %v7557_v18  ;;  %v5291_v9 = vpop.permute.xlu0 %5290 }
 0x8c2   :  { %6857 = vmatprep.subr.bf16.mxu1 %v7557_v18  ;;  %6873 = vmatprep.mubr.msk.bf16.mxu0 %vm7558_vm1, %v7557_v18 }
 0x8c5   :  { %6858 = vmatpush3.bf16.msra.mxu1 %v7309_v10 }
 0x8c6   :  { %6877 = vmatprep.subr.bf16.mxu1 %v7557_v18 }
 0x8c8   :  { %6860 = vmatmul.mubr.msk.bf16.vlgmr.msra.gmra.mrb[80].mxu1 %vm4718_vm7, %v4701_v61 }
 0x8c9   :  { %6879 = vmatprep.mubr.msk.bf16.mxu1 %vm7558_vm1, %v7557_v18 }
 0x97b   :  { %v4756_v11 = vpop.f32.mrb[64].mxu1  ;;  %v4813_v12 = vpop.f32.mrb[68].mxu0 }
 0x97c   :  { %v5218_v13 = vpack.c.bf16 %v4813_v12, %v4756_v11  ;;  %v6797_v14 = vpop.f32.mrb[65].mxu1  ;;  %v6805_v15 = vpop.f32.mrb[69].mxu0 }
 0x97d   :  { %v4759_v16 = vpop.f32.mrb[66].mxu1  ;;  %v4816_v17 = vpop.f32.mrb[70].mxu0 }
 0x97e   :  { %v6798_v19 = vpop.f32.mrb[67].mxu1  ;;  %v6806_v20 = vpop.f32.mrb[71].mxu0  ;;  %6864 = vmatpush3.bf16.msra.mxu0 %v5218_v13 }
 0x97f   :  { %6865 = vmatprep.subr.bf16.mxu0 %v7557_v18  ;;  %v5349_v20 = vld [vmem:[#allocation13] sm:$0x1] }
 0x983   :  { %v4870_v21 = vpop.f32.mrb[68].mxu1  ;;  %v4927_v22 = vpop.f32.mrb[72].mxu0 }
 0x984   :  { %v5219_v24 = vpack.c.bf16 %v4927_v22, %v4870_v21  ;;  %v6813_v25 = vpop.f32.mrb[69].mxu1  ;;  %v6821_v26 = vpop.f32.mrb[73].mxu0  ;;  %v7311_v21 = vld [vmem:[#allocation15] sm:$0xff]  }
 0x985   :  { %v4873_v27 = vpop.f32.mrb[70].mxu1  ;;  %v4930_v28 = vpop.f32.mrb[74].mxu0 }
 0x986   :  { %v6814_v29 = vpop.f32.mrb[71].mxu1  ;;  %v6822_v30 = vpop.f32.mrb[75].mxu0  ;;  %6866 = vmatpush3.bf16.msra.mxu0 %v5219_v24  ;;  %v6003_v24 = vld [vmem:[#allocation16] ss:$0 sm:$0xff] }
 0x987   :  { %6867 = vmatprep.subr.bf16.mxu0 %v7557_v18 }
 0x98b   :  { %v4984_v1 = vpop.f32.mrb[72].mxu1  ;;  %v5041_v31 = vpop.f32.mrb[76].mxu0 }
 0x98c   :  { %v5220_v23 = vpack.c.bf16 %v5041_v31, %v4984_v1  ;;  %v6829_v32 = vpop.f32.mrb[73].mxu1  ;;  %v6837_v33 = vpop.f32.mrb[77].mxu0 }
 0x98d   :  { %v4987_v39 = vpop.f32.mrb[74].mxu1  ;;  %v5044_v34 = vpop.f32.mrb[78].mxu0 }
 0x98e   :  { %v6830_v35 = vpop.f32.mrb[75].mxu1  ;;  %v6838_v36 = vpop.f32.mrb[79].mxu0  ;;  %6868 = vmatpush3.bf16.msra.mxu0 %v5220_v23 }
 0x98f   :  { %6869 = vmatprep.subr.bf16.mxu0 %v7557_v18 }
 0x993   :  { %v5098_v44 = vpop.f32.mrb[76].mxu1  ;;  %v5155_v38 = vpop.f32.mrb[80].mxu0 }
 0x994   :  { %v5221_v40 = vpack.c.bf16 %v5155_v38, %v5098_v44  ;;  %v6845_v42 = vpop.f32.mrb[77].mxu1  ;;  %v6853_v48 = vpop.f32.mrb[81].mxu0 }
 0x995   :  { %v5101_v49 = vpop.f32.mrb[78].mxu1  ;;  %v5158_v50 = vpop.f32.mrb[82].mxu0 }
 0x996   :  { %v6846_v51 = vpop.f32.mrb[79].mxu1  ;;  %v6854_v52 = vpop.f32.mrb[83].mxu0  ;;  %6870 = vmatpush3.bf16.msra.mxu0 %v5221_v40 }
 0x997   :  { %6871 = vmatprep.subr.bf16.mxu0 %v7557_v18 }
 0x99b   :  { %v5212_v43 = vpop.f32.mrb[80].mxu1 }
 0x99c   :  { %v5222_v53 = vpack.c.bf16 %v5212_v43, %v5212_v43  ;;  %v6861_v54 = vpop.f32.mrb[81].mxu1 }
 0x99d   :  { %v5215_v55 = vpop.f32.mrb[82].mxu1 }
 0x99e   :  { %v5235_v47 = vsel %vm3267_vm0, %v5222_v53, 0  ;;  %v6862_v56 = vpop.f32.mrb[83].mxu1 }
 0x99f   :  { %6872 = vmatpush3.bf16.msra.mxu0 %v5235_v47 }
 0x9a2   :  { %6874 = vmatmul.mubr.msk.bf16.vlgmr.msra.gmra.mrb[84].mxu0 %vm5230_vm8, %v5223_v57 }
 0xa75   :  { %v5271_v59 = vpop.f32.mrb[84].mxu0 }
 0xa76   :  { %v5272_v60 = vadd.f32 %v5271_v59, %v5228_v58  ;;  %v6875_v61 = vpop.f32.mrb[85].mxu0 }
 0xa77   :  { %v5274_v62 = vpop.f32.mrb[86].mxu0 }
 0xa78   :  { %v5277_v63 = vmax.f32 %v5272_v60, 0.0  ;;  %v6876_v0 = vpop.f32.mrb[87].mxu0 }
 0xa7a   :  { %v5278_v2 = vpack.c.bf16 %v5277_v63, %v5277_v63 }
 0xa7c   :  { %v5302_v3 = vsel %vm3267_vm0, %v5278_v2, 0 }
 0xa7d   :  { %6878 = vmatpush3.bf16.msra.mxu1 %v5302_v3 }
 0xa7e   :  { %6883 = vmatprep.subr.bf16.mxu1 %v7557_v18 }
 0xa80   :  { %6880 = vmatmul.mubr.msk.bf16.vlgmr.msra.gmra.mrb[84].mxu1 %vm3339_vm4, %v7310_v4 }
 0xa81   :  { %6885 = vmatprep.mubr.msk.bf16.mxu1 %vm7558_vm1, %v7557_v18 }
 0xb53   :  { %v5338_v6 = vpop.f32.mrb[84].mxu1 }
 0xb54   :  { %v5339_v7 = vadd.f32 %v5338_v6, %v5286_v5  ;;  %v6881_v8 = vpop.f32.mrb[85].mxu1 }
 0xb55   :  { %v5341_v10 = vpop.f32.mrb[86].mxu1 }
 0xb56   :  { %v5345_v11 = vadd.f32 %v5339_v7, %v4646_v45  ;;  %v5342_v12 = vadd.f32 %v5341_v10, %v5291_v9  ;;  %v6882_v13 = vpop.f32.mrb[87].mxu1 }
 0xb58   :  { %v5346_v14 = vadd.f32 %v5342_v12, %v4647_v46  ;;  %v5347_v15 = vmax.f32 %v5345_v11, 0.0 }
 0xb5a   :  { %v5348_v16 = vmax.f32 %v5346_v14, 0.0 }
 0xb5c   :  { %v5350_v17 = vpack.c.bf16 %v5348_v16, %v5347_v15 }
 0xb5e   :  { %v5355_v19 = vsel %vm4718_vm7, %v5350_v17, 0 }
 0xb5f   :  { %6884 = vmatpush3.bf16.xpose.msra.mxu1 %v5355_v19 }
 0xb60   :  { %6889 = vmatprep.subr.bf16.mxu1 %v7557_v18 }
 0xb66   :  { %6886 = vmatmul.mubr.msk.bf16.vlgmr.msra.gmra.mrb[88].mxu1 %vm4718_vm7, %v5349_v20 }
 0xb67   :  { %6890 = vmatpush3.bf16.msra.mxu1 %v7311_v21  ;;  %6891 = vmatprep.mubr.msk.bf16.mxu1 %vm7558_vm1, %v7557_v18 }
 0xc39   :  { %v5391_v37 = vpop.f32.mrb[88].mxu1 }
 0xc3a   :  { %v5397_v45 = vpack.c.bf16 %v5391_v37, %v5391_v37  ;;  %v6887_v41 = vpop.f32.mrb[89].mxu1 }
 0xc3b   :  { %v5394_v46 = vpop.f32.mrb[90].mxu1 }
 0xc3c   :  { %v6888_v22 = vpop.f32.mrb[91].mxu1  ;;  %6892 = vmatmul.mubr.msk.bf16.vlgmr.msra.gmra.mrb[92].mxu1 %vm4656_vm6, %v5397_v45 }
 0xd0f   :  { %v5450_v25 = vpop.f32.mrb[92].mxu1 }
 0xd10   :  { %v5451_v26 = vadd.f32 %v6003_v24, %v5450_v25  ;;  %v6893_v27 = vpop.f32.mrb[93].mxu1 }
 0xd11   :  { %v5453_v28 = vpop.f32.mrb[94].mxu1 }
 0xd12   :  { %5457 = vst.msk [vmem:[%s8421_s24] sm:$0x3] %vm5456_vm9, %v5451_v26  ;;  %v6894_v29 = vpop.f32.mrb[95].mxu1 }
 0xd13   :  { %5462 = vsyncpa [#allocation3], 1 }
 0xd14   :  { %5463 = vsyncpa [#allocation5], 1 }
 0xd15   :  { %5464 = vsyncpa [#allocation8], 1 }
 0xd16   :  { %5465 = vsyncpa [#allocation11], 1 }
 0xd17   :  { %5466 = vsyncpa [#allocation14], 1 }
 0xd18   :  { %5467 = vsyncpa [#allocation17], 1 }

</bundles_post_ra>
